<compile_context>
chip_gen: v5e
topology: v5e:2x2
jax: 0.10.0
libtpu: 0.0.40
codegen_flags: <defaults>
</compile_context>

<pallas_src>
from math import sqrt

import jax
import jax.numpy as jnp
from jax.experimental import pallas as pl
from jax.experimental.pallas import tpu as pltpu


# --------------------------------------------------------------------------- #
# Sizing helpers (generation-aware VMEM budgeting)
# --------------------------------------------------------------------------- #
def _vmem_capacity_bytes():
    try:
        return int(pltpu.get_tpu_info().vmem_capacity_bytes)
    except Exception:
        return 128 * 1024 * 1024  # conservative v5e/v6e default


def _rup(n, m):
    return ((n + m - 1) // m) * m


def _pick_seq_tile(L, cap=128):
    """Largest query tile <= cap that keeps the BlockSpec (8,128)-legal."""
    if L <= cap:
        return L
    for t in range(cap, 7, -1):
        if L % t == 0 and t % 8 == 0:
            return t
    # TODO(synk): pad L to a multiple of 8 instead of falling back to the full
    # sequence (awkward/prime L can otherwise blow up the VMEM working set).
    return L


def _pick_batch_tile(B, Lt, target_rows):
    """Pack batch rows per grid step so the flattened M dim is ~target_rows."""
    cap = max(1, target_rows // max(Lt, 1))
    bt = 1
    for t in range(1, min(B, cap) + 1):
        if B % t == 0:
            bt = t
    return bt


def _estimate_vmem_bytes(Bt, Lt, S, d_model, H, dk, dv):
    """Rough padded VMEM working-set estimate for the chosen tiles."""
    f32, bf = 4, 2
    rows = Bt * Lt
    q_blk = 2 * Bt * _rup(Lt, 8) * _rup(d_model, 128) * f32          # double-buffered
    o_blk = 2 * Bt * _rup(Lt, 8) * _rup(d_model, 128) * f32          # double-buffered
    kv_blk = 2 * Bt * _rup(S, 8) * _rup(d_model, 128) * f32          # K + V (single-buf)
    kv_scr = Bt * H * _rup(S, 8) * (_rup(dk, 128) + _rup(dv, 128)) * bf
    w = bf * (2 * _rup(d_model, 8) * _rup(H * dk, 128)
              + _rup(d_model, 8) * _rup(H * dv, 128)
              + _rup(H * dv, 8) * _rup(d_model, 128))
    scores = 2 * Bt * H * _rup(Lt, 8) * _rup(S, 128) * f32           # s and p
    interm = rows * (_rup(H * dk, 128) + _rup(H * dv, 128) + _rup(d_model, 128)) * f32
    return q_blk + o_blk + kv_blk + kv_scr + w + scores + interm


# --------------------------------------------------------------------------- #
# Kernel factory
# --------------------------------------------------------------------------- #
def make_attention_layer_kernel(B, L, S, d_model, n_heads, d_keys, d_values,
                                Bt=None, Lt=None, single_buffer_constants=True,
                                out_dtype=jnp.float32):
    H, dk, dv = n_heads, d_keys, d_values
    bf16 = jnp.bfloat16

    # ---- generation-aware VMEM budget + tile selection -----------------------
    vmem_cap = _vmem_capacity_bytes()
    vmem_limit = min(int(vmem_cap * 0.75), 96 * 1024 * 1024)   # 96 MiB on 128 MiB
    target_rows = 512 if vmem_cap >= 96 * 1024 * 1024 else 256  # parts, 48 MiB on v7x

    Lt = Lt or _pick_seq_tile(L)
    Bt = Bt or _pick_batch_tile(B, Lt, target_rows)
    budget = int(vmem_limit * 0.7)
    while _estimate_vmem_bytes(Bt, Lt, S, d_model, H, dk, dv) > budget:
        if Bt > 1:
            Bt = max(d for d in range(1, Bt) if B % d == 0)
        else:
            smaller = [t for t in range(8, Lt, 8) if L % t == 0]
            if not smaller:
                break  # nothing legal left; rely on vmem_limit headroom
            Lt = max(smaller)
    assert B % Bt == 0 and L % Lt == 0

    # ---- kernel body ----------------------------------------------------------
    def kernel(q_ref, k_ref, v_ref, wq, bq, wk, bk, wv, bv, wo, bo,
               out_ref, k_scr, v_scr):
        # K/V projections + head grouping: ONCE per batch block (first q tile).
        @pl.when(pl.program_id(1) == 0)
        def _():
            kx = k_ref[...].reshape(Bt * S, d_model).astype(bf16)
            vx = v_ref[...].reshape(Bt * S, d_model).astype(bf16)
            K = jnp.dot(kx, wk[...], preferred_element_type=jnp.float32) + bk[...]
            V = jnp.dot(vx, wv[...], preferred_element_type=jnp.float32) + bv[...]
            k_scr[...] = jnp.transpose(K.reshape(Bt, S, H, dk), (0, 2, 1, 3)
                                       ).reshape(Bt * H, S, dk).astype(bf16)
            v_scr[...] = jnp.transpose(V.reshape(Bt, S, H, dv), (0, 2, 1, 3)
                                       ).reshape(Bt * H, S, dv).astype(bf16)

        # Q projection (1/sqrt(dk) already folded into wq/bq at call boundary).
        qx = q_ref[...].reshape(Bt * Lt, d_model).astype(bf16)
        Q = jnp.dot(qx, wq[...], preferred_element_type=jnp.float32) + bq[...]
        Qh = jnp.transpose(Q.reshape(Bt, Lt, H, dk), (0, 2, 1, 3)
                           ).reshape(Bt * H, Lt, dk).astype(bf16)

        # One batched multi-head contraction (heads live in the batch dim).
        s = jnp.einsum('ble,bse->bls', Qh, k_scr[...],
                       preferred_element_type=jnp.float32)        # (Bt*H, Lt, S)
        # TODO(synk): for long S, replace this single-pass softmax with a
        # flash-style online-softmax loop over S tiles (third "arbitrary" grid
        # axis) so the (Bt*H, Lt, S) scores never materialize.
        s = s - jnp.max(s, axis=-1, keepdims=True)
        p = jnp.exp(s)
        p = p * pl.reciprocal(jnp.sum(p, axis=-1, keepdims=True), approx=True)
        o = jnp.einsum('bls,bsd->bld', p.astype(bf16), v_scr[...],
                       preferred_element_type=jnp.float32)        # (Bt*H, Lt, dv)

        # Re-assemble heads lane-dense in registers; output projection; one
        # dense (Bt, Lt, d_model) store (no per-head masked partial stores).
        o = jnp.transpose(o.reshape(Bt, H, Lt, dv), (0, 2, 1, 3)
                          ).reshape(Bt * Lt, H * dv).astype(bf16)
        out = jnp.dot(o, wo[...], preferred_element_type=jnp.float32) + bo[...]
        out_ref[...] = out.reshape(Bt, Lt, d_model).astype(out_ref.dtype)

    # ---- BlockSpecs -----------------------------------------------------------
    const_kwargs = {}
    if single_buffer_constants:
        # Constant block index along the inner axis -> single-buffer to halve
        # their VMEM footprint (matters on v7x's 64 MiB VMEM).
        const_kwargs = dict(pipeline_mode=pl.Buffered(1))

    def const_spec(shape, index_map):
        return pl.BlockSpec(shape, index_map, **const_kwargs)

    def w_spec(shape):
        return const_spec(shape, lambda b, l, _s=shape: tuple(0 for _ in _s))

    grid_spec = pltpu.PrefetchScalarGridSpec(
        num_scalar_prefetch=0,
        grid=(B // Bt, L // Lt),
        in_specs=[
            pl.BlockSpec((Bt, Lt, d_model), lambda b, l: (b, l, 0)),   # queries
            const_spec((Bt, S, d_model), lambda b, l: (b, 0, 0)),      # keys
            const_spec((Bt, S, d_model), lambda b, l: (b, 0, 0)),      # values
            w_spec((d_model, H * dk)), w_spec((1, H * dk)),            # Wq, bq
            w_spec((d_model, H * dk)), w_spec((1, H * dk)),            # Wk, bk
            w_spec((d_model, H * dv)), w_spec((1, H * dv)),            # Wv, bv
            w_spec((H * dv, d_model)), w_spec((1, d_model)),           # Wo, bo
        ],
        out_specs=pl.BlockSpec((Bt, Lt, d_model), lambda b, l: (b, l, 0)),
        scratch_shapes=[pltpu.VMEM((Bt * H, S, dk), bf16),   # projected K (head-grouped)
                        pltpu.VMEM((Bt * H, S, dv), bf16)],  # projected V (head-grouped)
    )

    # ---- cost estimate (helps XLA schedule around the kernel) ----------------
    flops = (2 * B * L * d_model * H * dk              # Q projection
             + 2 * B * S * d_model * H * (dk + dv)     # K/V projections (once per batch blk)
             + 2 * B * H * L * S * (dk + dv)           # scores + PV
             + 2 * B * L * H * dv * d_model)           # output projection
    transcendentals = B * H * L * S                    # softmax exp
    bytes_accessed = (4 * B * L * d_model              # queries (f32 in)
                      + 2 * 4 * B * S * d_model        # keys + values (f32 in)
                      + 4 * B * L * d_model            # output (f32)
                      + 2 * (2 * d_model * H * dk + d_model * H * dv + H * dv * d_model)
                      + 4 * (2 * H * dk + H * dv + d_model))

    return pl.pallas_call(
        kernel,
        out_shape=jax.ShapeDtypeStruct((B, L, d_model), out_dtype),
        grid_spec=grid_spec,
        compiler_params=pltpu.CompilerParams(
            dimension_semantics=("parallel", "arbitrary"),
            vmem_limit_bytes=vmem_limit,
        ),
        cost_estimate=pl.CostEstimate(flops=flops,
                                      transcendentals=transcendentals,
                                      bytes_accessed=bytes_accessed),
    )


# --------------------------------------------------------------------------- #
# Wrapper (mirrors AttentionLayer.forward, mix=False, FullAttention)
# --------------------------------------------------------------------------- #
def attention_layer_forward(queries, keys, values, params, n_heads):
    """Returns (out, additional_info). additional_info is None (no attn map)."""
    B, L, d_model = queries.shape
    _, S, _ = keys.shape
    d_keys = params["wq"].shape[1] // n_heads
    d_values = params["wv"].shape[1] // n_heads
    bf16 = jnp.bfloat16
    scale = 1.0 / sqrt(d_keys)

    # One-time weight prep outside the hot loop: fold the 1/sqrt(dk) score
    # scale into the query projection, cast weights to bf16 for the MXU, and
    # present biases as 2-D (1, N) for a clean sublane-broadcast add.
    wq = (params["wq"] * scale).astype(bf16)
    bq = (params["bq"] * scale).reshape(1, -1)
    wk = params["wk"].astype(bf16)
    bk = params["bk"].reshape(1, -1)
    wv = params["wv"].astype(bf16)
    bv = params["bv"].reshape(1, -1)
    wo = params["wo"].astype(bf16)
    bo = params["bo"].reshape(1, -1)
    args = (queries, keys, values, wq, bq, wk, bk, wv, bv, wo, bo)

    # Prefer single-buffered constant operands (pl.Buffered(1)); fall back to
    # default double-buffering if this jax build rejects that pipeline mode.
    out = None
    for single_buffer in (True, False):
        f = make_attention_layer_kernel(B, L, S, d_model, n_heads, d_keys,
                                        d_values,
                                        single_buffer_constants=single_buffer)
        try:
            out = f(*args)
            break
        except Exception:
            if not single_buffer:
                raise
    return out, None  # FullAttention(output_attention=False) -> no attn map


# --------------------------------------------------------------------------- #
# Params + pure-JAX reference
# --------------------------------------------------------------------------- #
def init_params(key, d_model, n_heads, d_keys=None, d_values=None):
    d_keys = d_keys or d_model // n_heads
    d_values = d_values or d_model // n_heads
    ks = jax.random.split(key, 8)

    def linear(kw, kb, fan_in, fan_out):
        # torch nn.Linear init: U(-1/sqrt(fan_in), 1/sqrt(fan_in)); stored as (in, out)
        bound = 1.0 / sqrt(fan_in)
        w = jax.random.uniform(kw, (fan_in, fan_out), jnp.float32, -bound, bound)
        b = jax.random.uniform(kb, (fan_out,), jnp.float32, -bound, bound)
        return w, b

    wq, bq = linear(ks[0], ks[1], d_model, d_keys * n_heads)
    wk, bk = linear(ks[2], ks[3], d_model, d_keys * n_heads)
    wv, bv = linear(ks[4], ks[5], d_model, d_values * n_heads)
    wo, bo = linear(ks[6], ks[7], d_values * n_heads, d_model)
    return dict(wq=wq, bq=bq, wk=wk, bk=bk, wv=wv, bv=bv, wo=wo, bo=bo)


def reference_forward(queries, keys, values, params, n_heads):
    """Pure-JAX f32 reference matching the PyTorch module (mix=False, FullAttention)."""
    B, L, d_model = queries.shape
    _, S, _ = keys.shape
    H = n_heads
    Q = (queries @ params["wq"] + params["bq"]).reshape(B, L, H, -1)
    K = (keys @ params["wk"] + params["bk"]).reshape(B, S, H, -1)
    V = (values @ params["wv"] + params["bv"]).reshape(B, S, H, -1)
    E = Q.shape[-1]
    scores = jnp.einsum("blhe,bshe->bhls", Q, K) / sqrt(E)
    A = jax.nn.softmax(scores, axis=-1)
    out = jnp.einsum("bhls,bshd->blhd", A, V).reshape(B, L, -1)
    return out @ params["wo"] + params["bo"]


if __name__ == "__main__":
    B, L, S = 2, 8, 8
    d_model, n_heads = 32, 4

    key = jax.random.PRNGKey(0)
    kq, kk, kv, kp = jax.random.split(key, 4)
    queries = jax.random.normal(kq, (B, L, d_model), jnp.float32)
    keys_in = jax.random.normal(kk, (B, S, d_model), jnp.float32)
    values = jax.random.normal(kv, (B, S, d_model), jnp.float32)
    params = init_params(kp, d_model, n_heads)

    out, info = attention_layer_forward(queries, keys_in, values, params, n_heads)
    out = jax.block_until_ready(out)

    ref = reference_forward(queries, keys_in, values, params, n_heads)
    assert out.shape == (B, L, d_model)
    assert info is None
    # bf16 MXU operands + approx reciprocal (f32 accumulation) -> loosened tolerance.
    assert jnp.allclose(out, ref, atol=5e-2, rtol=5e-2), "mismatch vs reference"
    print("KERNEL_OK")
</pallas_src>

<mosaic_0001>
module attributes {stable_mosaic.version = 11 : i64} {
  func.func @kernel(%arg0: i32, %arg1: i32, %arg2: memref<2x8x32xf32, #tpu.memory_space<vmem>>, %arg3: memref<2x8x32xf32, #tpu.memory_space<vmem>>, %arg4: memref<2x8x32xf32, #tpu.memory_space<vmem>>, %arg5: memref<32x32xbf16, #tpu.memory_space<vmem>>, %arg6: memref<1x32xf32, #tpu.memory_space<vmem>>, %arg7: memref<32x32xbf16, #tpu.memory_space<vmem>>, %arg8: memref<1x32xf32, #tpu.memory_space<vmem>>, %arg9: memref<32x32xbf16, #tpu.memory_space<vmem>>, %arg10: memref<1x32xf32, #tpu.memory_space<vmem>>, %arg11: memref<32x32xbf16, #tpu.memory_space<vmem>>, %arg12: memref<1x32xf32, #tpu.memory_space<vmem>>, %arg13: memref<2x8x32xf32, #tpu.memory_space<vmem>>, %arg14: memref<8x8x8xbf16, #tpu.memory_space<vmem>>, %arg15: memref<8x8x8xbf16, #tpu.memory_space<vmem>>) attributes {dimension_semantics = [#tpu.dimension_semantics<parallel>, #tpu.dimension_semantics<arbitrary>], iteration_bounds = array<i64: 1, 1>, scalar_prefetch = 0 : i64, scratch_operands = 2 : i64, tpu.core_type = #tpu.core_type<tc>, window_params = [{transform_indices = @transform_0, window_bounds = array<i64: 2, 8, 32>}, {pipeline_mode = #tpu.pipeline_mode<synchronous>, transform_indices = @transform_1, window_bounds = array<i64: 2, 8, 32>}, {pipeline_mode = #tpu.pipeline_mode<synchronous>, transform_indices = @transform_2, window_bounds = array<i64: 2, 8, 32>}, {pipeline_mode = #tpu.pipeline_mode<synchronous>, transform_indices = @transform_3, window_bounds = array<i64: 32, 32>}, {pipeline_mode = #tpu.pipeline_mode<synchronous>, transform_indices = @transform_4, window_bounds = array<i64: 1, 32>}, {pipeline_mode = #tpu.pipeline_mode<synchronous>, transform_indices = @transform_5, window_bounds = array<i64: 32, 32>}, {pipeline_mode = #tpu.pipeline_mode<synchronous>, transform_indices = @transform_6, window_bounds = array<i64: 1, 32>}, {pipeline_mode = #tpu.pipeline_mode<synchronous>, transform_indices = @transform_7, window_bounds = array<i64: 32, 32>}, {pipeline_mode = #tpu.pipeline_mode<synchronous>, transform_indices = @transform_8, window_bounds = array<i64: 1, 32>}, {pipeline_mode = #tpu.pipeline_mode<synchronous>, transform_indices = @transform_9, window_bounds = array<i64: 32, 32>}, {pipeline_mode = #tpu.pipeline_mode<synchronous>, transform_indices = @transform_10, window_bounds = array<i64: 1, 32>}, {transform_indices = @transform_11, window_bounds = array<i64: 2, 8, 32>}]} {
    %c0_i32 = arith.constant 0 : i32
    %0 = arith.cmpi eq, %arg1, %c0_i32 : i32
    %1 = arith.extui %0 : i1 to i32
    %c0_i32_0 = arith.constant 0 : i32
    %2 = arith.cmpi ne, %1, %c0_i32_0 : i32
    scf.if %2 {
      %c0_25 = arith.constant 0 : index
      %c0_26 = arith.constant 0 : index
      %c0_27 = arith.constant 0 : index
      %41 = vector.load %arg3[%c0_25, %c0_26, %c0_27] : memref<2x8x32xf32, #tpu.memory_space<vmem>>, vector<2x8x32xf32>
      %42 = vector.shape_cast %41 : vector<2x8x32xf32> to vector<16x32xf32>
      %43 = arith.truncf %42 : vector<16x32xf32> to vector<16x32xbf16>
      %c0_28 = arith.constant 0 : index
      %c0_29 = arith.constant 0 : index
      %c0_30 = arith.constant 0 : index
      %44 = vector.load %arg4[%c0_28, %c0_29, %c0_30] : memref<2x8x32xf32, #tpu.memory_space<vmem>>, vector<2x8x32xf32>
      %45 = vector.shape_cast %44 : vector<2x8x32xf32> to vector<16x32xf32>
      %46 = arith.truncf %45 : vector<16x32xf32> to vector<16x32xbf16>
      %c0_31 = arith.constant 0 : index
      %c0_32 = arith.constant 0 : index
      %47 = vector.load %arg7[%c0_31, %c0_32] : memref<32x32xbf16, #tpu.memory_space<vmem>>, vector<32x32xbf16>
      %cst_33 = arith.constant dense<0.000000e+00> : vector<16x32xf32>
      %48 = tpu.matmul %43, %47, %cst_33 {dimension_numbers = #tpu.dot_dimension_numbers<[1], [0], [0], [1], [0, 0, 1, 1], [], []>} : vector<16x32xbf16>, vector<32x32xbf16>, vector<16x32xf32> -> vector<16x32xf32>
      %c0_34 = arith.constant 0 : index
      %c0_35 = arith.constant 0 : index
      %49 = vector.load %arg8[%c0_34, %c0_35] : memref<1x32xf32, #tpu.memory_space<vmem>>, vector<1x32xf32>
      %50 = vector.broadcast %49 : vector<1x32xf32> to vector<16x32xf32>
      %51 = arith.addf %48, %50 : vector<16x32xf32>
      %c0_36 = arith.constant 0 : index
      %c0_37 = arith.constant 0 : index
      %52 = vector.load %arg9[%c0_36, %c0_37] : memref<32x32xbf16, #tpu.memory_space<vmem>>, vector<32x32xbf16>
      %cst_38 = arith.constant dense<0.000000e+00> : vector<16x32xf32>
      %53 = tpu.matmul %46, %52, %cst_38 {dimension_numbers = #tpu.dot_dimension_numbers<[1], [0], [0], [1], [0, 0, 1, 1], [], []>} : vector<16x32xbf16>, vector<32x32xbf16>, vector<16x32xf32> -> vector<16x32xf32>
      %c0_39 = arith.constant 0 : index
      %c0_40 = arith.constant 0 : index
      %54 = vector.load %arg10[%c0_39, %c0_40] : memref<1x32xf32, #tpu.memory_space<vmem>>, vector<1x32xf32>
      %55 = vector.broadcast %54 : vector<1x32xf32> to vector<16x32xf32>
      %56 = arith.addf %53, %55 : vector<16x32xf32>
      %57 = vector.shape_cast %51 : vector<16x32xf32> to vector<2x8x4x8xf32>
      %58 = tpu.transpose %57, [0, 2, 1, 3] : vector<2x8x4x8xf32> -> vector<2x4x8x8xf32>
      %59 = vector.shape_cast %58 : vector<2x4x8x8xf32> to vector<8x8x8xf32>
      %60 = arith.truncf %59 : vector<8x8x8xf32> to vector<8x8x8xbf16>
      %c0_41 = arith.constant 0 : index
      %c0_42 = arith.constant 0 : index
      %c0_43 = arith.constant 0 : index
      %61 = vector.load %arg14[%c0_41, %c0_42, %c0_43] : memref<8x8x8xbf16, #tpu.memory_space<vmem>>, vector<8x8x8xbf16>
      tpu.vector_store %arg14[%c0_41, %c0_42, %c0_43], %60 {strides = array<i32>} : memref<8x8x8xbf16, #tpu.memory_space<vmem>>, vector<8x8x8xbf16>,
      %62 = vector.shape_cast %56 : vector<16x32xf32> to vector<2x8x4x8xf32>
      %63 = tpu.transpose %62, [0, 2, 1, 3] : vector<2x8x4x8xf32> -> vector<2x4x8x8xf32>
      %64 = vector.shape_cast %63 : vector<2x4x8x8xf32> to vector<8x8x8xf32>
      %65 = arith.truncf %64 : vector<8x8x8xf32> to vector<8x8x8xbf16>
      %c0_44 = arith.constant 0 : index
      %c0_45 = arith.constant 0 : index
      %c0_46 = arith.constant 0 : index
      %66 = vector.load %arg15[%c0_44, %c0_45, %c0_46] : memref<8x8x8xbf16, #tpu.memory_space<vmem>>, vector<8x8x8xbf16>
      tpu.vector_store %arg15[%c0_44, %c0_45, %c0_46], %65 {strides = array<i32>} : memref<8x8x8xbf16, #tpu.memory_space<vmem>>, vector<8x8x8xbf16>,
    } else {
    }
    %c0 = arith.constant 0 : index
    %c0_1 = arith.constant 0 : index
    %c0_2 = arith.constant 0 : index
    %3 = vector.load %arg2[%c0, %c0_1, %c0_2] : memref<2x8x32xf32, #tpu.memory_space<vmem>>, vector<2x8x32xf32>
    %4 = vector.shape_cast %3 : vector<2x8x32xf32> to vector<16x32xf32>
    %5 = arith.truncf %4 : vector<16x32xf32> to vector<16x32xbf16>
    %c0_3 = arith.constant 0 : index
    %c0_4 = arith.constant 0 : index
    %6 = vector.load %arg5[%c0_3, %c0_4] : memref<32x32xbf16, #tpu.memory_space<vmem>>, vector<32x32xbf16>
    %cst = arith.constant dense<0.000000e+00> : vector<16x32xf32>
    %7 = tpu.matmul %5, %6, %cst {dimension_numbers = #tpu.dot_dimension_numbers<[1], [0], [0], [1], [0, 0, 1, 1], [], []>} : vector<16x32xbf16>, vector<32x32xbf16>, vector<16x32xf32> -> vector<16x32xf32>
    %c0_5 = arith.constant 0 : index
    %c0_6 = arith.constant 0 : index
    %8 = vector.load %arg6[%c0_5, %c0_6] : memref<1x32xf32, #tpu.memory_space<vmem>>, vector<1x32xf32>
    %9 = vector.broadcast %8 : vector<1x32xf32> to vector<16x32xf32>
    %10 = arith.addf %7, %9 : vector<16x32xf32>
    %11 = vector.shape_cast %10 : vector<16x32xf32> to vector<2x8x4x8xf32>
    %12 = tpu.transpose %11, [0, 2, 1, 3] : vector<2x8x4x8xf32> -> vector<2x4x8x8xf32>
    %13 = vector.shape_cast %12 : vector<2x4x8x8xf32> to vector<8x8x8xf32>
    %14 = arith.truncf %13 : vector<8x8x8xf32> to vector<8x8x8xbf16>
    %c0_7 = arith.constant 0 : index
    %c0_8 = arith.constant 0 : index
    %c0_9 = arith.constant 0 : index
    %15 = vector.load %arg14[%c0_7, %c0_8, %c0_9] : memref<8x8x8xbf16, #tpu.memory_space<vmem>>, vector<8x8x8xbf16>
    "tpu.trace_start"() <{level = 10 : i32, message = "ble,bse->bls"}> : () -> ()
    %cst_10 = arith.constant dense<0.000000e+00> : vector<8x8x8xf32>
    %16 = tpu.matmul %14, %15, %cst_10 {dimension_numbers = #tpu.dot_dimension_numbers<[2], [2], [1], [1], [0, 0, 0, 1, 1, 1], [0], [0]>} : vector<8x8x8xbf16>, vector<8x8x8xbf16>, vector<8x8x8xf32> -> vector<8x8x8xf32>
    "tpu.trace_stop"() : () -> ()
    %cst_11 = arith.constant dense<0xFF800000> : vector<8x8xf32>
    %17 = vector.multi_reduction <maximumf>, %16, %cst_11 [2] : vector<8x8x8xf32> to vector<8x8xf32>
    %18 = vector.shape_cast %17 : vector<8x8xf32> to vector<8x8x1xf32>
    %19 = vector.broadcast %18 : vector<8x8x1xf32> to vector<8x8x8xf32>
    %20 = arith.subf %16, %19 : vector<8x8x8xf32>
    %21 = math.exp %20 : vector<8x8x8xf32>
    %cst_12 = arith.constant dense<0.000000e+00> : vector<8x8xf32>
    %22 = vector.multi_reduction <add>, %21, %cst_12 [2] : vector<8x8x8xf32> to vector<8x8xf32>
    %23 = vector.shape_cast %22 : vector<8x8xf32> to vector<8x8x1xf32>
    %24 = tpu.reciprocal %23 {approx = true} : vector<8x8x1xf32> -> vector<8x8x1xf32>
    %25 = vector.broadcast %24 : vector<8x8x1xf32> to vector<8x8x8xf32>
    %26 = arith.mulf %21, %25 : vector<8x8x8xf32>
    %27 = arith.truncf %26 : vector<8x8x8xf32> to vector<8x8x8xbf16>
    %c0_13 = arith.constant 0 : index
    %c0_14 = arith.constant 0 : index
    %c0_15 = arith.constant 0 : index
    %28 = vector.load %arg15[%c0_13, %c0_14, %c0_15] : memref<8x8x8xbf16, #tpu.memory_space<vmem>>, vector<8x8x8xbf16>
    "tpu.trace_start"() <{level = 10 : i32, message = "bls,bsd->bld"}> : () -> ()
    %cst_16 = arith.constant dense<0.000000e+00> : vector<8x8x8xf32>
    %29 = tpu.matmul %27, %28, %cst_16 {dimension_numbers = #tpu.dot_dimension_numbers<[2], [1], [1], [2], [0, 0, 0, 1, 1, 2], [0], [0]>} : vector<8x8x8xbf16>, vector<8x8x8xbf16>, vector<8x8x8xf32> -> vector<8x8x8xf32>
    "tpu.trace_stop"() : () -> ()
    %30 = vector.shape_cast %29 : vector<8x8x8xf32> to vector<2x4x8x8xf32>
    %31 = tpu.transpose %30, [0, 2, 1, 3] : vector<2x4x8x8xf32> -> vector<2x8x4x8xf32>
    %32 = vector.shape_cast %31 : vector<2x8x4x8xf32> to vector<16x32xf32>
    %33 = arith.truncf %32 : vector<16x32xf32> to vector<16x32xbf16>
    %c0_17 = arith.constant 0 : index
    %c0_18 = arith.constant 0 : index
    %34 = vector.load %arg11[%c0_17, %c0_18] : memref<32x32xbf16, #tpu.memory_space<vmem>>, vector<32x32xbf16>
    %cst_19 = arith.constant dense<0.000000e+00> : vector<16x32xf32>
    %35 = tpu.matmul %33, %34, %cst_19 {dimension_numbers = #tpu.dot_dimension_numbers<[1], [0], [0], [1], [0, 0, 1, 1], [], []>} : vector<16x32xbf16>, vector<32x32xbf16>, vector<16x32xf32> -> vector<16x32xf32>
    %c0_20 = arith.constant 0 : index
    %c0_21 = arith.constant 0 : index
    %36 = vector.load %arg12[%c0_20, %c0_21] : memref<1x32xf32, #tpu.memory_space<vmem>>, vector<1x32xf32>
    %37 = vector.broadcast %36 : vector<1x32xf32> to vector<16x32xf32>
    %38 = arith.addf %35, %37 : vector<16x32xf32>
    %39 = vector.shape_cast %38 : vector<16x32xf32> to vector<2x8x32xf32>
    %c0_22 = arith.constant 0 : index
    %c0_23 = arith.constant 0 : index
    %c0_24 = arith.constant 0 : index
    %40 = vector.load %arg13[%c0_22, %c0_23, %c0_24] : memref<2x8x32xf32, #tpu.memory_space<vmem>>, vector<2x8x32xf32>
    tpu.vector_store %arg13[%c0_22, %c0_23, %c0_24], %39 {strides = array<i32>} : memref<2x8x32xf32, #tpu.memory_space<vmem>>, vector<2x8x32xf32>,
    return
  }
  func.func @transform_0(%arg0: i32, %arg1: i32) -> (i32, i32, i32) {
    %c0_i32 = arith.constant 0 : i32
    %c0_i32_0 = arith.constant 0 : i32
    return %arg0, %arg1, %c0_i32 : i32, i32, i32
  }
  func.func @transform_1(%arg0: i32, %arg1: i32) -> (i32, i32, i32) {
    %c0_i32 = arith.constant 0 : i32
    %c0_i32_0 = arith.constant 0 : i32
    %c0_i32_1 = arith.constant 0 : i32
    return %arg0, %c0_i32, %c0_i32_0 : i32, i32, i32
  }
  func.func @transform_2(%arg0: i32, %arg1: i32) -> (i32, i32, i32) {
    %c0_i32 = arith.constant 0 : i32
    %c0_i32_0 = arith.constant 0 : i32
    %c0_i32_1 = arith.constant 0 : i32
    return %arg0, %c0_i32, %c0_i32_0 : i32, i32, i32
  }
  func.func @transform_3(%arg0: i32, %arg1: i32) -> (i32, i32) {
    %c0_i32 = arith.constant 0 : i32
    %c0_i32_0 = arith.constant 0 : i32
    %c0_i32_1 = arith.constant 0 : i32
    return %c0_i32, %c0_i32_0 : i32, i32
  }
  func.func @transform_4(%arg0: i32, %arg1: i32) -> (i32, i32) {
    %c0_i32 = arith.constant 0 : i32
    %c0_i32_0 = arith.constant 0 : i32
    %c0_i32_1 = arith.constant 0 : i32
    return %c0_i32, %c0_i32_0 : i32, i32
  }
  func.func @transform_5(%arg0: i32, %arg1: i32) -> (i32, i32) {
    %c0_i32 = arith.constant 0 : i32
    %c0_i32_0 = arith.constant 0 : i32
    %c0_i32_1 = arith.constant 0 : i32
    return %c0_i32, %c0_i32_0 : i32, i32
  }
  func.func @transform_6(%arg0: i32, %arg1: i32) -> (i32, i32) {
    %c0_i32 = arith.constant 0 : i32
    %c0_i32_0 = arith.constant 0 : i32
    %c0_i32_1 = arith.constant 0 : i32
    return %c0_i32, %c0_i32_0 : i32, i32
  }
  func.func @transform_7(%arg0: i32, %arg1: i32) -> (i32, i32) {
    %c0_i32 = arith.constant 0 : i32
    %c0_i32_0 = arith.constant 0 : i32
    %c0_i32_1 = arith.constant 0 : i32
    return %c0_i32, %c0_i32_0 : i32, i32
  }
  func.func @transform_8(%arg0: i32, %arg1: i32) -> (i32, i32) {
    %c0_i32 = arith.constant 0 : i32
    %c0_i32_0 = arith.constant 0 : i32
    %c0_i32_1 = arith.constant 0 : i32
    return %c0_i32, %c0_i32_0 : i32, i32
  }
  func.func @transform_9(%arg0: i32, %arg1: i32) -> (i32, i32) {
    %c0_i32 = arith.constant 0 : i32
    %c0_i32_0 = arith.constant 0 : i32
    %c0_i32_1 = arith.constant 0 : i32
    return %c0_i32, %c0_i32_0 : i32, i32
  }
  func.func @transform_10(%arg0: i32, %arg1: i32) -> (i32, i32) {
    %c0_i32 = arith.constant 0 : i32
    %c0_i32_0 = arith.constant 0 : i32
    %c0_i32_1 = arith.constant 0 : i32
    return %c0_i32, %c0_i32_0 : i32, i32
  }
  func.func @transform_11(%arg0: i32, %arg1: i32) -> (i32, i32, i32) {
    %c0_i32 = arith.constant 0 : i32
    %c0_i32_0 = arith.constant 0 : i32
    return %arg0, %arg1, %c0_i32 : i32, i32, i32
  }
}

module attributes {stable_mosaic.version = 11 : i64} {
  func.func @kernel(%arg0: i32, %arg1: i32, %arg2: memref<2x8x32xf32, #tpu.memory_space<vmem>>, %arg3: memref<2x8x32xf32, #tpu.memory_space<vmem>>, %arg4: memref<2x8x32xf32, #tpu.memory_space<vmem>>, %arg5: memref<32x32xbf16, #tpu.memory_space<vmem>>, %arg6: memref<1x32xf32, #tpu.memory_space<vmem>>, %arg7: memref<32x32xbf16, #tpu.memory_space<vmem>>, %arg8: memref<1x32xf32, #tpu.memory_space<vmem>>, %arg9: memref<32x32xbf16, #tpu.memory_space<vmem>>, %arg10: memref<1x32xf32, #tpu.memory_space<vmem>>, %arg11: memref<32x32xbf16, #tpu.memory_space<vmem>>, %arg12: memref<1x32xf32, #tpu.memory_space<vmem>>, %arg13: memref<2x8x32xf32, #tpu.memory_space<vmem>>, %arg14: memref<8x8x8xbf16, #tpu.memory_space<vmem>>, %arg15: memref<8x8x8xbf16, #tpu.memory_space<vmem>>) attributes {dimension_semantics = [#tpu.dimension_semantics<parallel>, #tpu.dimension_semantics<arbitrary>], iteration_bounds = array<i64: 1, 1>, scalar_prefetch = 0 : i64, scratch_operands = 2 : i64, tpu.core_type = #tpu.core_type<tc>, window_params = [{transform_indices = @transform_0, window_bounds = array<i64: 2, 8, 32>}, {transform_indices = @transform_1, window_bounds = array<i64: 2, 8, 32>}, {transform_indices = @transform_2, window_bounds = array<i64: 2, 8, 32>}, {pipeline_mode = #tpu.pipeline_mode<synchronous>, transform_indices = @transform_3, window_bounds = array<i64: 32, 32>}, {pipeline_mode = #tpu.pipeline_mode<synchronous>, transform_indices = @transform_4, window_bounds = array<i64: 1, 32>}, {pipeline_mode = #tpu.pipeline_mode<synchronous>, transform_indices = @transform_5, window_bounds = array<i64: 32, 32>}, {pipeline_mode = #tpu.pipeline_mode<synchronous>, transform_indices = @transform_6, window_bounds = array<i64: 1, 32>}, {pipeline_mode = #tpu.pipeline_mode<synchronous>, transform_indices = @transform_7, window_bounds = array<i64: 32, 32>}, {pipeline_mode = #tpu.pipeline_mode<synchronous>, transform_indices = @transform_8, window_bounds = array<i64: 1, 32>}, {pipeline_mode = #tpu.pipeline_mode<synchronous>, transform_indices = @transform_9, window_bounds = array<i64: 32, 32>}, {pipeline_mode = #tpu.pipeline_mode<synchronous>, transform_indices = @transform_10, window_bounds = array<i64: 1, 32>}, {transform_indices = @transform_11, window_bounds = array<i64: 2, 8, 32>}]} {
    %c0_i32 = arith.constant 0 : i32
    %0 = arith.cmpi eq, %arg1, %c0_i32 : i32
    %1 = arith.extui %0 : i1 to i32
    %c0_i32_0 = arith.constant 0 : i32
    %2 = arith.cmpi ne, %1, %c0_i32_0 : i32
    scf.if %2 {
      %c0_25 = arith.constant 0 : index
      %c0_26 = arith.constant 0 : index
      %c0_27 = arith.constant 0 : index
      %41 = vector.load %arg3[%c0_25, %c0_26, %c0_27] : memref<2x8x32xf32, #tpu.memory_space<vmem>>, vector<2x8x32xf32>
      %42 = vector.shape_cast %41 : vector<2x8x32xf32> to vector<16x32xf32>
      %43 = arith.truncf %42 : vector<16x32xf32> to vector<16x32xbf16>
      %c0_28 = arith.constant 0 : index
      %c0_29 = arith.constant 0 : index
      %c0_30 = arith.constant 0 : index
      %44 = vector.load %arg4[%c0_28, %c0_29, %c0_30] : memref<2x8x32xf32, #tpu.memory_space<vmem>>, vector<2x8x32xf32>
      %45 = vector.shape_cast %44 : vector<2x8x32xf32> to vector<16x32xf32>
      %46 = arith.truncf %45 : vector<16x32xf32> to vector<16x32xbf16>
      %c0_31 = arith.constant 0 : index
      %c0_32 = arith.constant 0 : index
      %47 = vector.load %arg7[%c0_31, %c0_32] : memref<32x32xbf16, #tpu.memory_space<vmem>>, vector<32x32xbf16>
      %cst_33 = arith.constant dense<0.000000e+00> : vector<16x32xf32>
      %48 = tpu.matmul %43, %47, %cst_33 {dimension_numbers = #tpu.dot_dimension_numbers<[1], [0], [0], [1], [0, 0, 1, 1], [], []>} : vector<16x32xbf16>, vector<32x32xbf16>, vector<16x32xf32> -> vector<16x32xf32>
      %c0_34 = arith.constant 0 : index
      %c0_35 = arith.constant 0 : index
      %49 = vector.load %arg8[%c0_34, %c0_35] : memref<1x32xf32, #tpu.memory_space<vmem>>, vector<1x32xf32>
      %50 = vector.broadcast %49 : vector<1x32xf32> to vector<16x32xf32>
      %51 = arith.addf %48, %50 : vector<16x32xf32>
      %c0_36 = arith.constant 0 : index
      %c0_37 = arith.constant 0 : index
      %52 = vector.load %arg9[%c0_36, %c0_37] : memref<32x32xbf16, #tpu.memory_space<vmem>>, vector<32x32xbf16>
      %cst_38 = arith.constant dense<0.000000e+00> : vector<16x32xf32>
      %53 = tpu.matmul %46, %52, %cst_38 {dimension_numbers = #tpu.dot_dimension_numbers<[1], [0], [0], [1], [0, 0, 1, 1], [], []>} : vector<16x32xbf16>, vector<32x32xbf16>, vector<16x32xf32> -> vector<16x32xf32>
      %c0_39 = arith.constant 0 : index
      %c0_40 = arith.constant 0 : index
      %54 = vector.load %arg10[%c0_39, %c0_40] : memref<1x32xf32, #tpu.memory_space<vmem>>, vector<1x32xf32>
      %55 = vector.broadcast %54 : vector<1x32xf32> to vector<16x32xf32>
      %56 = arith.addf %53, %55 : vector<16x32xf32>
      %57 = vector.shape_cast %51 : vector<16x32xf32> to vector<2x8x4x8xf32>
      %58 = tpu.transpose %57, [0, 2, 1, 3] : vector<2x8x4x8xf32> -> vector<2x4x8x8xf32>
      %59 = vector.shape_cast %58 : vector<2x4x8x8xf32> to vector<8x8x8xf32>
      %60 = arith.truncf %59 : vector<8x8x8xf32> to vector<8x8x8xbf16>
      %c0_41 = arith.constant 0 : index
      %c0_42 = arith.constant 0 : index
      %c0_43 = arith.constant 0 : index
      %61 = vector.load %arg14[%c0_41, %c0_42, %c0_43] : memref<8x8x8xbf16, #tpu.memory_space<vmem>>, vector<8x8x8xbf16>
      tpu.vector_store %arg14[%c0_41, %c0_42, %c0_43], %60 {strides = array<i32>} : memref<8x8x8xbf16, #tpu.memory_space<vmem>>, vector<8x8x8xbf16>,
      %62 = vector.shape_cast %56 : vector<16x32xf32> to vector<2x8x4x8xf32>
      %63 = tpu.transpose %62, [0, 2, 1, 3] : vector<2x8x4x8xf32> -> vector<2x4x8x8xf32>
      %64 = vector.shape_cast %63 : vector<2x4x8x8xf32> to vector<8x8x8xf32>
      %65 = arith.truncf %64 : vector<8x8x8xf32> to vector<8x8x8xbf16>
      %c0_44 = arith.constant 0 : index
      %c0_45 = arith.constant 0 : index
      %c0_46 = arith.constant 0 : index
      %66 = vector.load %arg15[%c0_44, %c0_45, %c0_46] : memref<8x8x8xbf16, #tpu.memory_space<vmem>>, vector<8x8x8xbf16>
      tpu.vector_store %arg15[%c0_44, %c0_45, %c0_46], %65 {strides = array<i32>} : memref<8x8x8xbf16, #tpu.memory_space<vmem>>, vector<8x8x8xbf16>,
    } else {
    }
    %c0 = arith.constant 0 : index
    %c0_1 = arith.constant 0 : index
    %c0_2 = arith.constant 0 : index
    %3 = vector.load %arg2[%c0, %c0_1, %c0_2] : memref<2x8x32xf32, #tpu.memory_space<vmem>>, vector<2x8x32xf32>
    %4 = vector.shape_cast %3 : vector<2x8x32xf32> to vector<16x32xf32>
    %5 = arith.truncf %4 : vector<16x32xf32> to vector<16x32xbf16>
    %c0_3 = arith.constant 0 : index
    %c0_4 = arith.constant 0 : index
    %6 = vector.load %arg5[%c0_3, %c0_4] : memref<32x32xbf16, #tpu.memory_space<vmem>>, vector<32x32xbf16>
    %cst = arith.constant dense<0.000000e+00> : vector<16x32xf32>
    %7 = tpu.matmul %5, %6, %cst {dimension_numbers = #tpu.dot_dimension_numbers<[1], [0], [0], [1], [0, 0, 1, 1], [], []>} : vector<16x32xbf16>, vector<32x32xbf16>, vector<16x32xf32> -> vector<16x32xf32>
    %c0_5 = arith.constant 0 : index
    %c0_6 = arith.constant 0 : index
    %8 = vector.load %arg6[%c0_5, %c0_6] : memref<1x32xf32, #tpu.memory_space<vmem>>, vector<1x32xf32>
    %9 = vector.broadcast %8 : vector<1x32xf32> to vector<16x32xf32>
    %10 = arith.addf %7, %9 : vector<16x32xf32>
    %11 = vector.shape_cast %10 : vector<16x32xf32> to vector<2x8x4x8xf32>
    %12 = tpu.transpose %11, [0, 2, 1, 3] : vector<2x8x4x8xf32> -> vector<2x4x8x8xf32>
    %13 = vector.shape_cast %12 : vector<2x4x8x8xf32> to vector<8x8x8xf32>
    %14 = arith.truncf %13 : vector<8x8x8xf32> to vector<8x8x8xbf16>
    %c0_7 = arith.constant 0 : index
    %c0_8 = arith.constant 0 : index
    %c0_9 = arith.constant 0 : index
    %15 = vector.load %arg14[%c0_7, %c0_8, %c0_9] : memref<8x8x8xbf16, #tpu.memory_space<vmem>>, vector<8x8x8xbf16>
    "tpu.trace_start"() <{level = 10 : i32, message = "ble,bse->bls"}> : () -> ()
    %cst_10 = arith.constant dense<0.000000e+00> : vector<8x8x8xf32>
    %16 = tpu.matmul %14, %15, %cst_10 {dimension_numbers = #tpu.dot_dimension_numbers<[2], [2], [1], [1], [0, 0, 0, 1, 1, 1], [0], [0]>} : vector<8x8x8xbf16>, vector<8x8x8xbf16>, vector<8x8x8xf32> -> vector<8x8x8xf32>
    "tpu.trace_stop"() : () -> ()
    %cst_11 = arith.constant dense<0xFF800000> : vector<8x8xf32>
    %17 = vector.multi_reduction <maximumf>, %16, %cst_11 [2] : vector<8x8x8xf32> to vector<8x8xf32>
    %18 = vector.shape_cast %17 : vector<8x8xf32> to vector<8x8x1xf32>
    %19 = vector.broadcast %18 : vector<8x8x1xf32> to vector<8x8x8xf32>
    %20 = arith.subf %16, %19 : vector<8x8x8xf32>
    %21 = math.exp %20 : vector<8x8x8xf32>
    %cst_12 = arith.constant dense<0.000000e+00> : vector<8x8xf32>
    %22 = vector.multi_reduction <add>, %21, %cst_12 [2] : vector<8x8x8xf32> to vector<8x8xf32>
    %23 = vector.shape_cast %22 : vector<8x8xf32> to vector<8x8x1xf32>
    %24 = tpu.reciprocal %23 {approx = true} : vector<8x8x1xf32> -> vector<8x8x1xf32>
    %25 = vector.broadcast %24 : vector<8x8x1xf32> to vector<8x8x8xf32>
    %26 = arith.mulf %21, %25 : vector<8x8x8xf32>
    %27 = arith.truncf %26 : vector<8x8x8xf32> to vector<8x8x8xbf16>
    %c0_13 = arith.constant 0 : index
    %c0_14 = arith.constant 0 : index
    %c0_15 = arith.constant 0 : index
    %28 = vector.load %arg15[%c0_13, %c0_14, %c0_15] : memref<8x8x8xbf16, #tpu.memory_space<vmem>>, vector<8x8x8xbf16>
    "tpu.trace_start"() <{level = 10 : i32, message = "bls,bsd->bld"}> : () -> ()
    %cst_16 = arith.constant dense<0.000000e+00> : vector<8x8x8xf32>
    %29 = tpu.matmul %27, %28, %cst_16 {dimension_numbers = #tpu.dot_dimension_numbers<[2], [1], [1], [2], [0, 0, 0, 1, 1, 2], [0], [0]>} : vector<8x8x8xbf16>, vector<8x8x8xbf16>, vector<8x8x8xf32> -> vector<8x8x8xf32>
    "tpu.trace_stop"() : () -> ()
    %30 = vector.shape_cast %29 : vector<8x8x8xf32> to vector<2x4x8x8xf32>
    %31 = tpu.transpose %30, [0, 2, 1, 3] : vector<2x4x8x8xf32> -> vector<2x8x4x8xf32>
    %32 = vector.shape_cast %31 : vector<2x8x4x8xf32> to vector<16x32xf32>
    %33 = arith.truncf %32 : vector<16x32xf32> to vector<16x32xbf16>
    %c0_17 = arith.constant 0 : index
    %c0_18 = arith.constant 0 : index
    %34 = vector.load %arg11[%c0_17, %c0_18] : memref<32x32xbf16, #tpu.memory_space<vmem>>, vector<32x32xbf16>
    %cst_19 = arith.constant dense<0.000000e+00> : vector<16x32xf32>
    %35 = tpu.matmul %33, %34, %cst_19 {dimension_numbers = #tpu.dot_dimension_numbers<[1], [0], [0], [1], [0, 0, 1, 1], [], []>} : vector<16x32xbf16>, vector<32x32xbf16>, vector<16x32xf32> -> vector<16x32xf32>
    %c0_20 = arith.constant 0 : index
    %c0_21 = arith.constant 0 : index
    %36 = vector.load %arg12[%c0_20, %c0_21] : memref<1x32xf32, #tpu.memory_space<vmem>>, vector<1x32xf32>
    %37 = vector.broadcast %36 : vector<1x32xf32> to vector<16x32xf32>
    %38 = arith.addf %35, %37 : vector<16x32xf32>
    %39 = vector.shape_cast %38 : vector<16x32xf32> to vector<2x8x32xf32>
    %c0_22 = arith.constant 0 : index
    %c0_23 = arith.constant 0 : index
    %c0_24 = arith.constant 0 : index
    %40 = vector.load %arg13[%c0_22, %c0_23, %c0_24] : memref<2x8x32xf32, #tpu.memory_space<vmem>>, vector<2x8x32xf32>
    tpu.vector_store %arg13[%c0_22, %c0_23, %c0_24], %39 {strides = array<i32>} : memref<2x8x32xf32, #tpu.memory_space<vmem>>, vector<2x8x32xf32>,
    return
  }
  func.func @transform_0(%arg0: i32, %arg1: i32) -> (i32, i32, i32) {
    %c0_i32 = arith.constant 0 : i32
    %c0_i32_0 = arith.constant 0 : i32
    return %arg0, %arg1, %c0_i32 : i32, i32, i32
  }
  func.func @transform_1(%arg0: i32, %arg1: i32) -> (i32, i32, i32) {
    %c0_i32 = arith.constant 0 : i32
    %c0_i32_0 = arith.constant 0 : i32
    %c0_i32_1 = arith.constant 0 : i32
    return %arg0, %c0_i32, %c0_i32_0 : i32, i32, i32
  }
  func.func @transform_2(%arg0: i32, %arg1: i32) -> (i32, i32, i32) {
    %c0_i32 = arith.constant 0 : i32
    %c0_i32_0 = arith.constant 0 : i32
    %c0_i32_1 = arith.constant 0 : i32
    return %arg0, %c0_i32, %c0_i32_0 : i32, i32, i32
  }
  func.func @transform_3(%arg0: i32, %arg1: i32) -> (i32, i32) {
    %c0_i32 = arith.constant 0 : i32
    %c0_i32_0 = arith.constant 0 : i32
    %c0_i32_1 = arith.constant 0 : i32
    return %c0_i32, %c0_i32_0 : i32, i32
  }
  func.func @transform_4(%arg0: i32, %arg1: i32) -> (i32, i32) {
    %c0_i32 = arith.constant 0 : i32
    %c0_i32_0 = arith.constant 0 : i32
    %c0_i32_1 = arith.constant 0 : i32
    return %c0_i32, %c0_i32_0 : i32, i32
  }
  func.func @transform_5(%arg0: i32, %arg1: i32) -> (i32, i32) {
    %c0_i32 = arith.constant 0 : i32
    %c0_i32_0 = arith.constant 0 : i32
    %c0_i32_1 = arith.constant 0 : i32
    return %c0_i32, %c0_i32_0 : i32, i32
  }
  func.func @transform_6(%arg0: i32, %arg1: i32) -> (i32, i32) {
    %c0_i32 = arith.constant 0 : i32
    %c0_i32_0 = arith.constant 0 : i32
    %c0_i32_1 = arith.constant 0 : i32
    return %c0_i32, %c0_i32_0 : i32, i32
  }
  func.func @transform_7(%arg0: i32, %arg1: i32) -> (i32, i32) {
    %c0_i32 = arith.constant 0 : i32
    %c0_i32_0 = arith.constant 0 : i32
    %c0_i32_1 = arith.constant 0 : i32
    return %c0_i32, %c0_i32_0 : i32, i32
  }
  func.func @transform_8(%arg0: i32, %arg1: i32) -> (i32, i32) {
    %c0_i32 = arith.constant 0 : i32
    %c0_i32_0 = arith.constant 0 : i32
    %c0_i32_1 = arith.constant 0 : i32
    return %c0_i32, %c0_i32_0 : i32, i32
  }
  func.func @transform_9(%arg0: i32, %arg1: i32) -> (i32, i32) {
    %c0_i32 = arith.constant 0 : i32
    %c0_i32_0 = arith.constant 0 : i32
    %c0_i32_1 = arith.constant 0 : i32
    return %c0_i32, %c0_i32_0 : i32, i32
  }
  func.func @transform_10(%arg0: i32, %arg1: i32) -> (i32, i32) {
    %c0_i32 = arith.constant 0 : i32
    %c0_i32_0 = arith.constant 0 : i32
    %c0_i32_1 = arith.constant 0 : i32
    return %c0_i32, %c0_i32_0 : i32, i32
  }
  func.func @transform_11(%arg0: i32, %arg1: i32) -> (i32, i32, i32) {
    %c0_i32 = arith.constant 0 : i32
    %c0_i32_0 = arith.constant 0 : i32
    return %arg0, %arg1, %c0_i32 : i32, i32, i32
  }
}

</mosaic_0001>

<bundles_post_ra>
// kernel: tpu_custom_call.1
= control target key start
LH: loop header
LB: loop body
LE: loop exit
PB: predicated region body
PF: predicated region fallthrough
CT: control target
= control target key end

     0   :  { %16 = vsyncpa [#allocation5], 0  ;;  %s2789_s0 = inlined_call_operand.hbm [shape: f32[2,8,32], index: 0, kind: input, shape index: {}]   ;;  %s2790_s1 = inlined_call_operand.hbm [shape: f32[2,8,32], index: 1, kind: input, shape index: {}]   ;;  %s2791_s2 = inlined_call_operand.hbm [shape: f32[2,8,32], index: 2, kind: input, shape index: {}]   ;;  %s2792_s3 = inlined_call_operand.hbm [shape: bf16[32,32], index: 3, kind: input, shape index: {}]   ;;  %s2793_s4 = inlined_call_operand.vmem [shape: f32[1,32], index: 4, kind: input, shape index: {}]   ;;  %s2794_s5 = inlined_call_operand.hbm [shape: bf16[32,32], index: 5, kind: input, shape index: {}]   ;;  %s2795_s6 = inlined_call_operand.vmem [shape: f32[1,32], index: 6, kind: input, shape index: {}]   ;;  %s2796_s7 = inlined_call_operand.hbm [shape: bf16[32,32], index: 7, kind: input, shape index: {}]   ;;  %s2797_s8 = inlined_call_operand.vmem [shape: f32[1,32], index: 8, kind: input, shape index: {}]   ;;  %s2798_s9 = inlined_call_operand.hbm [shape: bf16[32,32], index: 9, kind: input, shape index: {}]   ;;  %s2799_s10 = inlined_call_operand.vmem [shape: f32[1,32], index: 10, kind: input, shape index: {}]   ;;  %s2800_s11 = inlined_call_operand.hbm [shape: f32[2,8,32], index: 11, kind: output, shape index: {}]  }
   0x1   :  { %17 = vsyncpa [#allocation8], 0 }
   0x2   :  { %18 = vsyncpa [#allocation11], 0 }
   0x3   :  { %19 = vsyncpa [#allocation14], 0 }
   0x4   :  { %20 = vsyncpa [#allocation6], 0  ;;  %s38_s19 = sshll.u32 %s2790_s1, 4  ;;  %s2117_s20 = smov [#allocation7]   ;;  %s39_s19 = int_to_ptr.hbm [resolvable:$true] %s38_s19 }
   0x5   :  { %s40_s21 = sshll.u32 %s2117_s20, 4  ;;  %s64_s24 = sshll.u32 %s2792_s3, 4  ;;  %s41_s21 = int_to_ptr.vmem [resolvable:$true] %s40_s21  ;;  %s65_s24 = int_to_ptr.hbm [resolvable:$true] %s64_s24 }
   0x6   :  { %s2118_s25 = smov 128   ;;  %s2119_s26 = smov 8  }
   0x7   :  { %46 = dma.hbm_to_vmem [thread:$0]  %s39_s19, 256, %s41_s21, [#allocation8], %s2118_s25, %s2118_s25, %s2119_s26  }
   0x8   :  { %s2120_s27 = smov [#allocation10]   ;;  %s2121_s29 = smov 64  }
   0x9   :  { %s66_s28 = sshll.u32 %s2120_s27, 4  ;;  %s2122_s1 = smov 4   ;;  %s67_s28 = int_to_ptr.vmem [resolvable:$true] %s66_s28 }
   0xa   :  { %72 = dma.hbm_to_vmem [thread:$0]  %s65_s24, 256, %s67_s28, [#allocation11], %s2121_s29, %s2121_s29, %s2122_s1  }
   0xb   :  { %s94_s3 = sshll.u32 %s2796_s7, 4  ;;  %s2123_s13 = smov [#allocation13]   ;;  %s95_s3 = int_to_ptr.hbm [resolvable:$true] %s94_s3 }
   0xc   :  { %s96_s14 = sshll.u32 %s2123_s13, 4  ;;  %s25_s17 = sshll.u32 %s2789_s0, 4  ;;  %s97_s14 = int_to_ptr.vmem [resolvable:$true] %s96_s14  ;;  %s26_s17 = int_to_ptr.hbm [resolvable:$true] %s25_s17 }
   0xd   :  { %102 = dma.hbm_to_vmem [thread:$0]  %s95_s3, 256, %s97_s14, [#allocation14], %s2121_s29, %s2121_s29, %s2122_s1  }
   0xe   :  { %s2124_s18 = smov [#allocation4]   ;;  %s51_s22 = sshll.u32 %s2791_s2, 4  ;;  %s52_s22 = int_to_ptr.hbm [resolvable:$true] %s51_s22 }
   0xf   :  { %s27_s19 = sshll.u32 %s2124_s18, 4  ;;  %s79_s0 = sshll.u32 %s2794_s5, 4  ;;  %s28_s19 = int_to_ptr.vmem [resolvable:$true] %s27_s19  ;;  %s80_s0 = int_to_ptr.hbm [resolvable:$true] %s79_s0 }
  0x10   :  { %33 = dma.hbm_to_vmem [thread:$0]  %s26_s17, 256, %s28_s19, [#allocation5], %s2118_s25, %s2118_s25, %s2119_s26  }
  0x11   :  { %s2125_s24 = smov [#allocation9]   ;;  %s2126_s28 = smov [#allocation12]  }
  0x12   :  { %s53_s27 = sshll.u32 %s2125_s24, 4  ;;  %s81_s2 = sshll.u32 %s2126_s28, 4  ;;  %s54_s27 = int_to_ptr.vmem [resolvable:$true] %s53_s27  ;;  %s82_s2 = int_to_ptr.vmem [resolvable:$true] %s81_s2 }
  0x13   :  { %59 = dma.hbm_to_vmem [thread:$0]  %s52_s22, 256, %s54_s27, [#allocation8], %s2118_s25, %s2118_s25, %s2119_s26  }
  0x14   :  { %s109_s3 = sshll.u32 %s2798_s9, 4  ;;  %s2127_s5 = smov [#allocation15]   ;;  %s110_s3 = int_to_ptr.hbm [resolvable:$true] %s109_s3 }
  0x15   :  { %87 = dma.hbm_to_vmem [thread:$0]  %s80_s0, 256, %s82_s2, [#allocation11], %s2121_s29, %s2121_s29, %s2122_s1  }
  0x16   :  { %s111_s13 = sshll.u32 %s2127_s5, 4  ;;  %s112_s13 = int_to_ptr.vmem [resolvable:$true] %s111_s13 }
  0x17   :  { %117 = dma.hbm_to_vmem [thread:$0]  %s110_s3, 256, %s112_s13, [#allocation14], %s2121_s29, %s2121_s29, %s2122_s1  }
  0x18   :  { %2107 = dma.done.wait [#allocation5], 256  }
  0x19   :  { %2108 = vsyncadd [#allocation5], 4294967040 }
  0x1a   :  { %2109 = dma.done.wait [#allocation8], 512  }
  0x1b   :  { %2110 = vsyncadd [#allocation8], 4294966784 }
  0x1c   :  { %2111 = dma.done.wait [#allocation11], 512  }
  0x1d   :  { %2112 = vsyncadd [#allocation11], 4294966784 }
  0x1e   :  { %2113 = dma.done.wait [#allocation14], 512  }
  0x1f   :  { %2114 = vsyncadd [#allocation14], 4294966784  ;;  %v1823_v0 = vld [vmem:[#allocation12 + $0x8] sm:$0xff]  ;;  %v1827_v1 = vld [vmem:[#allocation10 + $0x8] sm:$0xff]  ;;  %vm179_vm0 = vcmask 261120   ;;  %s2128_s1 = smov 104  }
  0x20   :  { %v1822_v2 = vld [vmem:[#allocation12] sm:$0xff]  ;;  %v1826_v3 = vld [vmem:[#allocation10] sm:$0xff]  ;;  %v154_v5 = vld [vmem:[#allocation7 + $0x8] sm:$0xff]  ;;  %189 = vmatpush.bf16.msra.mxu0 %v1823_v0  ;;  %781 = vmatpush.bf16.msra.mxu2 %v1827_v1  ;;  %s2129_s14 = smov 120   ;;  %v2131_v28 = vmov 1983009808  }
  0x21   :  { %v153_v4 = vld [vmem:[#allocation7] sm:$0xff]  ;;  %v748_v6 = vld [vmem:[#allocation4] sm:$0xff]  ;;  %v749_v7 = vld [vmem:[#allocation4 + $0x8] sm:$0xff]  ;;  %v260_v29 = vunpack.c.l.s4 %v2131_v28  ;;  %vm255_vm1 = vcmask 1047556   ;;  %v2132_v46 = vmov 1934713408  }
  0x22   :  { %v155_v8 = vpack.c.bf16 %v154_v5, %v153_v4  ;;  %v750_v9 = vpack.c.bf16 %v749_v7, %v748_v6  ;;  %v1825_v10 = vld [vmem:[#allocation13 + $0x8] sm:$0xff]  ;;  %v1824_v11 = vld [vmem:[#allocation13] sm:$0xff]  ;;  %v156_v12 = vld [vmem:[#allocation9] sm:$0xff]  ;;  %v284_v47 = vunpack.c.l.s4 %v2132_v46  ;;  %vm483_vm2 = vcmask 60416   ;;  %s2134_s18 = smov 16   ;;  %s2135_s21 = smov [#allocation16]  }
  0x23   :  { %226 = vmatpush.bf16.msra.mxu1 %v1825_v10  ;;  %v157_v13 = vld [vmem:[#allocation9 + $0x8] sm:$0xff]  ;;  %v1879_v15 = vld [vmem:[%s2795_s6] ss:$0 sm:$0xff]  ;;  %s2130_s6 = smov 112   ;;  %v2266_v32 = vunpack.c.0.s8 %v260_v29  ;;  %vm1046_vm3 = vcmask 64512   ;;  %vm1306_vm4 = vcmask 1043456  }
  0x24   :  { %190 = vmatpush.bf16.msra.mxu0 %v1822_v2  ;;  %782 = vmatpush.bf16.msra.mxu2 %v1826_v3  ;;  %v158_v14 = vpack.c.bf16 %v157_v13, %v156_v12  ;;  %v1880_v18 = vld [vmem:[%s2793_s4] ss:$0 sm:$0xff]  ;;  %v2288_v57 = vunpack.c.0.s8 %v284_v47  ;;  %vm1702_vm5 = vcmask 130048   ;;  %vm1705_vm6 = vcmask 195584   ;;  %s1752_s22 = sshll.u32 %s2135_s21, 4  ;;  %s1754_s0 = sshll.u32 %s2800_s11, 4  ;;  %s1753_s22 = int_to_ptr.vmem [resolvable:$true] %s1752_s22  ;;  %s1755_s0 = int_to_ptr.hbm [resolvable:$true] %s1754_s0 }
  0x27   :  { %1778 = vmatmul.msk.bf16.vlgmr.msra.gmra.mxu0 %vm179_vm0, %v155_v8  ;;  %1796 = vmatmul.msk.bf16.vlgmr.msra.gmra.mxu2 %vm179_vm0, %v750_v9 }
  0x28   :  { %227 = vmatpush.bf16.msra.mxu1 %v1824_v11 }
  0x2b   :  { %1787 = vmatmul.msk.bf16.vlgmr.msra.gmra.mxu1 %vm179_vm0, %v158_v14 }
  0xa4   :  { %v192_v16 = vpop.f32.mrf.mxu0 }
  0xa5   :  { %v2244_v17 = vadd.f32 %v1879_v15, %v192_v16 }
  0xa7   :  { %248 = vrot.lane.b32.xlu1 %v2244_v17, %s2128_s1  ;;  %236 = vrot.lane.b32.xlu0 %v2244_v17, %s2129_s14  ;;  %v257_v55 = vrot.slane %v2244_v17, 4 }
  0xaa   :  { %v784_v19 = vpop.f32.mrf.mxu2 }
  0xab   :  { %v785_v20 = vadd.f32 %v1880_v18, %v784_v19 }
  0xac   :  { %v194_v21 = vpop.f32.mrf.mxu0 }
  0xad   :  { %v195_v22 = vadd.f32 %v1879_v15, %v194_v21  ;;  %v812_v33 = vrot.slane %v785_v20, 4 }
  0xaf   :  { %242 = vrot.lane.b32.xlu0 %v2244_v17, %s2130_s6  ;;  %v1854_v23 = vpack.i.bf16 %v785_v20, %v195_v22  ;;  %v313_v37 = vrot.slane %v195_v22, 4 }
  0xb1   :  { %1855 = vrot.lane.b32.xlu2 %v1854_v23, %s2130_s6  ;;  %1850 = vrot.lane.b32.xlu1 %v1854_v23, %s2129_s14 }
  0xb2   :  { %v786_v24 = vpop.f32.mrf.mxu2 }
  0xb3   :  { %v2257_v25 = vadd.f32 %v1880_v18, %v786_v24 }
  0xb5   :  { %v868_v59 = vrot.slane %v2257_v25, 4 }
  0xb7   :  { %793 = vrot.lane.b32.xlu0 %v2257_v25, %s2129_s14 }
  0xb9   :  { %1860 = vrot.lane.b32.xlu2 %v1854_v23, %s2128_s1  ;;  %799 = vrot.lane.b32.xlu1 %v2257_v25, %s2130_s6 }
  0xc1   :  { %805 = vrot.lane.b32.xlu2 %v2257_v25, %s2128_s1 }
 0x10b   :  { %v1856_v26 = vpop.permute.xlu2 %1855 }
 0x10c   :  { %v1858_v27 = vunpack.i.h.bf16 %v1856_v26  ;;  %v1857_v30 = vunpack.i.l.bf16 %v1856_v26 }
 0x10e   :  { %v809_v31 = vrot.slane %v1858_v27, 4  ;;  %v311_v34 = vrot.slane %v1857_v30, 4  ;;  %v813_v40 = vsel %vm255_vm1, %v1858_v27, %v812_v33  ;;  %v314_v42 = vsel %vm255_vm1, %v1857_v30, %v313_v37 }
 0x10f   :  { %v821_v48 = vperm.slane %v813_v40, %v2266_v32  ;;  %v2279_v51 = vperm.slane %v314_v42, %v2266_v32 }
 0x110   :  { %v811_v41 = vsel %vm255_vm1, %v809_v31, %v785_v20  ;;  %v312_v44 = vsel %vm255_vm1, %v311_v34, %v195_v22 }
 0x111   :  { %v817_v50 = vperm.slane %v811_v41, %v2266_v32  ;;  %v2283_v53 = vperm.slane %v312_v44, %v2266_v32  ;;  %v848_v60 = vrot.slane %v821_v48, 4  ;;  %v349_v1 = vrot.slane %v2279_v51, 4 }
 0x113   :  { %v2273_v45 = vpop.permute.xlu2 %1860  ;;  %v836_v0 = vrot.slane %v817_v50, 4  ;;  %v337_v5 = vrot.slane %v2283_v53, 4 }
 0x114   :  { %v1863_v54 = vunpack.i.h.bf16 %v2273_v45  ;;  %v1862_v61 = vunpack.i.l.bf16 %v2273_v45 }
 0x116   :  { %v822_v6 = vrot.slane %v1863_v54, 4  ;;  %v323_v13 = vrot.slane %v1862_v61, 4 }
 0x119   :  { %v249_v35 = vpop.permute.xlu1 %248  ;;  %v237_v36 = vpop.permute.xlu0 %236 }
 0x11a   :  { %v267_v38 = vrot.slane %v249_v35, 4  ;;  %v269_v39 = vrot.slane %v237_v36, 4 }
 0x11c   :  { %v270_v43 = vsel %vm255_vm1, %v249_v35, %v269_v39  ;;  %v268_v49 = vsel %vm255_vm1, %v267_v38, %v237_v36 }
 0x11d   :  { %v278_v52 = vperm.slane %v270_v43, %v2266_v32  ;;  %v274_v56 = vperm.slane %v268_v49, %v2266_v32  ;;  %v2327_v49 = vpop.permute.xlu2 %805 }
 0x11f   :  { %v291_v2 = vrot.slane %v278_v52, 4  ;;  %v279_v9 = vrot.slane %v274_v56, 4 }
 0x121   :  { %v243_v58 = vpop.permute.xlu0 %242 }
 0x122   :  { %v254_v62 = vrot.slane %v243_v58, 4  ;;  %v258_v63 = vsel %vm255_vm1, %v243_v58, %v257_v55 }
 0x123   :  { %v266_v3 = vperm.slane %v258_v63, %v2266_v32  ;;  %v2295_v4 = vpop.permute.xlu1 %1850 }
 0x124   :  { %v256_v7 = vsel %vm255_vm1, %v254_v62, %v2244_v17  ;;  %v1853_v8 = vunpack.i.h.bf16 %v2295_v4  ;;  %v1852_v34 = vunpack.i.l.bf16 %v2295_v4 }
 0x125   :  { %v262_v10 = vperm.slane %v256_v7, %v2266_v32  ;;  %v292_v11 = vsel %vm255_vm1, %v291_v2, %v266_v3  ;;  %v293_v12 = vrot.slane %v266_v3, 4  ;;  %v878_v3 = vrot.slane %v2327_v49, 4 }
 0x126   :  { %v298_v14 = vperm.slane %v292_v11, %v2288_v57  ;;  %v823_v15 = vsel %vm255_vm1, %v822_v6, %v1853_v8  ;;  %v824_v16 = vrot.slane %v1853_v8, 4 }
 0x127   :  { %v280_v18 = vsel %vm255_vm1, %v279_v9, %v262_v10  ;;  %v281_v19 = vrot.slane %v262_v10, 4  ;;  %v294_v17 = vsel %vm255_vm1, %v278_v52, %v293_v12  ;;  %v829_v20 = vperm.slane %v823_v15, %v2266_v32 }
 0x128   :  { %v286_v21 = vperm.slane %v280_v18, %v2288_v57  ;;  %v302_v22 = vperm.slane %v294_v17, %v2288_v57  ;;  %v307_v23 = vrot.slane %v298_v14, 4  ;;  %v825_v24 = vsel %vm255_vm1, %v1863_v54, %v824_v16 }
 0x129   :  { %v282_v26 = vsel %vm255_vm1, %v274_v56, %v281_v19  ;;  %v833_v27 = vperm.slane %v825_v24, %v2266_v32  ;;  %v834_v28 = vrot.slane %v829_v20, 4  ;;  %v837_v29 = vsel %vm255_vm1, %v829_v20, %v836_v0 }
 0x12a   :  { %v290_v30 = vperm.slane %v282_v26, %v2288_v57  ;;  %v303_v31 = vrot.slane %v286_v21, 4  ;;  %v309_v33 = vrot.slane %v302_v22, 4  ;;  %v308_v35 = vsel %vm255_vm1, 0.0, %v307_v23 }
 0x12b   :  { %v835_v36 = vsel %vm255_vm1, %v834_v28, %v817_v50  ;;  %v846_v37 = vrot.slane %v833_v27, 4  ;;  %v849_v38 = vsel %vm255_vm1, %v833_v27, %v848_v60  ;;  %v845_v42 = vperm.slane %v837_v29, %v2288_v57 }
 0x12c   :  { %v305_v39 = vrot.slane %v290_v30, 4  ;;  %v310_v40 = vsel %vm255_vm1, 0.0, %v309_v33  ;;  %v378_v41 = vsel %vm255_vm1, %v309_v33, %v298_v14  ;;  %v841_v46 = vperm.slane %v835_v36, %v2288_v57 }
 0x12d   :  { %v382_v43 = vperm.slane %v378_v41, %v2266_v32  ;;  %v383_v44 = vrot.slane %v310_v40, 4  ;;  %v847_v47 = vsel %vm255_vm1, %v846_v37, %v821_v48  ;;  %v857_v55 = vperm.slane %v849_v38, %v2288_v57 }
 0x12e   :  { %v306_v50 = vsel %vm255_vm1, 0.0, %v305_v39  ;;  %v367_v52 = vsel %vm255_vm1, %v305_v39, %v286_v21  ;;  %v853_v54 = vperm.slane %v847_v47, %v2288_v57  ;;  %v304_v63 = vsel %vm255_vm1, 0.0, %v303_v31 }
 0x12f   :  { %v371_v56 = vperm.slane %v367_v52, %v2266_v32  ;;  %v372_v58 = vrot.slane %v306_v50, 4  ;;  %v384_v60 = vsel %vm255_vm1, %v383_v44, %v308_v35  ;;  %v403_v62 = vrot.slane %v382_v43, 4 }
 0x130   :  { %v388_v48 = vperm.slane %v384_v60, %v2266_v32  ;;  %v858_v0 = vrot.slane %v841_v46, 4  ;;  %v860_v2 = vrot.slane %v845_v42, 4  ;;  %v862_v7 = vrot.slane %v853_v54, 4  ;;  %v794_v42 = vpop.permute.xlu0 %793 }
 0x131   :  { %v373_v4 = vsel %vm255_vm1, %v372_v58, %v304_v63  ;;  %v391_v6 = vrot.slane %v371_v56, 4  ;;  %v864_v11 = vrot.slane %v857_v55, 4  ;;  %v324_v15 = vsel %vm255_vm1, %v323_v13, %v1852_v34 }
 0x132   :  { %v377_v8 = vperm.slane %v373_v4, %v2266_v32  ;;  %v401_v9 = vrot.slane %v388_v48, 4  ;;  %v404_v10 = vsel %vm255_vm1, %v388_v48, %v403_v62  ;;  %v2343_v14 = vsel %vm255_vm1, 0.0, %v860_v2 }
 0x133   :  { %v412_v12 = vperm.slane %v404_v10, %v2288_v57  ;;  %v325_v16 = vrot.slane %v1852_v34, 4  ;;  %v2349_v20 = vsel %vm255_vm1, 0.0, %v858_v0  ;;  %v2354_v24 = vsel %vm255_vm1, 0.0, %v862_v7 }
 0x134   :  { %v389_v18 = vrot.slane %v377_v8, 4  ;;  %v392_v19 = vsel %vm255_vm1, %v377_v8, %v391_v6  ;;  %v402_v17 = vsel %vm255_vm1, %v401_v9, %v382_v43  ;;  %v2358_v13 = vsel %vm255_vm1, 0.0, %v864_v11 }
 0x135   :  { %v400_v21 = vperm.slane %v392_v19, %v2288_v57  ;;  %v408_v22 = vperm.slane %v402_v17, %v2288_v57  ;;  %v417_v23 = vrot.slane %v412_v12, 4  ;;  %v2361_v27 = vsel %vm255_vm1, %v860_v2, %v841_v46 }
 0x136   :  { %v390_v26 = vsel %vm255_vm1, %v389_v18, %v371_v56  ;;  %v927_v28 = vrot.slane %v2343_v14, 4  ;;  %v2367_v35 = vsel %vm255_vm1, %v864_v11, %v853_v54  ;;  %v326_v36 = vsel %vm255_vm1, %v1862_v61, %v325_v16  ;;  %v800_v54 = vpop.permute.xlu1 %799 }
 0x137   :  { %v396_v29 = vperm.slane %v390_v26, %v2288_v57  ;;  %v413_v30 = vrot.slane %v408_v22, 4  ;;  %v418_v31 = vsel %vm255_vm1, %v417_v23, %v400_v21  ;;  %v419_v33 = vrot.slane %v400_v21, 4  ;;  %v2412_v21 = vld [vmem:[%s2797_s8] ss:$0 sm:$0xff]  ;;  %s2133_s8 = smov 24  }
 0x138   :  { %v477_v34 = vpack.c.bf16 %v418_v31, %v418_v31  ;;  %v330_v37 = vperm.slane %v324_v15, %v2266_v32  ;;  %v334_v41 = vperm.slane %v326_v36, %v2266_v32  ;;  %v866_v2 = vrot.slane %v800_v54, 4 }
 0x139   :  { %v414_v38 = vsel %vm255_vm1, %v413_v30, %v396_v29  ;;  %v415_v39 = vrot.slane %v396_v29, 4  ;;  %v420_v40 = vsel %vm255_vm1, %v412_v12, %v419_v33  ;;  %v229_v30 = vpop.f32.mrf.mxu1  ;;  %v869_v36 = vsel %vm255_vm1, %v800_v54, %v868_v59 }
 0x13a   :  { %v475_v43 = vpack.c.bf16 %v414_v38, %v414_v38  ;;  %v478_v44 = vpack.c.bf16 %v420_v40, %v420_v40  ;;  %486 = vst.msk [vmem:[#allocation2 + $0x8] sm:$0xf] %vm483_vm2, %v477_v34  ;;  %v335_v46 = vrot.slane %v330_v37, 4  ;;  %v338_v45 = vsel %vm255_vm1, %v330_v37, %v337_v5 }
 0x13b   :  { %v416_v61 = vsel %vm255_vm1, %v408_v22, %v415_v39  ;;  %v346_v47 = vperm.slane %v338_v45, %v2288_v57  ;;  %v347_v50 = vrot.slane %v334_v41, 4  ;;  %v350_v52 = vsel %vm255_vm1, %v334_v41, %v349_v1 }
 0x13c   :  { %v476_v55 = vpack.c.bf16 %v416_v61, %v416_v61  ;;  %484 = vst.msk [vmem:[#allocation2] sm:$0xf] %vm483_vm2, %v475_v43  ;;  %v336_v56 = vsel %vm255_vm1, %v335_v46, %v2283_v53  ;;  %v358_v58 = vperm.slane %v350_v52, %v2288_v57  ;;  %v879_v5 = vsel %vm255_vm1, %v878_v3, %v794_v42 }
 0x13d   :  { %487 = vst.msk [vmem:[#allocation2 + $0xc] sm:$0xf] %vm483_vm2, %v478_v44  ;;  %v342_v60 = vperm.slane %v336_v56, %v2288_v57  ;;  %v348_v62 = vsel %vm255_vm1, %v347_v50, %v2279_v51  ;;  %v361_v63 = vrot.slane %v346_v47, 4  ;;  %v880_v1 = vrot.slane %v794_v42, 4 }
 0x13e   :  { %485 = vst.msk [vmem:[#allocation2 + $0x4] sm:$0xf] %vm483_vm2, %v476_v55  ;;  %v354_v48 = vperm.slane %v348_v62, %v2288_v57  ;;  %v365_v0 = vrot.slane %v358_v58, 4  ;;  %v885_v53 = vperm.slane %v879_v5, %v2266_v32  ;;  %v867_v34 = vsel %vm255_vm1, %v866_v2, %v2257_v25 }
 0x13f   :  { %v359_v4 = vrot.slane %v342_v60, 4  ;;  %v362_v3 = vsel %vm255_vm1, 0.0, %v361_v63  ;;  %v421_v6 = vsel %vm255_vm1, %v361_v63, %v342_v60  ;;  %v881_v7 = vsel %vm255_vm1, %v2327_v49, %v880_v1 }
 0x140   :  { %v363_v8 = vrot.slane %v354_v48, 4  ;;  %v366_v51 = vsel %vm255_vm1, 0.0, %v365_v0  ;;  %v425_v9 = vperm.slane %v421_v6, %v2266_v32  ;;  %v426_v10 = vrot.slane %v362_v3, 4 }
 0x141   :  { %v360_v11 = vsel %vm255_vm1, 0.0, %v359_v4  ;;  %v432_v12 = vsel %vm255_vm1, %v365_v0, %v354_v48  ;;  %v437_v15 = vrot.slane %v366_v51, 4  ;;  %v889_v16 = vperm.slane %v881_v7, %v2266_v32  ;;  %v1040_v7 = vld [vmem:[#allocation2 + $0x8] sm:$0xf] }
 0x142   :  { %v364_v18 = vsel %vm255_vm1, 0.0, %v363_v8  ;;  %v427_v19 = vsel %vm255_vm1, %v426_v10, %v360_v11  ;;  %v436_v17 = vperm.slane %v432_v12, %v2266_v32  ;;  %v445_v49 = vrot.slane %v425_v9, 4 }
 0x143   :  { %v431_v22 = vperm.slane %v427_v19, %v2266_v32  ;;  %v438_v23 = vsel %vm255_vm1, %v437_v15, %v364_v18  ;;  %v890_v26 = vrot.slane %v885_v53, 4  ;;  %v902_v29 = vrot.slane %v889_v16, 4  ;;  %v1038_v8 = vld [vmem:[#allocation2] sm:$0xf] }
 0x144   :  { %v442_v31 = vperm.slane %v438_v23, %v2266_v32  ;;  %v457_v33 = vrot.slane %v436_v17, 4  ;;  %v873_v39 = vperm.slane %v867_v34, %v2266_v32  ;;  %v877_v40 = vperm.slane %v869_v36, %v2266_v32  ;;  %v1041_v12 = vld [vmem:[#allocation2 + $0xc] sm:$0xf] }
 0x145   :  { %v443_v37 = vrot.slane %v431_v22, 4  ;;  %v446_v38 = vsel %vm255_vm1, %v431_v22, %v445_v49  ;;  %v2428_v44 = vadd.f32 %v2412_v21, %v229_v30  ;;  %v926_v15 = vperm.slane %v2361_v27, %v2266_v32 }
 0x146   :  { %v454_v41 = vperm.slane %v446_v38, %v2288_v57  ;;  %v455_v42 = vrot.slane %v442_v31, 4  ;;  %v458_v43 = vsel %vm255_vm1, %v442_v31, %v457_v33  ;;  %v891_v59 = vsel %vm255_vm1, %v890_v26, %v873_v39 }
 0x147   :  { %v444_v46 = vsel %vm255_vm1, %v443_v37, %v425_v9  ;;  %v466_v25 = vperm.slane %v458_v43, %v2288_v57  ;;  %v892_v45 = vrot.slane %v873_v39, 4  ;;  %v897_v52 = vperm.slane %v891_v59, %v2288_v57  ;;  %494 = vrot.lane.b32.xlu1 %v2428_v44, %s2129_s14  ;;  %506 = vrot.lane.b32.xlu0 %v2428_v44, %s2128_s1 }
 0x148   :  { %v450_v61 = vperm.slane %v444_v46, %v2288_v57  ;;  %v456_v47 = vsel %vm255_vm1, %v455_v42, %v436_v17  ;;  %v473_v50 = vrot.slane %v454_v41, 4  ;;  %v903_v58 = vsel %vm255_vm1, %v902_v29, %v877_v40  ;;  %500 = vrot.lane.b32.xlu2 %v2428_v44, %s2130_s6 }
 0x149   :  { %v462_v54 = vperm.slane %v456_v47, %v2288_v57  ;;  %v471_v55 = vrot.slane %v466_v25, 4  ;;  %v893_v56 = vsel %vm255_vm1, %v885_v53, %v892_v45  ;;  %v904_v63 = vrot.slane %v877_v40, 4 }
 0x14a   :  { %v469_v5 = vrot.slane %v450_v61, 4  ;;  %v474_v60 = vsel %vm255_vm1, %v466_v25, %v473_v50  ;;  %v901_v62 = vperm.slane %v893_v56, %v2288_v57  ;;  %v909_v2 = vperm.slane %v903_v58, %v2288_v57 }
 0x14b   :  { %v467_v1 = vrot.slane %v462_v54, 4  ;;  %v472_v48 = vsel %vm255_vm1, %v471_v55, %v454_v41  ;;  %v482_v0 = vpack.c.bf16 %v474_v60, %v474_v60  ;;  %v905_v3 = vsel %vm255_vm1, %v889_v16, %v904_v63  ;;  %v1039_v16 = vld [vmem:[#allocation2 + $0x4] sm:$0xf] }
 0x14c   :  { %v470_v4 = vsel %vm255_vm1, %v462_v54, %v469_v5  ;;  %v481_v53 = vpack.c.bf16 %v472_v48, %v472_v48  ;;  %v914_v6 = vrot.slane %v897_v52, 4  ;;  %v913_v10 = vperm.slane %v905_v3, %v2288_v57 }
 0x14d   :  { %v468_v51 = vsel %vm255_vm1, %v467_v1, %v450_v61  ;;  %v480_v9 = vpack.c.bf16 %v470_v4, %v470_v4  ;;  %491 = vst.msk [vmem:[#allocation2 + $0x1c] sm:$0xf] %vm483_vm2, %v482_v0  ;;  %v916_v11 = vrot.slane %v901_v62, 4  ;;  %v938_v18 = vrot.slane %v2358_v13, 4 }
 0x14e   :  { %v479_v19 = vpack.c.bf16 %v468_v51, %v468_v51  ;;  %490 = vst.msk [vmem:[#allocation2 + $0x18] sm:$0xf] %vm483_vm2, %v481_v53  ;;  %v918_v49 = vrot.slane %v909_v2, 4  ;;  %v920_v22 = vrot.slane %v913_v10, 4  ;;  %v1089_v23 = vsel %vm1046_vm3, %v1040_v7, 0 }
 0x14f   :  { %489 = vst.msk [vmem:[#allocation2 + $0x14] sm:$0xf] %vm483_vm2, %v480_v9  ;;  %v917_v17 = vsel %vm255_vm1, 0.0, %v916_v11  ;;  %v937_v26 = vperm.slane %v2367_v35, %v2266_v32  ;;  %v915_v13 = vsel %vm255_vm1, 0.0, %v914_v6  ;;  %1098 = vmatpush.bf16.xpose.msrb.mxu1 %v1089_v23  ;;  %v1051_v29 = vsel %vm1046_vm3, %v1038_v8, 0 }
 0x150   :  { %488 = vst.msk [vmem:[#allocation2 + $0x10] sm:$0xf] %vm483_vm2, %v479_v19  ;;  %v981_v27 = vrot.slane %v917_v17, 4  ;;  %v921_v30 = vsel %vm255_vm1, 0.0, %v920_v22  ;;  %v976_v31 = vsel %vm255_vm1, %v916_v11, %v897_v52  ;;  %1060 = vmatpush.bf16.xpose.msra.mxu3 %v1051_v29  ;;  %v1108_v33 = vsel %vm1046_vm3, %v1041_v12, 0 }
 0x151   :  { %v1070_v34 = vsel %vm1046_vm3, %v1039_v16, 0  ;;  %v987_v35 = vsel %vm255_vm1, %v920_v22, %v909_v2  ;;  %v992_v37 = vrot.slane %v921_v30, 4  ;;  %1117 = vmatpush.bf16.xpose.msrb.mxu2 %v1108_v33  ;;  %v919_v38 = vsel %vm255_vm1, 0.0, %v918_v49 }
 0x152   :  { %v982_v36 = vsel %vm255_vm1, %v981_v27, %v915_v13  ;;  %1079 = vmatpush.bf16.xpose.msrb.mxu0 %v1070_v34  ;;  %v928_v39 = vsel %vm255_vm1, %v927_v28, %v2349_v20  ;;  %v939_v40 = vsel %vm255_vm1, %v938_v18, %v2354_v24  ;;  %v946_v41 = vrot.slane %v926_v15, 4 }
 0x153   :  { %v980_v42 = vperm.slane %v976_v31, %v2266_v32  ;;  %v993_v43 = vsel %vm255_vm1, %v992_v37, %v919_v38  ;;  %v932_v25 = vperm.slane %v928_v39, %v2266_v32  ;;  %v943_v59 = vperm.slane %v939_v40, %v2266_v32 }
 0x154   :  { %v1045_v46 = vld [vmem:[#allocation2 + $0x1c] sm:$0xf]  ;;  %v986_v45 = vperm.slane %v982_v36, %v2266_v32  ;;  %v991_v61 = vperm.slane %v987_v35, %v2266_v32  ;;  %v958_v28 = vrot.slane %v937_v26, 4  ;;  %v997_v55 = vperm.slane %v993_v43, %v2266_v32 }
 0x155   :  { %v1184_v14 = vsel %vm1046_vm3, %v1045_v46, 0  ;;  %v1044_v20 = vld [vmem:[#allocation2 + $0x18] sm:$0xf]  ;;  %v947_v50 = vsel %vm255_vm1, %v932_v25, %v946_v41  ;;  %v944_v52 = vrot.slane %v932_v25, 4  ;;  %v956_v54 = vrot.slane %v943_v59, 4 }
 0x156   :  { %v1165_v24 = vsel %vm1046_vm3, %v1044_v20, 0  ;;  %v1043_v47 = vld [vmem:[#allocation2 + $0x14] sm:$0xf]  ;;  %v955_v5 = vperm.slane %v947_v50, %v2288_v57  ;;  %v959_v60 = vsel %vm255_vm1, %v943_v59, %v958_v28  ;;  %v1000_v53 = vrot.slane %v980_v42, 4 }
 0x157   :  { %1174 = vmatpush.bf16.xpose.msra.mxu1 %v1165_v24  ;;  %v1146_v56 = vsel %vm1046_vm3, %v1043_v47, 0  ;;  %v1042_v58 = vld [vmem:[#allocation2 + $0x10] sm:$0xf]  ;;  %v967_v63 = vperm.slane %v959_v60, %v2288_v57  ;;  %v945_v1 = vsel %vm255_vm1, %v944_v52, %v926_v15  ;;  %v957_v48 = vsel %vm255_vm1, %v956_v54, %v937_v26 }
 0x158   :  { %v1127_v62 = vsel %vm1046_vm3, %v1042_v58, 0  ;;  %v951_v0 = vperm.slane %v945_v1, %v2288_v57  ;;  %v963_v2 = vperm.slane %v957_v48, %v2288_v57  ;;  %v974_v4 = vrot.slane %v955_v5, 4 }
 0x159   :  { %1193 = vmatpush.bf16.xpose.msra.mxu2 %v1184_v14  ;;  %1136 = vmatpush.bf16.xpose.msrb.mxu3 %v1127_v62  ;;  %v972_v3 = vrot.slane %v967_v63, 4  ;;  %v1012_v6 = vrot.slane %v991_v61, 4  ;;  %v1010_v9 = vrot.slane %v997_v55, 4  ;;  %v998_v12 = vrot.slane %v986_v45, 4 }
 0x15a   :  { %1155 = vmatpush.bf16.xpose.msra.mxu0 %v1146_v56  ;;  %v968_v7 = vrot.slane %v963_v2, 4  ;;  %v970_v8 = vrot.slane %v951_v0, 4  ;;  %v975_v51 = vsel %vm255_vm1, %v967_v63, %v974_v4  ;;  %v1001_v49 = vsel %vm255_vm1, %v986_v45, %v1000_v53 }
 0x15b   :  { %v973_v10 = vsel %vm255_vm1, %v972_v3, %v955_v5  ;;  %v1033_v11 = vpack.c.bf16 %v975_v51, %v975_v51  ;;  %v1013_v22 = vsel %vm255_vm1, %v997_v55, %v1012_v6  ;;  %v999_v23 = vsel %vm255_vm1, %v998_v12, %v980_v42 }
 0x15c   :  { %v1032_v15 = vpack.c.bf16 %v973_v10, %v973_v10  ;;  %v969_v18 = vsel %vm255_vm1, %v968_v7, %v951_v0  ;;  %v971_v19 = vsel %vm255_vm1, %v963_v2, %v970_v8  ;;  %v1011_v26 = vsel %vm255_vm1, %v1010_v9, %v991_v61 }
 0x15d   :  { %v1030_v16 = vpack.c.bf16 %v969_v18, %v969_v18  ;;  %1800 = vmatmul.msk.bf16.vlgmr.msrb.gmra.mxu2 %vm1046_vm3, %v1033_v11  ;;  %v1031_v17 = vpack.c.bf16 %v971_v19, %v971_v19  ;;  %v1009_v13 = vperm.slane %v1001_v49, %v2288_v57  ;;  %v1021_v27 = vperm.slane %v1013_v22, %v2288_v57 }
 0x15e   :  { %1799 = vmatmul.msk.bf16.vlgmr.msrb.gmra.mxu1 %vm1046_vm3, %v1032_v15  ;;  %v1005_v29 = vperm.slane %v999_v23, %v2288_v57  ;;  %v1017_v30 = vperm.slane %v1011_v26, %v2288_v57  ;;  %v514_v25 = vrot.slane %v2428_v44, 4 }
 0x15f   :  { %1797 = vmatmul.msk.bf16.vlgmr.msra.gmra.mxu3 %vm1046_vm3, %v1030_v16  ;;  %1798 = vmatmul.msk.bf16.vlgmr.msrb.gmra.mxu0 %vm1046_vm3, %v1031_v17  ;;  %v1028_v31 = vrot.slane %v1009_v13, 4  ;;  %v1026_v33 = vrot.slane %v1021_v27, 4 }
 0x160   :  { %v1022_v34 = vrot.slane %v1017_v30, 4  ;;  %v1024_v36 = vrot.slane %v1005_v29, 4 }
 0x161   :  { %v1029_v35 = vsel %vm255_vm1, %v1021_v27, %v1028_v31  ;;  %v1027_v37 = vsel %vm255_vm1, %v1026_v33, %v1009_v13 }
 0x162   :  { %v1023_v38 = vsel %vm255_vm1, %v1022_v34, %v1005_v29  ;;  %v1025_v39 = vsel %vm255_vm1, %v1017_v30, %v1024_v36  ;;  %v1037_v40 = vpack.c.bf16 %v1029_v35, %v1029_v35  ;;  %v1036_v41 = vpack.c.bf16 %v1027_v37, %v1027_v37 }
 0x163   :  { %v1034_v42 = vpack.c.bf16 %v1023_v38, %v1023_v38  ;;  %v1035_v43 = vpack.c.bf16 %v1025_v39, %v1025_v39 }
 0x16d   :  { %1804 = vmatmul.msk.bf16.vlgmr.msra.gmra.mxu2 %vm1046_vm3, %v1037_v40 }
 0x16e   :  { %1803 = vmatmul.msk.bf16.vlgmr.msra.gmra.mxu1 %vm1046_vm3, %v1036_v41 }
 0x16f   :  { %1801 = vmatmul.msk.bf16.vlgmr.msrb.gmra.mxu3 %vm1046_vm3, %v1034_v42  ;;  %1802 = vmatmul.msk.bf16.vlgmr.msra.gmra.mxu0 %vm1046_vm3, %v1035_v43 }
 0x1a2   :  { %v501_v46 = vpop.permute.xlu2 %500 }
 0x1a3   :  { %v512_v59 = vrot.slane %v501_v46, 4  ;;  %v515_v61 = vsel %vm255_vm1, %v501_v46, %v514_v25 }
 0x1a4   :  { %v523_v20 = vperm.slane %v515_v61, %v2266_v32 }
 0x1a5   :  { %v513_v45 = vsel %vm255_vm1, %v512_v59, %v2428_v44 }
 0x1a6   :  { %v519_v14 = vperm.slane %v513_v45, %v2266_v32  ;;  %v550_v54 = vrot.slane %v523_v20, 4 }
 0x1a8   :  { %v538_v52 = vrot.slane %v519_v14, 4 }
 0x1b9   :  { %v495_v28 = vpop.permute.xlu1 %494  ;;  %v507_v24 = vpop.permute.xlu0 %506 }
 0x1ba   :  { %v526_v47 = vrot.slane %v495_v28, 4  ;;  %v524_v50 = vrot.slane %v507_v24, 4 }
 0x1bc   :  { %v525_v55 = vsel %vm255_vm1, %v524_v50, %v495_v28  ;;  %v527_v56 = vsel %vm255_vm1, %v507_v24, %v526_v47  ;;  %v231_v24 = vpop.f32.mrf.mxu1 }
 0x1bd   :  { %v531_v58 = vperm.slane %v525_v55, %v2266_v32  ;;  %v535_v44 = vperm.slane %v527_v56, %v2266_v32 }
 0x1bf   :  { %v536_v5 = vrot.slane %v531_v58, 4  ;;  %v539_v60 = vsel %vm255_vm1, %v531_v58, %v538_v52  ;;  %v548_v62 = vrot.slane %v535_v44, 4  ;;  %v551_v63 = vsel %vm255_vm1, %v535_v44, %v550_v54 }
 0x1c0   :  { %v547_v1 = vperm.slane %v539_v60, %v2288_v57  ;;  %v559_v48 = vperm.slane %v551_v63, %v2288_v57 }
 0x1c1   :  { %v537_v0 = vsel %vm255_vm1, %v536_v5, %v519_v14  ;;  %v549_v2 = vsel %vm255_vm1, %v548_v62, %v523_v20 }
 0x1c2   :  { %v543_v4 = vperm.slane %v537_v0, %v2288_v57  ;;  %v555_v53 = vperm.slane %v549_v2, %v2288_v57  ;;  %v562_v3 = vrot.slane %v547_v1, 4  ;;  %v566_v6 = vrot.slane %v559_v48, 4 }
 0x1c4   :  { %v560_v7 = vrot.slane %v543_v4, 4  ;;  %v563_v8 = vsel %vm255_vm1, 0.0, %v562_v3  ;;  %v564_v51 = vrot.slane %v555_v53, 4  ;;  %v567_v9 = vsel %vm255_vm1, 0.0, %v566_v6 }
 0x1c5   :  { %v624_v10 = vsel %vm255_vm1, %v562_v3, %v543_v4  ;;  %v629_v11 = vrot.slane %v563_v8, 4  ;;  %v635_v12 = vsel %vm255_vm1, %v566_v6, %v555_v53  ;;  %v640_v15 = vrot.slane %v567_v9, 4 }
 0x1c6   :  { %v561_v18 = vsel %vm255_vm1, 0.0, %v560_v7  ;;  %v565_v19 = vsel %vm255_vm1, 0.0, %v564_v51  ;;  %v628_v16 = vperm.slane %v624_v10, %v2266_v32  ;;  %v639_v17 = vperm.slane %v635_v12, %v2266_v32 }
 0x1c7   :  { %v630_v49 = vsel %vm255_vm1, %v629_v11, %v561_v18  ;;  %v641_v22 = vsel %vm255_vm1, %v640_v15, %v565_v19 }
 0x1c8   :  { %v634_v23 = vperm.slane %v630_v49, %v2266_v32  ;;  %v645_v26 = vperm.slane %v641_v22, %v2266_v32  ;;  %v648_v13 = vrot.slane %v628_v16, 4  ;;  %v660_v27 = vrot.slane %v639_v17, 4 }
 0x1c9   :  { %v2581_v49 = vadd.f32 %v2412_v21, %v231_v24 }
 0x1ca   :  { %v646_v29 = vrot.slane %v634_v23, 4  ;;  %v649_v30 = vsel %vm255_vm1, %v634_v23, %v648_v13  ;;  %v658_v31 = vrot.slane %v645_v26, 4  ;;  %v661_v33 = vsel %vm255_vm1, %v645_v26, %v660_v27 }
 0x1cb   :  { %v657_v34 = vperm.slane %v649_v30, %v2288_v57  ;;  %v669_v36 = vperm.slane %v661_v33, %v2288_v57 }
 0x1cc   :  { %v647_v35 = vsel %vm255_vm1, %v646_v29, %v628_v16  ;;  %v659_v37 = vsel %vm255_vm1, %v658_v31, %v639_v17 }
 0x1cd   :  { %v653_v38 = vperm.slane %v647_v35, %v2288_v57  ;;  %v665_v39 = vperm.slane %v659_v37, %v2288_v57  ;;  %v674_v40 = vrot.slane %v669_v36, 4  ;;  %v676_v41 = vrot.slane %v657_v34, 4 }
 0x1cf   :  { %v670_v42 = vrot.slane %v665_v39, 4  ;;  %v672_v43 = vrot.slane %v653_v38, 4  ;;  %v675_v46 = vsel %vm255_vm1, %v674_v40, %v657_v34  ;;  %v677_v25 = vsel %vm255_vm1, %v669_v36, %v676_v41 }
 0x1d0   :  { %v734_v59 = vpack.c.bf16 %v675_v46, %v675_v46  ;;  %v735_v45 = vpack.c.bf16 %v677_v25, %v677_v25 }
 0x1d1   :  { %v671_v61 = vsel %vm255_vm1, %v670_v42, %v653_v38  ;;  %v673_v14 = vsel %vm255_vm1, %v665_v39, %v672_v43 }
 0x1d2   :  { %v732_v20 = vpack.c.bf16 %v671_v61, %v671_v61  ;;  %v733_v28 = vpack.c.bf16 %v673_v14, %v673_v14  ;;  %742 = vst.msk [vmem:[#allocation3 + $0x8] sm:$0xf] %vm483_vm2, %v734_v59 }
 0x1d3   :  { %743 = vst.msk [vmem:[#allocation3 + $0xc] sm:$0xf] %vm483_vm2, %v735_v45 }
 0x1d4   :  { %740 = vst.msk [vmem:[#allocation3] sm:$0xf] %vm483_vm2, %v732_v20 }
 0x1d5   :  { %741 = vst.msk [vmem:[#allocation3 + $0x4] sm:$0xf] %vm483_vm2, %v733_v28 }
 0x1d9   :  { %v1297_v47 = vld [vmem:[#allocation3 + $0x8] sm:$0xf] }
 0x1da   :  { %v1346_v50 = vsel %vm1306_vm4, %v1297_v47, 0  ;;  %v1298_v52 = vld [vmem:[#allocation3 + $0xc] sm:$0xf] }
 0x1db   :  { %v1100_v54 = vpop.f32.mrf.mxu1  ;;  %v1295_v55 = vld [vmem:[#allocation3] sm:$0xf]  ;;  %1355 = vmatpush.bf16.msrb.mxu1 %v1346_v50  ;;  %v1365_v56 = vsel %vm1306_vm4, %v1298_v52, 0 }
 0x1dc   :  { %v1205_v58 = vsel %vm1046_vm3, %v1100_v54, -inf  ;;  %v1081_v44 = vpop.f32.mrf.mxu0  ;;  %v1308_v5 = vsel %vm1306_vm4, %v1295_v55, 0  ;;  %v1296_v60 = vld [vmem:[#allocation3 + $0x4] sm:$0xf]  ;;  %1374 = vmatpush.bf16.msrb.mxu2 %v1365_v56 }
 0x1dd   :  { %1206 = vmax.xlane.f32.xlu2 %v1205_v58  ;;  %1317 = vmatpush.bf16.msra.mxu3 %v1308_v5  ;;  %v1327_v62 = vsel %vm1306_vm4, %v1296_v60, 0  ;;  %v1202_v4 = vsel %vm1046_vm3, %v1081_v44, -inf }
 0x1de   :  { %1336 = vmatpush.bf16.msrb.mxu0 %v1327_v62 }
 0x1e0   :  { %v1119_v63 = vpop.f32.mrf.mxu2 }
 0x1e1   :  { %v1208_v1 = vsel %vm1046_vm3, %v1119_v63, -inf }
 0x1e2   :  { %v1062_v48 = vpop.f32.mrf.mxu3  ;;  %1209 = vmax.xlane.f32.xlu1 %v1208_v1 }
 0x1e3   :  { %v1102_v0 = vpop.f32.mrf.mxu1  ;;  %v1199_v2 = vsel %vm1046_vm3, %v1062_v48, -inf }
 0x1e4   :  { %1200 = vmax.xlane.f32.xlu0 %v1199_v2  ;;  %v1083_v53 = vpop.f32.mrf.mxu0 }
 0x1e5   :  { %1203 = vmax.xlane.f32.xlu2 %v1202_v4 }
 0x1e8   :  { %v1121_v3 = vpop.f32.mrf.mxu2 }
 0x1ea   :  { %v1064_v6 = vpop.f32.mrf.mxu3 }
 0x1eb   :  { %v1176_v7 = vpop.f32.mrf.mxu1 }
 0x1ec   :  { %v1217_v8 = vsel %vm1046_vm3, %v1176_v7, -inf  ;;  %v1157_v51 = vpop.f32.mrf.mxu0 }
 0x1ed   :  { %1218 = vmax.xlane.f32.xlu2 %v1217_v8  ;;  %v1214_v9 = vsel %vm1046_vm3, %v1157_v51, -inf }
 0x1ee   :  { %1215 = vmax.xlane.f32.xlu0 %v1214_v9 }
 0x1f0   :  { %v1195_v10 = vpop.f32.mrf.mxu2 }
 0x1f1   :  { %v1220_v11 = vsel %vm1046_vm3, %v1195_v10, -inf }
 0x1f2   :  { %v1138_v12 = vpop.f32.mrf.mxu3  ;;  %1221 = vmax.xlane.f32.xlu1 %v1220_v11 }
 0x1f3   :  { %v1178_v15 = vpop.f32.mrf.mxu1  ;;  %v1211_v19 = vsel %vm1046_vm3, %v1138_v12, -inf }
 0x1f4   :  { %v1159_v18 = vpop.f32.mrf.mxu0 }
 0x1f6   :  { %1212 = vmax.xlane.f32.xlu0 %v1211_v19 }
 0x1f8   :  { %v1197_v16 = vpop.f32.mrf.mxu2 }
 0x1fa   :  { %v1140_v17 = vpop.f32.mrf.mxu3 }
 0x205   :  { %508 = vrot.lane.b32.xlu2 %v2581_v49, %s2128_s1 }
 0x20a   :  { %502 = vrot.lane.b32.xlu0 %v2581_v49, %s2130_s6 }
 0x20b   :  { %496 = vrot.lane.b32.xlu1 %v2581_v49, %s2129_s14 }
 0x250   :  { %v1207_v22 = vpop.xlane.xlu2 %1206 }
 0x251   :  { %v1225_v23 = vsub.f32 %v1100_v54, %v1207_v22 }
 0x253   :  { %v1235_v26 = vmul.f32 1.442695, %v1225_v23 }
 0x255   :  { %1883 = vpow2.f32 %v1235_v26  ;;  %v1210_v13 = vpop.xlane.xlu1 %1209 }
 0x256   :  { %v1226_v27 = vsub.f32 %v1119_v63, %v1210_v13  ;;  %v570_v63 = vrot.slane %v2581_v49, 4 }
 0x257   :  { %v1201_v29 = vpop.xlane.xlu0 %1200 }
 0x258   :  { %v1237_v30 = vmul.f32 1.442695, %v1226_v27  ;;  %v1204_v31 = vpop.xlane.xlu2 %1203  ;;  %v1223_v21 = vsub.f32 %v1062_v48, %v1201_v29 }
 0x259   :  { %v1224_v33 = vsub.f32 %v1081_v44, %v1204_v31 }
 0x25a   :  { %1885 = vpow2.f32 %v1237_v30  ;;  %v1231_v34 = vmul.f32 1.442695, %v1223_v21 }
 0x25b   :  { %v2589_v36 = vpop.eup %1883  ;;  %v1233_v37 = vmul.f32 1.442695, %v1224_v33 }
 0x25c   :  { %1887 = vpow2.f32 %v1231_v34  ;;  %v1253_v35 = vsel %vm1046_vm3, %v2589_v36, 0.0 }
 0x25d   :  { %1254 = vadd.xlane.f32.xlu2 %v1253_v35  ;;  %1889 = vpow2.f32 %v1233_v37 }
 0x260   :  { %v2593_v38 = vpop.eup %1885  ;;  %v1219_v39 = vpop.xlane.xlu2 %1218 }
 0x261   :  { %v1229_v40 = vsub.f32 %v1176_v7, %v1219_v39  ;;  %v1216_v41 = vpop.xlane.xlu0 %1215  ;;  %v1256_v42 = vsel %vm1046_vm3, %v2593_v38, 0.0 }
 0x262   :  { %v2597_v43 = vpop.eup %1887  ;;  %1257 = vadd.xlane.f32.xlu0 %v1256_v42  ;;  %v1228_v47 = vsub.f32 %v1157_v51, %v1216_v41 }
 0x263   :  { %v1247_v46 = vsel %vm1046_vm3, %v2597_v43, 0.0  ;;  %v1243_v25 = vmul.f32 1.442695, %v1229_v40  ;;  %v2601_v61 = vpop.eup %1889 }
 0x264   :  { %1248 = vadd.xlane.f32.xlu1 %v1247_v46  ;;  %v1250_v24 = vsel %vm1046_vm3, %v2601_v61, 0.0  ;;  %v1241_v55 = vmul.f32 1.442695, %v1228_v47 }
 0x265   :  { %v1222_v59 = vpop.xlane.xlu1 %1221  ;;  %1891 = vpow2.f32 %v1243_v25 }
 0x266   :  { %v1230_v45 = vsub.f32 %v1195_v10, %v1222_v59 }
 0x268   :  { %v1245_v14 = vmul.f32 1.442695, %v1230_v45  ;;  %v509_v60 = vpop.permute.xlu2 %508 }
 0x269   :  { %v1213_v20 = vpop.xlane.xlu0 %1212  ;;  %v580_v1 = vrot.slane %v509_v60, 4 }
 0x26a   :  { %1893 = vpow2.f32 %v1245_v14  ;;  %v1227_v28 = vsub.f32 %v1138_v12, %v1213_v20 }
 0x26b   :  { %v2605_v52 = vpop.eup %1891 }
 0x26c   :  { %v1239_v50 = vmul.f32 1.442695, %v1227_v28  ;;  %1251 = vadd.xlane.f32.xlu1 %v1250_v24  ;;  %v1265_v58 = vsel %vm1046_vm3, %v2605_v52, 0.0 }
 0x26e   :  { %1895 = vpow2.f32 %v1239_v50 }
 0x26f   :  { %1897 = vpow2.f32 %v1241_v55 }
 0x270   :  { %v2607_v54 = vpop.eup %1893 }
 0x271   :  { %v1268_v56 = vsel %vm1046_vm3, %v2607_v54, 0.0 }
 0x272   :  { %1269 = vadd.xlane.f32.xlu2 %v1268_v56 }
 0x274   :  { %v2613_v44 = vpop.eup %1895  ;;  %1266 = vadd.xlane.f32.xlu1 %v1265_v58 }
 0x275   :  { %v1259_v5 = vsel %vm1046_vm3, %v2613_v44, 0.0  ;;  %v2617_v62 = vpop.eup %1897 }
 0x276   :  { %1260 = vadd.xlane.f32.xlu0 %v1259_v5  ;;  %v1262_v53 = vsel %vm1046_vm3, %v2617_v62, 0.0 }
 0x27c   :  { %v503_v48 = vpop.permute.xlu0 %502 }
 0x27d   :  { %v568_v0 = vrot.slane %v503_v48, 4  ;;  %v571_v2 = vsel %vm255_vm1, %v503_v48, %v570_v63  ;;  %v497_v4 = vpop.permute.xlu1 %496 }
 0x27e   :  { %v579_v3 = vperm.slane %v571_v2, %v2266_v32  ;;  %v581_v6 = vsel %vm255_vm1, %v580_v1, %v497_v4  ;;  %v582_v7 = vrot.slane %v497_v4, 4  ;;  %1263 = vadd.xlane.f32.xlu0 %v1262_v53 }
 0x27f   :  { %v569_v8 = vsel %vm255_vm1, %v568_v0, %v2581_v49  ;;  %v587_v51 = vperm.slane %v581_v6, %v2266_v32 }
 0x280   :  { %v575_v9 = vperm.slane %v569_v8, %v2266_v32  ;;  %v606_v10 = vrot.slane %v579_v3, 4  ;;  %v583_v11 = vsel %vm255_vm1, %v509_v60, %v582_v7 }
 0x281   :  { %v591_v12 = vperm.slane %v583_v11, %v2266_v32  ;;  %v592_v15 = vrot.slane %v587_v51, 4 }
 0x282   :  { %v594_v18 = vrot.slane %v575_v9, 4 }
 0x283   :  { %v593_v19 = vsel %vm255_vm1, %v592_v15, %v575_v9  ;;  %v604_v16 = vrot.slane %v591_v12, 4  ;;  %v607_v17 = vsel %vm255_vm1, %v591_v12, %v606_v10 }
 0x284   :  { %v595_v22 = vsel %vm255_vm1, %v587_v51, %v594_v18  ;;  %v599_v49 = vperm.slane %v593_v19, %v2288_v57  ;;  %v615_v23 = vperm.slane %v607_v17, %v2288_v57 }
 0x285   :  { %v603_v26 = vperm.slane %v595_v22, %v2288_v57  ;;  %v605_v13 = vsel %vm255_vm1, %v604_v16, %v579_v3 }
 0x286   :  { %v611_v27 = vperm.slane %v605_v13, %v2288_v57  ;;  %v622_v29 = vrot.slane %v615_v23, 4  ;;  %v616_v30 = vrot.slane %v599_v49, 4 }
 0x287   :  { %v618_v31 = vrot.slane %v603_v26, 4 }
 0x288   :  { %v620_v21 = vrot.slane %v611_v27, 4  ;;  %v623_v33 = vsel %vm255_vm1, 0.0, %v622_v29  ;;  %v689_v34 = vsel %vm255_vm1, %v622_v29, %v611_v27  ;;  %v617_v25 = vsel %vm255_vm1, 0.0, %v616_v30 }
 0x289   :  { %v619_v35 = vsel %vm255_vm1, 0.0, %v618_v31  ;;  %v678_v37 = vsel %vm255_vm1, %v618_v31, %v599_v49  ;;  %v693_v39 = vperm.slane %v689_v34, %v2266_v32  ;;  %v694_v40 = vrot.slane %v623_v33, 4 }
 0x28a   :  { %v621_v41 = vsel %vm255_vm1, 0.0, %v620_v21  ;;  %v682_v42 = vperm.slane %v678_v37, %v2266_v32  ;;  %v683_v46 = vrot.slane %v619_v35, 4 }
 0x28b   :  { %v695_v59 = vsel %vm255_vm1, %v694_v40, %v621_v41  ;;  %v714_v45 = vrot.slane %v693_v39, 4 }
 0x28c   :  { %v684_v14 = vsel %vm255_vm1, %v683_v46, %v617_v25  ;;  %v699_v20 = vperm.slane %v695_v59, %v2266_v32  ;;  %v702_v28 = vrot.slane %v682_v42, 4 }
 0x28d   :  { %v688_v24 = vperm.slane %v684_v14, %v2266_v32 }
 0x28e   :  { %v712_v47 = vrot.slane %v699_v20, 4  ;;  %v715_v50 = vsel %vm255_vm1, %v699_v20, %v714_v45 }
 0x28f   :  { %v700_v55 = vrot.slane %v688_v24, 4  ;;  %v703_v56 = vsel %vm255_vm1, %v688_v24, %v702_v28  ;;  %v723_v58 = vperm.slane %v715_v50, %v2288_v57 }
 0x290   :  { %v711_v5 = vperm.slane %v703_v56, %v2288_v57  ;;  %v713_v60 = vsel %vm255_vm1, %v712_v47, %v693_v39 }
 0x291   :  { %v701_v63 = vsel %vm255_vm1, %v700_v55, %v682_v42  ;;  %v719_v1 = vperm.slane %v713_v60, %v2288_v57  ;;  %v728_v48 = vrot.slane %v723_v58, 4 }
 0x292   :  { %v707_v0 = vperm.slane %v701_v63, %v2288_v57  ;;  %v730_v2 = vrot.slane %v711_v5, 4 }
 0x293   :  { %v724_v4 = vrot.slane %v719_v1, 4  ;;  %v729_v53 = vsel %vm255_vm1, %v728_v48, %v711_v5 }
 0x294   :  { %v726_v3 = vrot.slane %v707_v0, 4  ;;  %v731_v6 = vsel %vm255_vm1, %v723_v58, %v730_v2  ;;  %v738_v7 = vpack.c.bf16 %v729_v53, %v729_v53 }
 0x295   :  { %v725_v8 = vsel %vm255_vm1, %v724_v4, %v707_v0  ;;  %v739_v51 = vpack.c.bf16 %v731_v6, %v731_v6 }
 0x296   :  { %v727_v9 = vsel %vm255_vm1, %v719_v1, %v726_v3  ;;  %v736_v10 = vpack.c.bf16 %v725_v8, %v725_v8  ;;  %746 = vst.msk [vmem:[#allocation3 + $0x18] sm:$0xf] %vm483_vm2, %v738_v7 }
 0x297   :  { %v737_v11 = vpack.c.bf16 %v727_v9, %v727_v9  ;;  %747 = vst.msk [vmem:[#allocation3 + $0x1c] sm:$0xf] %vm483_vm2, %v739_v51 }
 0x298   :  { %744 = vst.msk [vmem:[#allocation3 + $0x10] sm:$0xf] %vm483_vm2, %v736_v10 }
 0x299   :  { %745 = vst.msk [vmem:[#allocation3 + $0x14] sm:$0xf] %vm483_vm2, %v737_v11 }
 0x29d   :  { %v1301_v12 = vld [vmem:[#allocation3 + $0x18] sm:$0xf] }
 0x29e   :  { %v1422_v15 = vsel %vm1306_vm4, %v1301_v12, 0  ;;  %v1302_v18 = vld [vmem:[#allocation3 + $0x1c] sm:$0xf] }
 0x29f   :  { %1431 = vmatpush.bf16.msra.mxu1 %v1422_v15  ;;  %v1441_v19 = vsel %vm1306_vm4, %v1302_v18, 0  ;;  %v1299_v16 = vld [vmem:[#allocation3 + $0x10] sm:$0xf] }
 0x2a0   :  { %1450 = vmatpush.bf16.msra.mxu2 %v1441_v19  ;;  %v1384_v17 = vsel %vm1306_vm4, %v1299_v16, 0  ;;  %v1300_v22 = vld [vmem:[#allocation3 + $0x14] sm:$0xf] }
 0x2a1   :  { %1393 = vmatpush.bf16.msrb.mxu3 %v1384_v17  ;;  %v1403_v49 = vsel %vm1306_vm4, %v1300_v22, 0 }
 0x2a2   :  { %1412 = vmatpush.bf16.msra.mxu0 %v1403_v49 }
 0x2d0   :  { %v1255_v23 = vpop.xlane.xlu2 %1254 }
 0x2d1   :  { %1899 = vrcp.f32 %v1255_v23 }
 0x2d5   :  { %v1258_v26 = vpop.xlane.xlu0 %1257 }
 0x2d6   :  { %1901 = vrcp.f32 %v1258_v26 }
 0x2d7   :  { %v1900_v13 = vpop.eup %1899  ;;  %v1249_v27 = vpop.xlane.xlu1 %1248 }
 0x2d8   :  { %v1281_v29 = vmul.f32 %v1900_v13, %v2589_v36  ;;  %1903 = vrcp.f32 %v1249_v27 }
 0x2da   :  { %v1289_v30 = vpack.c.bf16 %v1281_v29, %v1281_v29 }
 0x2dc   :  { %v1902_v31 = vpop.eup %1901  ;;  %1807 = vmatmul.msk.bf16.vlgmr.msrb.gmra.mxu1 %vm1046_vm3, %v1289_v30 }
 0x2dd   :  { %v1282_v21 = vmul.f32 %v1902_v31, %v2593_v38 }
 0x2de   :  { %v1904_v33 = vpop.eup %1903 }
 0x2df   :  { %v1279_v34 = vmul.f32 %v1904_v33, %v2597_v43  ;;  %v1290_v35 = vpack.c.bf16 %v1282_v21, %v1282_v21  ;;  %v1252_v37 = vpop.xlane.xlu1 %1251 }
 0x2e0   :  { %1905 = vrcp.f32 %v1252_v37 }
 0x2e1   :  { %v1287_v39 = vpack.c.bf16 %v1279_v34, %v1279_v34  ;;  %1808 = vmatmul.msk.bf16.vlgmr.msrb.gmra.mxu2 %vm1046_vm3, %v1290_v35 }
 0x2e3   :  { %1805 = vmatmul.msk.bf16.vlgmr.msra.gmra.mxu3 %vm1046_vm3, %v1287_v39 }
 0x2e5   :  { %v1270_v40 = vpop.xlane.xlu2 %1269 }
 0x2e6   :  { %v1906_v36 = vpop.eup %1905  ;;  %1907 = vrcp.f32 %v1270_v40 }
 0x2e7   :  { %v1280_v41 = vmul.f32 %v1906_v36, %v2601_v61  ;;  %v1267_v42 = vpop.xlane.xlu1 %1266 }
 0x2e8   :  { %1909 = vrcp.f32 %v1267_v42 }
 0x2e9   :  { %v1288_v46 = vpack.c.bf16 %v1280_v41, %v1280_v41  ;;  %v1261_v38 = vpop.xlane.xlu0 %1260 }
 0x2ea   :  { %1911 = vrcp.f32 %v1261_v38 }
 0x2eb   :  { %1806 = vmatmul.msk.bf16.vlgmr.msrb.gmra.mxu0 %vm1046_vm3, %v1288_v46 }
 0x2ec   :  { %v1908_v43 = vpop.eup %1907 }
 0x2ed   :  { %v1286_v25 = vmul.f32 %v1908_v43, %v2607_v54 }
 0x2ee   :  { %v1910_v59 = vpop.eup %1909 }
 0x2ef   :  { %v1294_v45 = vpack.c.bf16 %v1286_v25, %v1286_v25  ;;  %v1285_v14 = vmul.f32 %v1910_v59, %v2605_v52 }
 0x2f0   :  { %v1912_v20 = vpop.eup %1911 }
 0x2f1   :  { %v1293_v28 = vpack.c.bf16 %v1285_v14, %v1285_v14  ;;  %v1283_v24 = vmul.f32 %v1912_v20, %v2613_v44  ;;  %1812 = vmatmul.msk.bf16.vlgmr.msra.gmra.mxu2 %vm1046_vm3, %v1294_v45  ;;  %v1264_v61 = vpop.xlane.xlu0 %1263 }
 0x2f2   :  { %1913 = vrcp.f32 %v1264_v61 }
 0x2f3   :  { %v1291_v47 = vpack.c.bf16 %v1283_v24, %v1283_v24  ;;  %1811 = vmatmul.msk.bf16.vlgmr.msra.gmra.mxu1 %vm1046_vm3, %v1293_v28 }
 0x2f5   :  { %1809 = vmatmul.msk.bf16.vlgmr.msrb.gmra.mxu3 %vm1046_vm3, %v1291_v47 }
 0x2f8   :  { %v1914_v50 = vpop.eup %1913 }
 0x2f9   :  { %v1284_v54 = vmul.f32 %v1914_v50, %v2617_v62 }
 0x2fb   :  { %v1292_v55 = vpack.c.bf16 %v1284_v54, %v1284_v54 }
 0x2fd   :  { %1810 = vmatmul.msk.bf16.vlgmr.msra.gmra.mxu0 %vm1046_vm3, %v1292_v55 }
 0x359   :  { %v1357_v52 = vpop.f32.mrf.mxu1 }
 0x35a   :  { %v1456_v5 = vrot.slane %v1357_v52, 4 }
 0x361   :  { %v1359_v56 = vpop.f32.mrf.mxu1 }
 0x364   :  { %v1376_v58 = vpop.f32.mrf.mxu2 }
 0x365   :  { %v1468_v44 = vrot.slane %v1376_v58, 4 }
 0x366   :  { %v1319_v60 = vpop.f32.mrf.mxu3 }
 0x367   :  { %v1457_v63 = vsel %vm255_vm1, %v1456_v5, %v1319_v60  ;;  %v1458_v1 = vrot.slane %v1319_v60, 4 }
 0x368   :  { %v1463_v48 = vperm.slane %v1457_v63, %v2266_v32  ;;  %v1338_v0 = vpop.f32.mrf.mxu0 }
 0x369   :  { %v1459_v2 = vsel %vm255_vm1, %v1357_v52, %v1458_v1  ;;  %v1469_v4 = vsel %vm255_vm1, %v1468_v44, %v1338_v0  ;;  %v1470_v62 = vrot.slane %v1338_v0, 4 }
 0x36a   :  { %v1467_v53 = vperm.slane %v1459_v2, %v2266_v32  ;;  %v1482_v3 = vrot.slane %v1463_v48, 4  ;;  %v1475_v6 = vperm.slane %v1469_v4, %v2266_v32 }
 0x36b   :  { %v1471_v7 = vsel %vm255_vm1, %v1376_v58, %v1470_v62 }
 0x36c   :  { %v1494_v8 = vrot.slane %v1467_v53, 4  ;;  %v1479_v51 = vperm.slane %v1471_v7, %v2266_v32  ;;  %v1480_v9 = vrot.slane %v1475_v6, 4  ;;  %v1483_v10 = vsel %vm255_vm1, %v1475_v6, %v1482_v3  ;;  %v1378_v11 = vpop.f32.mrf.mxu2 }
 0x36d   :  { %v1491_v12 = vperm.slane %v1483_v10, %v2288_v57 }
 0x36e   :  { %v1481_v15 = vsel %vm255_vm1, %v1480_v9, %v1463_v48  ;;  %v1492_v18 = vrot.slane %v1479_v51, 4  ;;  %v1495_v19 = vsel %vm255_vm1, %v1479_v51, %v1494_v8  ;;  %v1321_v16 = vpop.f32.mrf.mxu3 }
 0x36f   :  { %v1487_v17 = vperm.slane %v1481_v15, %v2288_v57  ;;  %v1503_v22 = vperm.slane %v1495_v19, %v2288_v57  ;;  %v1506_v49 = vrot.slane %v1491_v12, 4 }
 0x370   :  { %v1493_v23 = vsel %vm255_vm1, %v1492_v18, %v1467_v53  ;;  %v1340_v26 = vpop.f32.mrf.mxu0  ;;  %v1433_v13 = vpop.f32.mrf.mxu1 }
 0x371   :  { %v1499_v27 = vperm.slane %v1493_v23, %v2288_v57  ;;  %v1504_v29 = vrot.slane %v1487_v17, 4  ;;  %v1507_v30 = vsel %vm255_vm1, 0.0, %v1506_v49  ;;  %v1510_v31 = vrot.slane %v1503_v22, 4 }
 0x372   :  { %v1573_v21 = vrot.slane %v1507_v30, 4  ;;  %v1568_v37 = vsel %vm255_vm1, %v1506_v49, %v1487_v17  ;;  %v1512_v25 = vrot.slane %v1433_v13, 4 }
 0x373   :  { %v1505_v33 = vsel %vm255_vm1, 0.0, %v1504_v29  ;;  %v1508_v34 = vrot.slane %v1499_v27, 4  ;;  %v1511_v35 = vsel %vm255_vm1, 0.0, %v1510_v31  ;;  %v1579_v42 = vsel %vm255_vm1, %v1510_v31, %v1499_v27 }
 0x374   :  { %v1574_v39 = vsel %vm255_vm1, %v1573_v21, %v1505_v33  ;;  %v1584_v40 = vrot.slane %v1511_v35, 4  ;;  %v1452_v36 = vpop.f32.mrf.mxu2  ;;  %v1572_v43 = vperm.slane %v1568_v37, %v2266_v32  ;;  %v1583_v28 = vperm.slane %v1579_v42, %v2266_v32 }
 0x375   :  { %v1578_v41 = vperm.slane %v1574_v39, %v2266_v32  ;;  %v1509_v46 = vsel %vm255_vm1, 0.0, %v1508_v34  ;;  %v1524_v45 = vrot.slane %v1452_v36, 4 }
 0x376   :  { %v1585_v38 = vsel %vm255_vm1, %v1584_v40, %v1509_v46  ;;  %v1592_v52 = vrot.slane %v1572_v43, 4  ;;  %v1604_v2 = vrot.slane %v1583_v28, 4 }
 0x377   :  { %v1589_v59 = vperm.slane %v1585_v38, %v2266_v32  ;;  %v1590_v47 = vrot.slane %v1578_v41, 4 }
 0x378   :  { %v1435_v14 = vpop.f32.mrf.mxu1  ;;  %v1395_v20 = vpop.f32.mrf.mxu3  ;;  %v1593_v17 = vsel %vm255_vm1, %v1578_v41, %v1592_v52 }
 0x379   :  { %v1513_v24 = vsel %vm255_vm1, %v1512_v25, %v1395_v20  ;;  %v1514_v61 = vrot.slane %v1395_v20, 4  ;;  %v1602_v50 = vrot.slane %v1589_v59, 4  ;;  %v1591_v4 = vsel %vm255_vm1, %v1590_v47, %v1572_v43 }
 0x37a   :  { %v1519_v54 = vperm.slane %v1513_v24, %v2266_v32  ;;  %v1414_v55 = vpop.f32.mrf.mxu0  ;;  %v1597_v15 = vperm.slane %v1591_v4, %v2288_v57  ;;  %v1605_v23 = vsel %vm255_vm1, %v1589_v59, %v1604_v2  ;;  %v1601_v33 = vperm.slane %v1593_v17, %v2288_v57 }
 0x37b   :  { %v1515_v56 = vsel %vm255_vm1, %v1433_v13, %v1514_v61  ;;  %v1525_v58 = vsel %vm255_vm1, %v1524_v45, %v1414_v55  ;;  %v1526_v5 = vrot.slane %v1414_v55, 4  ;;  %v1603_v48 = vsel %vm255_vm1, %v1602_v50, %v1583_v28 }
 0x37c   :  { %v1523_v44 = vperm.slane %v1515_v56, %v2266_v32  ;;  %v1538_v60 = vrot.slane %v1519_v54, 4  ;;  %v1531_v63 = vperm.slane %v1525_v58, %v2266_v32  ;;  %v1454_v1 = vpop.f32.mrf.mxu2  ;;  %v2725_v62 = vperm.slane %v1603_v48, %v2288_v57 }
 0x37d   :  { %v1527_v0 = vsel %vm255_vm1, %v1452_v36, %v1526_v5  ;;  %v1613_v42 = vperm.slane %v1605_v23, %v2288_v57  ;;  %v1620_v59 = vrot.slane %v1601_v33, 4  ;;  %v1616_v58 = vrot.slane %v1597_v15, 4 }
 0x37e   :  { %v1550_v53 = vrot.slane %v1523_v44, 4  ;;  %v1535_v3 = vperm.slane %v1527_v0, %v2266_v32  ;;  %v1536_v6 = vrot.slane %v1531_v63, 4  ;;  %v1539_v7 = vsel %vm255_vm1, %v1531_v63, %v1538_v60 }
 0x37f   :  { %v1547_v8 = vperm.slane %v1539_v7, %v2288_v57  ;;  %v1614_v51 = vrot.slane %v2725_v62, 4  ;;  %v1618_v50 = vrot.slane %v1613_v42, 4 }
 0x380   :  { %v1537_v9 = vsel %vm255_vm1, %v1536_v6, %v1519_v54  ;;  %v1548_v10 = vrot.slane %v1535_v3, 4  ;;  %v1551_v11 = vsel %vm255_vm1, %v1535_v3, %v1550_v53  ;;  %v1397_v12 = vpop.f32.mrf.mxu3  ;;  %v1617_v53 = vsel %vm255_vm1, %v2725_v62, %v1616_v58 }
 0x381   :  { %v1543_v18 = vperm.slane %v1537_v9, %v2288_v57  ;;  %v1559_v19 = vperm.slane %v1551_v11, %v2288_v57  ;;  %v1562_v16 = vrot.slane %v1547_v8, 4  ;;  %v2740_v26 = vsel %vm255_vm1, %v1614_v51, %v1597_v15  ;;  %v1828_v9 = vld [vmem:[#allocation15] sm:$0xff] }
 0x382   :  { %v1549_v22 = vsel %vm255_vm1, %v1548_v10, %v1523_v44  ;;  %v1416_v49 = vpop.f32.mrf.mxu0  ;;  %v1619_v2 = vsel %vm255_vm1, %v1618_v50, %v1601_v33 }
 0x383   :  { %v1555_v13 = vperm.slane %v1549_v22, %v2288_v57  ;;  %v1560_v27 = vrot.slane %v1543_v18, 4  ;;  %v1563_v29 = vsel %vm255_vm1, 0.0, %v1562_v16  ;;  %v1566_v30 = vrot.slane %v1559_v19, 4 }
 0x384   :  { %v1622_v31 = vsel %vm255_vm1, %v1562_v16, %v1543_v18  ;;  %v1627_v21 = vrot.slane %v1563_v29, 4 }
 0x385   :  { %v1561_v34 = vsel %vm255_vm1, 0.0, %v1560_v27  ;;  %v1564_v35 = vrot.slane %v1555_v13, 4  ;;  %v1567_v37 = vsel %vm255_vm1, 0.0, %v1566_v30  ;;  %v1626_v39 = vperm.slane %v1622_v31, %v2266_v32  ;;  %v1882_v31 = vld [vmem:[%s2799_s10] ss:$0 sm:$0xff] }
 0x386   :  { %v1628_v40 = vsel %vm255_vm1, %v1627_v21, %v1561_v34  ;;  %v1633_v36 = vsel %vm255_vm1, %v1566_v30, %v1555_v13  ;;  %v1638_v41 = vrot.slane %v1567_v37, 4 }
 0x387   :  { %v1632_v46 = vperm.slane %v1628_v40, %v2266_v32  ;;  %v1646_v38 = vrot.slane %v1626_v39, 4  ;;  %v1565_v43 = vsel %vm255_vm1, 0.0, %v1564_v35  ;;  %v1637_v25 = vperm.slane %v1633_v36, %v2266_v32 }
 0x388   :  { %v1639_v45 = vsel %vm255_vm1, %v1638_v41, %v1565_v43 }
 0x389   :  { %v1643_v14 = vperm.slane %v1639_v45, %v2266_v32  ;;  %v1647_v20 = vsel %vm255_vm1, %v1632_v46, %v1646_v38  ;;  %v1658_v28 = vrot.slane %v1637_v25, 4  ;;  %v1644_v24 = vrot.slane %v1632_v46, 4 }
 0x38a   :  { %v1655_v61 = vperm.slane %v1647_v20, %v2288_v57  ;;  %v1621_v32 = vsel %vm255_vm1, %v1613_v42, %v1620_v59 }
 0x38b   :  { %v1659_v47 = vsel %vm255_vm1, %v1643_v14, %v1658_v28  ;;  %v1645_v54 = vsel %vm255_vm1, %v1644_v24, %v1626_v39  ;;  %v1656_v55 = vrot.slane %v1643_v14, 4 }
 0x38c   :  { %v1667_v52 = vperm.slane %v1659_v47, %v2288_v57  ;;  %v1674_v56 = vrot.slane %v1655_v61, 4  ;;  %v1651_v5 = vperm.slane %v1645_v54, %v2288_v57 }
 0x38d   :  { %v1657_v44 = vsel %vm255_vm1, %v1656_v55, %v1637_v25 }
 0x38e   :  { %v1675_v60 = vsel %vm255_vm1, %v1667_v52, %v1674_v56  ;;  %v1672_v63 = vrot.slane %v1667_v52, 4  ;;  %v1663_v1 = vperm.slane %v1657_v44, %v2288_v57  ;;  %v1670_v48 = vrot.slane %v1651_v5, 4  ;;  %v1829_v57 = vld [vmem:[#allocation15 + $0x8] sm:$0xff] }
 0x38f   :  { %v1874_v0 = vpack.i.bf16 %v1675_v60, %v1621_v32  ;;  %1738 = vmatpush.bf16.msra.mxu3 %v1829_v57 }
 0x390   :  { %v1673_v4 = vsel %vm255_vm1, %v1672_v63, %v1655_v61  ;;  %v1668_v3 = vrot.slane %v1663_v1, 4  ;;  %v1671_v6 = vsel %vm255_vm1, %v1663_v1, %v1670_v48 }
 0x391   :  { %1875 = vrot.lane.b32.xlu0 %v1874_v0, %s2133_s8  ;;  %v1869_v7 = vpack.i.bf16 %v1673_v4, %v1619_v2  ;;  %v1864_v8 = vpack.i.bf16 %v1671_v6, %v1617_v53 }
 0x392   :  { %v1669_v51 = vsel %vm255_vm1, %v1668_v3, %v1651_v5 }
 0x393   :  { %1870 = vrot.lane.b32.xlu1 %v1869_v7, %s2134_s18  ;;  %1865 = vrot.lane.b32.xlu2 %v1864_v8, %s2119_s26 }
 0x394   :  { %1739 = vmatpush.bf16.msra.mxu3 %v1828_v9 }
 0x3ed   :  { %v1866_v10 = vpop.permute.xlu2 %1865 }
 0x3ee   :  { %v1868_v11 = vunpack.i.h.bf16 %v1866_v10  ;;  %v1867_v62 = vunpack.i.l.bf16 %v1866_v10 }
 0x3f0   :  { %v1700_v16 = vsel %vm1046_vm3, %v2740_v26, %v1867_v62  ;;  %v1701_v17 = vsel %vm1046_vm3, %v1669_v51, %v1868_v11 }
 0x403   :  { %v1876_v12 = vpop.permute.xlu0 %1875 }
 0x404   :  { %v1878_v22 = vunpack.i.h.bf16 %v1876_v12  ;;  %v1877_v49 = vunpack.i.l.bf16 %v1876_v12 }
 0x405   :  { %v1871_v15 = vpop.permute.xlu1 %1870 }
 0x406   :  { %v1873_v18 = vunpack.i.h.bf16 %v1871_v15  ;;  %v1872_v19 = vunpack.i.l.bf16 %v1871_v15 }
 0x408   :  { %v1703_v23 = vsel %vm1702_vm5, %v1700_v16, %v1872_v19  ;;  %v1704_v13 = vsel %vm1702_vm5, %v1701_v17, %v1873_v18 }
 0x409   :  { %v1706_v27 = vsel %vm1705_vm6, %v1703_v23, %v1877_v49  ;;  %v1707_v29 = vsel %vm1705_vm6, %v1704_v13, %v1878_v22 }
 0x40a   :  { %v1708_v30 = vpack.c.bf16 %v1707_v29, %v1706_v27 }
 0x40c   :  { %1821 = vmatmul.msk.bf16.vlgmr.msra.gmra.mxu3 %vm179_vm0, %v1708_v30 }
 0x48f   :  { %v1741_v21 = vpop.f32.mrf.mxu3 }
 0x490   :  { %v1742_v33 = vadd.f32 %v1882_v31, %v1741_v21 }
 0x492   :  { %1746 = vst.msk [vmem:[#allocation16] sm:$0xff] %vm179_vm0, %v1742_v33 }
 0x497   :  { %v1743_v26 = vpop.f32.mrf.mxu3 }
 0x498   :  { %v1744_v34 = vadd.f32 %v1882_v31, %v1743_v26 }
 0x49a   :  { %1747 = vst.msk [vmem:[#allocation16 + $0x8] sm:$0xff] %vm179_vm0, %v1744_v34 }
 0x49b   :  { %1760 = dma.vmem_to_hbm [thread:$0]  %s1753_s22, 256, %s1755_s0, [#allocation6], %s2118_s25, %s2118_s25, %s2119_s26  }
 0x49c   :  { %2115 = dma.done.wait [#allocation6], 256  }
 0x49d   :  { %2116 = vsyncadd [#allocation6], 4294967040 }
 0x49e   :  { %1765 = vsyncpa [#allocation5], 1 }
 0x49f   :  { %1766 = vsyncpa [#allocation8], 1 }
 0x4a0   :  { %1767 = vsyncpa [#allocation11], 1 }
 0x4a1   :  { %1768 = vsyncpa [#allocation14], 1 }
 0x4a2   :  { %1769 = vsyncpa [#allocation6], 1 }

// kernel: tpu_custom_call.1
= control target key start
LH: loop header
LB: loop body
LE: loop exit
PB: predicated region body
PF: predicated region fallthrough
CT: control target
= control target key end

     0   :  { %16 = vsyncpa [#allocation5], 0  ;;  %s2789_s0 = inlined_call_operand.hbm [shape: f32[2,8,32], index: 0, kind: input, shape index: {}]   ;;  %s2790_s1 = inlined_call_operand.hbm [shape: f32[2,8,32], index: 1, kind: input, shape index: {}]   ;;  %s2791_s2 = inlined_call_operand.hbm [shape: f32[2,8,32], index: 2, kind: input, shape index: {}]   ;;  %s2792_s3 = inlined_call_operand.hbm [shape: bf16[32,32], index: 3, kind: input, shape index: {}]   ;;  %s2793_s4 = inlined_call_operand.vmem [shape: f32[1,32], index: 4, kind: input, shape index: {}]   ;;  %s2794_s5 = inlined_call_operand.hbm [shape: bf16[32,32], index: 5, kind: input, shape index: {}]   ;;  %s2795_s6 = inlined_call_operand.vmem [shape: f32[1,32], index: 6, kind: input, shape index: {}]   ;;  %s2796_s7 = inlined_call_operand.hbm [shape: bf16[32,32], index: 7, kind: input, shape index: {}]   ;;  %s2797_s8 = inlined_call_operand.vmem [shape: f32[1,32], index: 8, kind: input, shape index: {}]   ;;  %s2798_s9 = inlined_call_operand.hbm [shape: bf16[32,32], index: 9, kind: input, shape index: {}]   ;;  %s2799_s10 = inlined_call_operand.vmem [shape: f32[1,32], index: 10, kind: input, shape index: {}]   ;;  %s2800_s11 = inlined_call_operand.hbm [shape: f32[2,8,32], index: 11, kind: output, shape index: {}]  }
   0x1   :  { %17 = vsyncpa [#allocation8], 0 }
   0x2   :  { %18 = vsyncpa [#allocation11], 0 }
   0x3   :  { %19 = vsyncpa [#allocation14], 0 }
   0x4   :  { %20 = vsyncpa [#allocation6], 0  ;;  %s38_s19 = sshll.u32 %s2790_s1, 4  ;;  %s2117_s20 = smov [#allocation7]   ;;  %s39_s19 = int_to_ptr.hbm [resolvable:$true] %s38_s19 }
   0x5   :  { %s40_s21 = sshll.u32 %s2117_s20, 4  ;;  %s64_s24 = sshll.u32 %s2792_s3, 4  ;;  %s41_s21 = int_to_ptr.vmem [resolvable:$true] %s40_s21  ;;  %s65_s24 = int_to_ptr.hbm [resolvable:$true] %s64_s24 }
   0x6   :  { %s2118_s25 = smov 128   ;;  %s2119_s26 = smov 8  }
   0x7   :  { %46 = dma.hbm_to_vmem [thread:$0]  %s39_s19, 256, %s41_s21, [#allocation8], %s2118_s25, %s2118_s25, %s2119_s26  }
   0x8   :  { %s2120_s27 = smov [#allocation10]   ;;  %s2121_s29 = smov 64  }
   0x9   :  { %s66_s28 = sshll.u32 %s2120_s27, 4  ;;  %s2122_s1 = smov 4   ;;  %s67_s28 = int_to_ptr.vmem [resolvable:$true] %s66_s28 }
   0xa   :  { %72 = dma.hbm_to_vmem [thread:$0]  %s65_s24, 256, %s67_s28, [#allocation11], %s2121_s29, %s2121_s29, %s2122_s1  }
   0xb   :  { %s94_s3 = sshll.u32 %s2796_s7, 4  ;;  %s2123_s13 = smov [#allocation13]   ;;  %s95_s3 = int_to_ptr.hbm [resolvable:$true] %s94_s3 }
   0xc   :  { %s96_s14 = sshll.u32 %s2123_s13, 4  ;;  %s25_s17 = sshll.u32 %s2789_s0, 4  ;;  %s97_s14 = int_to_ptr.vmem [resolvable:$true] %s96_s14  ;;  %s26_s17 = int_to_ptr.hbm [resolvable:$true] %s25_s17 }
   0xd   :  { %102 = dma.hbm_to_vmem [thread:$0]  %s95_s3, 256, %s97_s14, [#allocation14], %s2121_s29, %s2121_s29, %s2122_s1  }
   0xe   :  { %s2124_s18 = smov [#allocation4]   ;;  %s51_s22 = sshll.u32 %s2791_s2, 4  ;;  %s52_s22 = int_to_ptr.hbm [resolvable:$true] %s51_s22 }
   0xf   :  { %s27_s19 = sshll.u32 %s2124_s18, 4  ;;  %s79_s0 = sshll.u32 %s2794_s5, 4  ;;  %s28_s19 = int_to_ptr.vmem [resolvable:$true] %s27_s19  ;;  %s80_s0 = int_to_ptr.hbm [resolvable:$true] %s79_s0 }
  0x10   :  { %33 = dma.hbm_to_vmem [thread:$0]  %s26_s17, 256, %s28_s19, [#allocation5], %s2118_s25, %s2118_s25, %s2119_s26  }
  0x11   :  { %s2125_s24 = smov [#allocation9]   ;;  %s2126_s28 = smov [#allocation12]  }
  0x12   :  { %s53_s27 = sshll.u32 %s2125_s24, 4  ;;  %s81_s2 = sshll.u32 %s2126_s28, 4  ;;  %s54_s27 = int_to_ptr.vmem [resolvable:$true] %s53_s27  ;;  %s82_s2 = int_to_ptr.vmem [resolvable:$true] %s81_s2 }
  0x13   :  { %59 = dma.hbm_to_vmem [thread:$0]  %s52_s22, 256, %s54_s27, [#allocation8], %s2118_s25, %s2118_s25, %s2119_s26  }
  0x14   :  { %s109_s3 = sshll.u32 %s2798_s9, 4  ;;  %s2127_s5 = smov [#allocation15]   ;;  %s110_s3 = int_to_ptr.hbm [resolvable:$true] %s109_s3 }
  0x15   :  { %87 = dma.hbm_to_vmem [thread:$0]  %s80_s0, 256, %s82_s2, [#allocation11], %s2121_s29, %s2121_s29, %s2122_s1  }
  0x16   :  { %s111_s13 = sshll.u32 %s2127_s5, 4  ;;  %s112_s13 = int_to_ptr.vmem [resolvable:$true] %s111_s13 }
  0x17   :  { %117 = dma.hbm_to_vmem [thread:$0]  %s110_s3, 256, %s112_s13, [#allocation14], %s2121_s29, %s2121_s29, %s2122_s1  }
  0x18   :  { %2107 = dma.done.wait [#allocation5], 256  }
  0x19   :  { %2108 = vsyncadd [#allocation5], 4294967040 }
  0x1a   :  { %2109 = dma.done.wait [#allocation8], 512  }
  0x1b   :  { %2110 = vsyncadd [#allocation8], 4294966784 }
  0x1c   :  { %2111 = dma.done.wait [#allocation11], 512  }
  0x1d   :  { %2112 = vsyncadd [#allocation11], 4294966784 }
  0x1e   :  { %2113 = dma.done.wait [#allocation14], 512  }
  0x1f   :  { %2114 = vsyncadd [#allocation14], 4294966784  ;;  %v1823_v0 = vld [vmem:[#allocation12 + $0x8] sm:$0xff]  ;;  %v1827_v1 = vld [vmem:[#allocation10 + $0x8] sm:$0xff]  ;;  %vm179_vm0 = vcmask 261120   ;;  %s2128_s1 = smov 104  }
  0x20   :  { %v1822_v2 = vld [vmem:[#allocation12] sm:$0xff]  ;;  %v1826_v3 = vld [vmem:[#allocation10] sm:$0xff]  ;;  %v154_v5 = vld [vmem:[#allocation7 + $0x8] sm:$0xff]  ;;  %189 = vmatpush.bf16.msra.mxu0 %v1823_v0  ;;  %781 = vmatpush.bf16.msra.mxu2 %v1827_v1  ;;  %s2129_s14 = smov 120   ;;  %v2131_v28 = vmov 1983009808  }
  0x21   :  { %v153_v4 = vld [vmem:[#allocation7] sm:$0xff]  ;;  %v748_v6 = vld [vmem:[#allocation4] sm:$0xff]  ;;  %v749_v7 = vld [vmem:[#allocation4 + $0x8] sm:$0xff]  ;;  %v260_v29 = vunpack.c.l.s4 %v2131_v28  ;;  %vm255_vm1 = vcmask 1047556   ;;  %v2132_v46 = vmov 1934713408  }
  0x22   :  { %v155_v8 = vpack.c.bf16 %v154_v5, %v153_v4  ;;  %v750_v9 = vpack.c.bf16 %v749_v7, %v748_v6  ;;  %v1825_v10 = vld [vmem:[#allocation13 + $0x8] sm:$0xff]  ;;  %v1824_v11 = vld [vmem:[#allocation13] sm:$0xff]  ;;  %v156_v12 = vld [vmem:[#allocation9] sm:$0xff]  ;;  %v284_v47 = vunpack.c.l.s4 %v2132_v46  ;;  %vm483_vm2 = vcmask 60416   ;;  %s2134_s18 = smov 16   ;;  %s2135_s21 = smov [#allocation16]  }
  0x23   :  { %226 = vmatpush.bf16.msra.mxu1 %v1825_v10  ;;  %v157_v13 = vld [vmem:[#allocation9 + $0x8] sm:$0xff]  ;;  %v1879_v15 = vld [vmem:[%s2795_s6] ss:$0 sm:$0xff]  ;;  %s2130_s6 = smov 112   ;;  %v2266_v32 = vunpack.c.0.s8 %v260_v29  ;;  %vm1046_vm3 = vcmask 64512   ;;  %vm1306_vm4 = vcmask 1043456  }
  0x24   :  { %190 = vmatpush.bf16.msra.mxu0 %v1822_v2  ;;  %782 = vmatpush.bf16.msra.mxu2 %v1826_v3  ;;  %v158_v14 = vpack.c.bf16 %v157_v13, %v156_v12  ;;  %v1880_v18 = vld [vmem:[%s2793_s4] ss:$0 sm:$0xff]  ;;  %v2288_v57 = vunpack.c.0.s8 %v284_v47  ;;  %vm1702_vm5 = vcmask 130048   ;;  %vm1705_vm6 = vcmask 195584   ;;  %s1752_s22 = sshll.u32 %s2135_s21, 4  ;;  %s1754_s0 = sshll.u32 %s2800_s11, 4  ;;  %s1753_s22 = int_to_ptr.vmem [resolvable:$true] %s1752_s22  ;;  %s1755_s0 = int_to_ptr.hbm [resolvable:$true] %s1754_s0 }
  0x27   :  { %1778 = vmatmul.msk.bf16.vlgmr.msra.gmra.mxu0 %vm179_vm0, %v155_v8  ;;  %1796 = vmatmul.msk.bf16.vlgmr.msra.gmra.mxu2 %vm179_vm0, %v750_v9 }
  0x28   :  { %227 = vmatpush.bf16.msra.mxu1 %v1824_v11 }
  0x2b   :  { %1787 = vmatmul.msk.bf16.vlgmr.msra.gmra.mxu1 %vm179_vm0, %v158_v14 }
  0xa4   :  { %v192_v16 = vpop.f32.mrf.mxu0 }
  0xa5   :  { %v2244_v17 = vadd.f32 %v1879_v15, %v192_v16 }
  0xa7   :  { %248 = vrot.lane.b32.xlu1 %v2244_v17, %s2128_s1  ;;  %236 = vrot.lane.b32.xlu0 %v2244_v17, %s2129_s14  ;;  %v257_v55 = vrot.slane %v2244_v17, 4 }
  0xaa   :  { %v784_v19 = vpop.f32.mrf.mxu2 }
  0xab   :  { %v785_v20 = vadd.f32 %v1880_v18, %v784_v19 }
  0xac   :  { %v194_v21 = vpop.f32.mrf.mxu0 }
  0xad   :  { %v195_v22 = vadd.f32 %v1879_v15, %v194_v21  ;;  %v812_v33 = vrot.slane %v785_v20, 4 }
  0xaf   :  { %242 = vrot.lane.b32.xlu0 %v2244_v17, %s2130_s6  ;;  %v1854_v23 = vpack.i.bf16 %v785_v20, %v195_v22  ;;  %v313_v37 = vrot.slane %v195_v22, 4 }
  0xb1   :  { %1855 = vrot.lane.b32.xlu2 %v1854_v23, %s2130_s6  ;;  %1850 = vrot.lane.b32.xlu1 %v1854_v23, %s2129_s14 }
  0xb2   :  { %v786_v24 = vpop.f32.mrf.mxu2 }
  0xb3   :  { %v2257_v25 = vadd.f32 %v1880_v18, %v786_v24 }
  0xb5   :  { %v868_v59 = vrot.slane %v2257_v25, 4 }
  0xb7   :  { %793 = vrot.lane.b32.xlu0 %v2257_v25, %s2129_s14 }
  0xb9   :  { %1860 = vrot.lane.b32.xlu2 %v1854_v23, %s2128_s1  ;;  %799 = vrot.lane.b32.xlu1 %v2257_v25, %s2130_s6 }
  0xc1   :  { %805 = vrot.lane.b32.xlu2 %v2257_v25, %s2128_s1 }
 0x10b   :  { %v1856_v26 = vpop.permute.xlu2 %1855 }
 0x10c   :  { %v1858_v27 = vunpack.i.h.bf16 %v1856_v26  ;;  %v1857_v30 = vunpack.i.l.bf16 %v1856_v26 }
 0x10e   :  { %v809_v31 = vrot.slane %v1858_v27, 4  ;;  %v311_v34 = vrot.slane %v1857_v30, 4  ;;  %v813_v40 = vsel %vm255_vm1, %v1858_v27, %v812_v33  ;;  %v314_v42 = vsel %vm255_vm1, %v1857_v30, %v313_v37 }
 0x10f   :  { %v821_v48 = vperm.slane %v813_v40, %v2266_v32  ;;  %v2279_v51 = vperm.slane %v314_v42, %v2266_v32 }
 0x110   :  { %v811_v41 = vsel %vm255_vm1, %v809_v31, %v785_v20  ;;  %v312_v44 = vsel %vm255_vm1, %v311_v34, %v195_v22 }
 0x111   :  { %v817_v50 = vperm.slane %v811_v41, %v2266_v32  ;;  %v2283_v53 = vperm.slane %v312_v44, %v2266_v32  ;;  %v848_v60 = vrot.slane %v821_v48, 4  ;;  %v349_v1 = vrot.slane %v2279_v51, 4 }
 0x113   :  { %v2273_v45 = vpop.permute.xlu2 %1860  ;;  %v836_v0 = vrot.slane %v817_v50, 4  ;;  %v337_v5 = vrot.slane %v2283_v53, 4 }
 0x114   :  { %v1863_v54 = vunpack.i.h.bf16 %v2273_v45  ;;  %v1862_v61 = vunpack.i.l.bf16 %v2273_v45 }
 0x116   :  { %v822_v6 = vrot.slane %v1863_v54, 4  ;;  %v323_v13 = vrot.slane %v1862_v61, 4 }
 0x119   :  { %v249_v35 = vpop.permute.xlu1 %248  ;;  %v237_v36 = vpop.permute.xlu0 %236 }
 0x11a   :  { %v267_v38 = vrot.slane %v249_v35, 4  ;;  %v269_v39 = vrot.slane %v237_v36, 4 }
 0x11c   :  { %v270_v43 = vsel %vm255_vm1, %v249_v35, %v269_v39  ;;  %v268_v49 = vsel %vm255_vm1, %v267_v38, %v237_v36 }
 0x11d   :  { %v278_v52 = vperm.slane %v270_v43, %v2266_v32  ;;  %v274_v56 = vperm.slane %v268_v49, %v2266_v32  ;;  %v2327_v49 = vpop.permute.xlu2 %805 }
 0x11f   :  { %v291_v2 = vrot.slane %v278_v52, 4  ;;  %v279_v9 = vrot.slane %v274_v56, 4 }
 0x121   :  { %v243_v58 = vpop.permute.xlu0 %242 }
 0x122   :  { %v254_v62 = vrot.slane %v243_v58, 4  ;;  %v258_v63 = vsel %vm255_vm1, %v243_v58, %v257_v55 }
 0x123   :  { %v266_v3 = vperm.slane %v258_v63, %v2266_v32  ;;  %v2295_v4 = vpop.permute.xlu1 %1850 }
 0x124   :  { %v256_v7 = vsel %vm255_vm1, %v254_v62, %v2244_v17  ;;  %v1853_v8 = vunpack.i.h.bf16 %v2295_v4  ;;  %v1852_v34 = vunpack.i.l.bf16 %v2295_v4 }
 0x125   :  { %v262_v10 = vperm.slane %v256_v7, %v2266_v32  ;;  %v292_v11 = vsel %vm255_vm1, %v291_v2, %v266_v3  ;;  %v293_v12 = vrot.slane %v266_v3, 4  ;;  %v878_v3 = vrot.slane %v2327_v49, 4 }
 0x126   :  { %v298_v14 = vperm.slane %v292_v11, %v2288_v57  ;;  %v823_v15 = vsel %vm255_vm1, %v822_v6, %v1853_v8  ;;  %v824_v16 = vrot.slane %v1853_v8, 4 }
 0x127   :  { %v280_v18 = vsel %vm255_vm1, %v279_v9, %v262_v10  ;;  %v281_v19 = vrot.slane %v262_v10, 4  ;;  %v294_v17 = vsel %vm255_vm1, %v278_v52, %v293_v12  ;;  %v829_v20 = vperm.slane %v823_v15, %v2266_v32 }
 0x128   :  { %v286_v21 = vperm.slane %v280_v18, %v2288_v57  ;;  %v302_v22 = vperm.slane %v294_v17, %v2288_v57  ;;  %v307_v23 = vrot.slane %v298_v14, 4  ;;  %v825_v24 = vsel %vm255_vm1, %v1863_v54, %v824_v16 }
 0x129   :  { %v282_v26 = vsel %vm255_vm1, %v274_v56, %v281_v19  ;;  %v833_v27 = vperm.slane %v825_v24, %v2266_v32  ;;  %v834_v28 = vrot.slane %v829_v20, 4  ;;  %v837_v29 = vsel %vm255_vm1, %v829_v20, %v836_v0 }
 0x12a   :  { %v290_v30 = vperm.slane %v282_v26, %v2288_v57  ;;  %v303_v31 = vrot.slane %v286_v21, 4  ;;  %v309_v33 = vrot.slane %v302_v22, 4  ;;  %v308_v35 = vsel %vm255_vm1, 0.0, %v307_v23 }
 0x12b   :  { %v835_v36 = vsel %vm255_vm1, %v834_v28, %v817_v50  ;;  %v846_v37 = vrot.slane %v833_v27, 4  ;;  %v849_v38 = vsel %vm255_vm1, %v833_v27, %v848_v60  ;;  %v845_v42 = vperm.slane %v837_v29, %v2288_v57 }
 0x12c   :  { %v305_v39 = vrot.slane %v290_v30, 4  ;;  %v310_v40 = vsel %vm255_vm1, 0.0, %v309_v33  ;;  %v378_v41 = vsel %vm255_vm1, %v309_v33, %v298_v14  ;;  %v841_v46 = vperm.slane %v835_v36, %v2288_v57 }
 0x12d   :  { %v382_v43 = vperm.slane %v378_v41, %v2266_v32  ;;  %v383_v44 = vrot.slane %v310_v40, 4  ;;  %v847_v47 = vsel %vm255_vm1, %v846_v37, %v821_v48  ;;  %v857_v55 = vperm.slane %v849_v38, %v2288_v57 }
 0x12e   :  { %v306_v50 = vsel %vm255_vm1, 0.0, %v305_v39  ;;  %v367_v52 = vsel %vm255_vm1, %v305_v39, %v286_v21  ;;  %v853_v54 = vperm.slane %v847_v47, %v2288_v57  ;;  %v304_v63 = vsel %vm255_vm1, 0.0, %v303_v31 }
 0x12f   :  { %v371_v56 = vperm.slane %v367_v52, %v2266_v32  ;;  %v372_v58 = vrot.slane %v306_v50, 4  ;;  %v384_v60 = vsel %vm255_vm1, %v383_v44, %v308_v35  ;;  %v403_v62 = vrot.slane %v382_v43, 4 }
 0x130   :  { %v388_v48 = vperm.slane %v384_v60, %v2266_v32  ;;  %v858_v0 = vrot.slane %v841_v46, 4  ;;  %v860_v2 = vrot.slane %v845_v42, 4  ;;  %v862_v7 = vrot.slane %v853_v54, 4  ;;  %v794_v42 = vpop.permute.xlu0 %793 }
 0x131   :  { %v373_v4 = vsel %vm255_vm1, %v372_v58, %v304_v63  ;;  %v391_v6 = vrot.slane %v371_v56, 4  ;;  %v864_v11 = vrot.slane %v857_v55, 4  ;;  %v324_v15 = vsel %vm255_vm1, %v323_v13, %v1852_v34 }
 0x132   :  { %v377_v8 = vperm.slane %v373_v4, %v2266_v32  ;;  %v401_v9 = vrot.slane %v388_v48, 4  ;;  %v404_v10 = vsel %vm255_vm1, %v388_v48, %v403_v62  ;;  %v2343_v14 = vsel %vm255_vm1, 0.0, %v860_v2 }
 0x133   :  { %v412_v12 = vperm.slane %v404_v10, %v2288_v57  ;;  %v325_v16 = vrot.slane %v1852_v34, 4  ;;  %v2349_v20 = vsel %vm255_vm1, 0.0, %v858_v0  ;;  %v2354_v24 = vsel %vm255_vm1, 0.0, %v862_v7 }
 0x134   :  { %v389_v18 = vrot.slane %v377_v8, 4  ;;  %v392_v19 = vsel %vm255_vm1, %v377_v8, %v391_v6  ;;  %v402_v17 = vsel %vm255_vm1, %v401_v9, %v382_v43  ;;  %v2358_v13 = vsel %vm255_vm1, 0.0, %v864_v11 }
 0x135   :  { %v400_v21 = vperm.slane %v392_v19, %v2288_v57  ;;  %v408_v22 = vperm.slane %v402_v17, %v2288_v57  ;;  %v417_v23 = vrot.slane %v412_v12, 4  ;;  %v2361_v27 = vsel %vm255_vm1, %v860_v2, %v841_v46 }
 0x136   :  { %v390_v26 = vsel %vm255_vm1, %v389_v18, %v371_v56  ;;  %v927_v28 = vrot.slane %v2343_v14, 4  ;;  %v2367_v35 = vsel %vm255_vm1, %v864_v11, %v853_v54  ;;  %v326_v36 = vsel %vm255_vm1, %v1862_v61, %v325_v16  ;;  %v800_v54 = vpop.permute.xlu1 %799 }
 0x137   :  { %v396_v29 = vperm.slane %v390_v26, %v2288_v57  ;;  %v413_v30 = vrot.slane %v408_v22, 4  ;;  %v418_v31 = vsel %vm255_vm1, %v417_v23, %v400_v21  ;;  %v419_v33 = vrot.slane %v400_v21, 4  ;;  %v2412_v21 = vld [vmem:[%s2797_s8] ss:$0 sm:$0xff]  ;;  %s2133_s8 = smov 24  }
 0x138   :  { %v477_v34 = vpack.c.bf16 %v418_v31, %v418_v31  ;;  %v330_v37 = vperm.slane %v324_v15, %v2266_v32  ;;  %v334_v41 = vperm.slane %v326_v36, %v2266_v32  ;;  %v866_v2 = vrot.slane %v800_v54, 4 }
 0x139   :  { %v414_v38 = vsel %vm255_vm1, %v413_v30, %v396_v29  ;;  %v415_v39 = vrot.slane %v396_v29, 4  ;;  %v420_v40 = vsel %vm255_vm1, %v412_v12, %v419_v33  ;;  %v229_v30 = vpop.f32.mrf.mxu1  ;;  %v869_v36 = vsel %vm255_vm1, %v800_v54, %v868_v59 }
 0x13a   :  { %v475_v43 = vpack.c.bf16 %v414_v38, %v414_v38  ;;  %v478_v44 = vpack.c.bf16 %v420_v40, %v420_v40  ;;  %486 = vst.msk [vmem:[#allocation2 + $0x8] sm:$0xf] %vm483_vm2, %v477_v34  ;;  %v335_v46 = vrot.slane %v330_v37, 4  ;;  %v338_v45 = vsel %vm255_vm1, %v330_v37, %v337_v5 }
 0x13b   :  { %v416_v61 = vsel %vm255_vm1, %v408_v22, %v415_v39  ;;  %v346_v47 = vperm.slane %v338_v45, %v2288_v57  ;;  %v347_v50 = vrot.slane %v334_v41, 4  ;;  %v350_v52 = vsel %vm255_vm1, %v334_v41, %v349_v1 }
 0x13c   :  { %v476_v55 = vpack.c.bf16 %v416_v61, %v416_v61  ;;  %484 = vst.msk [vmem:[#allocation2] sm:$0xf] %vm483_vm2, %v475_v43  ;;  %v336_v56 = vsel %vm255_vm1, %v335_v46, %v2283_v53  ;;  %v358_v58 = vperm.slane %v350_v52, %v2288_v57  ;;  %v879_v5 = vsel %vm255_vm1, %v878_v3, %v794_v42 }
 0x13d   :  { %487 = vst.msk [vmem:[#allocation2 + $0xc] sm:$0xf] %vm483_vm2, %v478_v44  ;;  %v342_v60 = vperm.slane %v336_v56, %v2288_v57  ;;  %v348_v62 = vsel %vm255_vm1, %v347_v50, %v2279_v51  ;;  %v361_v63 = vrot.slane %v346_v47, 4  ;;  %v880_v1 = vrot.slane %v794_v42, 4 }
 0x13e   :  { %485 = vst.msk [vmem:[#allocation2 + $0x4] sm:$0xf] %vm483_vm2, %v476_v55  ;;  %v354_v48 = vperm.slane %v348_v62, %v2288_v57  ;;  %v365_v0 = vrot.slane %v358_v58, 4  ;;  %v885_v53 = vperm.slane %v879_v5, %v2266_v32  ;;  %v867_v34 = vsel %vm255_vm1, %v866_v2, %v2257_v25 }
 0x13f   :  { %v359_v4 = vrot.slane %v342_v60, 4  ;;  %v362_v3 = vsel %vm255_vm1, 0.0, %v361_v63  ;;  %v421_v6 = vsel %vm255_vm1, %v361_v63, %v342_v60  ;;  %v881_v7 = vsel %vm255_vm1, %v2327_v49, %v880_v1 }
 0x140   :  { %v363_v8 = vrot.slane %v354_v48, 4  ;;  %v366_v51 = vsel %vm255_vm1, 0.0, %v365_v0  ;;  %v425_v9 = vperm.slane %v421_v6, %v2266_v32  ;;  %v426_v10 = vrot.slane %v362_v3, 4 }
 0x141   :  { %v360_v11 = vsel %vm255_vm1, 0.0, %v359_v4  ;;  %v432_v12 = vsel %vm255_vm1, %v365_v0, %v354_v48  ;;  %v437_v15 = vrot.slane %v366_v51, 4  ;;  %v889_v16 = vperm.slane %v881_v7, %v2266_v32  ;;  %v1040_v7 = vld [vmem:[#allocation2 + $0x8] sm:$0xf] }
 0x142   :  { %v364_v18 = vsel %vm255_vm1, 0.0, %v363_v8  ;;  %v427_v19 = vsel %vm255_vm1, %v426_v10, %v360_v11  ;;  %v436_v17 = vperm.slane %v432_v12, %v2266_v32  ;;  %v445_v49 = vrot.slane %v425_v9, 4 }
 0x143   :  { %v431_v22 = vperm.slane %v427_v19, %v2266_v32  ;;  %v438_v23 = vsel %vm255_vm1, %v437_v15, %v364_v18  ;;  %v890_v26 = vrot.slane %v885_v53, 4  ;;  %v902_v29 = vrot.slane %v889_v16, 4  ;;  %v1038_v8 = vld [vmem:[#allocation2] sm:$0xf] }
 0x144   :  { %v442_v31 = vperm.slane %v438_v23, %v2266_v32  ;;  %v457_v33 = vrot.slane %v436_v17, 4  ;;  %v873_v39 = vperm.slane %v867_v34, %v2266_v32  ;;  %v877_v40 = vperm.slane %v869_v36, %v2266_v32  ;;  %v1041_v12 = vld [vmem:[#allocation2 + $0xc] sm:$0xf] }
 0x145   :  { %v443_v37 = vrot.slane %v431_v22, 4  ;;  %v446_v38 = vsel %vm255_vm1, %v431_v22, %v445_v49  ;;  %v2428_v44 = vadd.f32 %v2412_v21, %v229_v30  ;;  %v926_v15 = vperm.slane %v2361_v27, %v2266_v32 }
 0x146   :  { %v454_v41 = vperm.slane %v446_v38, %v2288_v57  ;;  %v455_v42 = vrot.slane %v442_v31, 4  ;;  %v458_v43 = vsel %vm255_vm1, %v442_v31, %v457_v33  ;;  %v891_v59 = vsel %vm255_vm1, %v890_v26, %v873_v39 }
 0x147   :  { %v444_v46 = vsel %vm255_vm1, %v443_v37, %v425_v9  ;;  %v466_v25 = vperm.slane %v458_v43, %v2288_v57  ;;  %v892_v45 = vrot.slane %v873_v39, 4  ;;  %v897_v52 = vperm.slane %v891_v59, %v2288_v57  ;;  %494 = vrot.lane.b32.xlu1 %v2428_v44, %s2129_s14  ;;  %506 = vrot.lane.b32.xlu0 %v2428_v44, %s2128_s1 }
 0x148   :  { %v450_v61 = vperm.slane %v444_v46, %v2288_v57  ;;  %v456_v47 = vsel %vm255_vm1, %v455_v42, %v436_v17  ;;  %v473_v50 = vrot.slane %v454_v41, 4  ;;  %v903_v58 = vsel %vm255_vm1, %v902_v29, %v877_v40  ;;  %500 = vrot.lane.b32.xlu2 %v2428_v44, %s2130_s6 }
 0x149   :  { %v462_v54 = vperm.slane %v456_v47, %v2288_v57  ;;  %v471_v55 = vrot.slane %v466_v25, 4  ;;  %v893_v56 = vsel %vm255_vm1, %v885_v53, %v892_v45  ;;  %v904_v63 = vrot.slane %v877_v40, 4 }
 0x14a   :  { %v469_v5 = vrot.slane %v450_v61, 4  ;;  %v474_v60 = vsel %vm255_vm1, %v466_v25, %v473_v50  ;;  %v901_v62 = vperm.slane %v893_v56, %v2288_v57  ;;  %v909_v2 = vperm.slane %v903_v58, %v2288_v57 }
 0x14b   :  { %v467_v1 = vrot.slane %v462_v54, 4  ;;  %v472_v48 = vsel %vm255_vm1, %v471_v55, %v454_v41  ;;  %v482_v0 = vpack.c.bf16 %v474_v60, %v474_v60  ;;  %v905_v3 = vsel %vm255_vm1, %v889_v16, %v904_v63  ;;  %v1039_v16 = vld [vmem:[#allocation2 + $0x4] sm:$0xf] }
 0x14c   :  { %v470_v4 = vsel %vm255_vm1, %v462_v54, %v469_v5  ;;  %v481_v53 = vpack.c.bf16 %v472_v48, %v472_v48  ;;  %v914_v6 = vrot.slane %v897_v52, 4  ;;  %v913_v10 = vperm.slane %v905_v3, %v2288_v57 }
 0x14d   :  { %v468_v51 = vsel %vm255_vm1, %v467_v1, %v450_v61  ;;  %v480_v9 = vpack.c.bf16 %v470_v4, %v470_v4  ;;  %491 = vst.msk [vmem:[#allocation2 + $0x1c] sm:$0xf] %vm483_vm2, %v482_v0  ;;  %v916_v11 = vrot.slane %v901_v62, 4  ;;  %v938_v18 = vrot.slane %v2358_v13, 4 }
 0x14e   :  { %v479_v19 = vpack.c.bf16 %v468_v51, %v468_v51  ;;  %490 = vst.msk [vmem:[#allocation2 + $0x18] sm:$0xf] %vm483_vm2, %v481_v53  ;;  %v918_v49 = vrot.slane %v909_v2, 4  ;;  %v920_v22 = vrot.slane %v913_v10, 4  ;;  %v1089_v23 = vsel %vm1046_vm3, %v1040_v7, 0 }
 0x14f   :  { %489 = vst.msk [vmem:[#allocation2 + $0x14] sm:$0xf] %vm483_vm2, %v480_v9  ;;  %v917_v17 = vsel %vm255_vm1, 0.0, %v916_v11  ;;  %v937_v26 = vperm.slane %v2367_v35, %v2266_v32  ;;  %v915_v13 = vsel %vm255_vm1, 0.0, %v914_v6  ;;  %1098 = vmatpush.bf16.xpose.msrb.mxu1 %v1089_v23  ;;  %v1051_v29 = vsel %vm1046_vm3, %v1038_v8, 0 }
 0x150   :  { %488 = vst.msk [vmem:[#allocation2 + $0x10] sm:$0xf] %vm483_vm2, %v479_v19  ;;  %v981_v27 = vrot.slane %v917_v17, 4  ;;  %v921_v30 = vsel %vm255_vm1, 0.0, %v920_v22  ;;  %v976_v31 = vsel %vm255_vm1, %v916_v11, %v897_v52  ;;  %1060 = vmatpush.bf16.xpose.msra.mxu3 %v1051_v29  ;;  %v1108_v33 = vsel %vm1046_vm3, %v1041_v12, 0 }
 0x151   :  { %v1070_v34 = vsel %vm1046_vm3, %v1039_v16, 0  ;;  %v987_v35 = vsel %vm255_vm1, %v920_v22, %v909_v2  ;;  %v992_v37 = vrot.slane %v921_v30, 4  ;;  %1117 = vmatpush.bf16.xpose.msrb.mxu2 %v1108_v33  ;;  %v919_v38 = vsel %vm255_vm1, 0.0, %v918_v49 }
 0x152   :  { %v982_v36 = vsel %vm255_vm1, %v981_v27, %v915_v13  ;;  %1079 = vmatpush.bf16.xpose.msrb.mxu0 %v1070_v34  ;;  %v928_v39 = vsel %vm255_vm1, %v927_v28, %v2349_v20  ;;  %v939_v40 = vsel %vm255_vm1, %v938_v18, %v2354_v24  ;;  %v946_v41 = vrot.slane %v926_v15, 4 }
 0x153   :  { %v980_v42 = vperm.slane %v976_v31, %v2266_v32  ;;  %v993_v43 = vsel %vm255_vm1, %v992_v37, %v919_v38  ;;  %v932_v25 = vperm.slane %v928_v39, %v2266_v32  ;;  %v943_v59 = vperm.slane %v939_v40, %v2266_v32 }
 0x154   :  { %v1045_v46 = vld [vmem:[#allocation2 + $0x1c] sm:$0xf]  ;;  %v986_v45 = vperm.slane %v982_v36, %v2266_v32  ;;  %v991_v61 = vperm.slane %v987_v35, %v2266_v32  ;;  %v958_v28 = vrot.slane %v937_v26, 4  ;;  %v997_v55 = vperm.slane %v993_v43, %v2266_v32 }
 0x155   :  { %v1184_v14 = vsel %vm1046_vm3, %v1045_v46, 0  ;;  %v1044_v20 = vld [vmem:[#allocation2 + $0x18] sm:$0xf]  ;;  %v947_v50 = vsel %vm255_vm1, %v932_v25, %v946_v41  ;;  %v944_v52 = vrot.slane %v932_v25, 4  ;;  %v956_v54 = vrot.slane %v943_v59, 4 }
 0x156   :  { %v1165_v24 = vsel %vm1046_vm3, %v1044_v20, 0  ;;  %v1043_v47 = vld [vmem:[#allocation2 + $0x14] sm:$0xf]  ;;  %v955_v5 = vperm.slane %v947_v50, %v2288_v57  ;;  %v959_v60 = vsel %vm255_vm1, %v943_v59, %v958_v28  ;;  %v1000_v53 = vrot.slane %v980_v42, 4 }
 0x157   :  { %1174 = vmatpush.bf16.xpose.msra.mxu1 %v1165_v24  ;;  %v1146_v56 = vsel %vm1046_vm3, %v1043_v47, 0  ;;  %v1042_v58 = vld [vmem:[#allocation2 + $0x10] sm:$0xf]  ;;  %v967_v63 = vperm.slane %v959_v60, %v2288_v57  ;;  %v945_v1 = vsel %vm255_vm1, %v944_v52, %v926_v15  ;;  %v957_v48 = vsel %vm255_vm1, %v956_v54, %v937_v26 }
 0x158   :  { %v1127_v62 = vsel %vm1046_vm3, %v1042_v58, 0  ;;  %v951_v0 = vperm.slane %v945_v1, %v2288_v57  ;;  %v963_v2 = vperm.slane %v957_v48, %v2288_v57  ;;  %v974_v4 = vrot.slane %v955_v5, 4 }
 0x159   :  { %1193 = vmatpush.bf16.xpose.msra.mxu2 %v1184_v14  ;;  %1136 = vmatpush.bf16.xpose.msrb.mxu3 %v1127_v62  ;;  %v972_v3 = vrot.slane %v967_v63, 4  ;;  %v1012_v6 = vrot.slane %v991_v61, 4  ;;  %v1010_v9 = vrot.slane %v997_v55, 4  ;;  %v998_v12 = vrot.slane %v986_v45, 4 }
 0x15a   :  { %1155 = vmatpush.bf16.xpose.msra.mxu0 %v1146_v56  ;;  %v968_v7 = vrot.slane %v963_v2, 4  ;;  %v970_v8 = vrot.slane %v951_v0, 4  ;;  %v975_v51 = vsel %vm255_vm1, %v967_v63, %v974_v4  ;;  %v1001_v49 = vsel %vm255_vm1, %v986_v45, %v1000_v53 }
 0x15b   :  { %v973_v10 = vsel %vm255_vm1, %v972_v3, %v955_v5  ;;  %v1033_v11 = vpack.c.bf16 %v975_v51, %v975_v51  ;;  %v1013_v22 = vsel %vm255_vm1, %v997_v55, %v1012_v6  ;;  %v999_v23 = vsel %vm255_vm1, %v998_v12, %v980_v42 }
 0x15c   :  { %v1032_v15 = vpack.c.bf16 %v973_v10, %v973_v10  ;;  %v969_v18 = vsel %vm255_vm1, %v968_v7, %v951_v0  ;;  %v971_v19 = vsel %vm255_vm1, %v963_v2, %v970_v8  ;;  %v1011_v26 = vsel %vm255_vm1, %v1010_v9, %v991_v61 }
 0x15d   :  { %v1030_v16 = vpack.c.bf16 %v969_v18, %v969_v18  ;;  %1800 = vmatmul.msk.bf16.vlgmr.msrb.gmra.mxu2 %vm1046_vm3, %v1033_v11  ;;  %v1031_v17 = vpack.c.bf16 %v971_v19, %v971_v19  ;;  %v1009_v13 = vperm.slane %v1001_v49, %v2288_v57  ;;  %v1021_v27 = vperm.slane %v1013_v22, %v2288_v57 }
 0x15e   :  { %1799 = vmatmul.msk.bf16.vlgmr.msrb.gmra.mxu1 %vm1046_vm3, %v1032_v15  ;;  %v1005_v29 = vperm.slane %v999_v23, %v2288_v57  ;;  %v1017_v30 = vperm.slane %v1011_v26, %v2288_v57  ;;  %v514_v25 = vrot.slane %v2428_v44, 4 }
 0x15f   :  { %1797 = vmatmul.msk.bf16.vlgmr.msra.gmra.mxu3 %vm1046_vm3, %v1030_v16  ;;  %1798 = vmatmul.msk.bf16.vlgmr.msrb.gmra.mxu0 %vm1046_vm3, %v1031_v17  ;;  %v1028_v31 = vrot.slane %v1009_v13, 4  ;;  %v1026_v33 = vrot.slane %v1021_v27, 4 }
 0x160   :  { %v1022_v34 = vrot.slane %v1017_v30, 4  ;;  %v1024_v36 = vrot.slane %v1005_v29, 4 }
 0x161   :  { %v1029_v35 = vsel %vm255_vm1, %v1021_v27, %v1028_v31  ;;  %v1027_v37 = vsel %vm255_vm1, %v1026_v33, %v1009_v13 }
 0x162   :  { %v1023_v38 = vsel %vm255_vm1, %v1022_v34, %v1005_v29  ;;  %v1025_v39 = vsel %vm255_vm1, %v1017_v30, %v1024_v36  ;;  %v1037_v40 = vpack.c.bf16 %v1029_v35, %v1029_v35  ;;  %v1036_v41 = vpack.c.bf16 %v1027_v37, %v1027_v37 }
 0x163   :  { %v1034_v42 = vpack.c.bf16 %v1023_v38, %v1023_v38  ;;  %v1035_v43 = vpack.c.bf16 %v1025_v39, %v1025_v39 }
 0x16d   :  { %1804 = vmatmul.msk.bf16.vlgmr.msra.gmra.mxu2 %vm1046_vm3, %v1037_v40 }
 0x16e   :  { %1803 = vmatmul.msk.bf16.vlgmr.msra.gmra.mxu1 %vm1046_vm3, %v1036_v41 }
 0x16f   :  { %1801 = vmatmul.msk.bf16.vlgmr.msrb.gmra.mxu3 %vm1046_vm3, %v1034_v42  ;;  %1802 = vmatmul.msk.bf16.vlgmr.msra.gmra.mxu0 %vm1046_vm3, %v1035_v43 }
 0x1a2   :  { %v501_v46 = vpop.permute.xlu2 %500 }
 0x1a3   :  { %v512_v59 = vrot.slane %v501_v46, 4  ;;  %v515_v61 = vsel %vm255_vm1, %v501_v46, %v514_v25 }
 0x1a4   :  { %v523_v20 = vperm.slane %v515_v61, %v2266_v32 }
 0x1a5   :  { %v513_v45 = vsel %vm255_vm1, %v512_v59, %v2428_v44 }
 0x1a6   :  { %v519_v14 = vperm.slane %v513_v45, %v2266_v32  ;;  %v550_v54 = vrot.slane %v523_v20, 4 }
 0x1a8   :  { %v538_v52 = vrot.slane %v519_v14, 4 }
 0x1b9   :  { %v495_v28 = vpop.permute.xlu1 %494  ;;  %v507_v24 = vpop.permute.xlu0 %506 }
 0x1ba   :  { %v526_v47 = vrot.slane %v495_v28, 4  ;;  %v524_v50 = vrot.slane %v507_v24, 4 }
 0x1bc   :  { %v525_v55 = vsel %vm255_vm1, %v524_v50, %v495_v28  ;;  %v527_v56 = vsel %vm255_vm1, %v507_v24, %v526_v47  ;;  %v231_v24 = vpop.f32.mrf.mxu1 }
 0x1bd   :  { %v531_v58 = vperm.slane %v525_v55, %v2266_v32  ;;  %v535_v44 = vperm.slane %v527_v56, %v2266_v32 }
 0x1bf   :  { %v536_v5 = vrot.slane %v531_v58, 4  ;;  %v539_v60 = vsel %vm255_vm1, %v531_v58, %v538_v52  ;;  %v548_v62 = vrot.slane %v535_v44, 4  ;;  %v551_v63 = vsel %vm255_vm1, %v535_v44, %v550_v54 }
 0x1c0   :  { %v547_v1 = vperm.slane %v539_v60, %v2288_v57  ;;  %v559_v48 = vperm.slane %v551_v63, %v2288_v57 }
 0x1c1   :  { %v537_v0 = vsel %vm255_vm1, %v536_v5, %v519_v14  ;;  %v549_v2 = vsel %vm255_vm1, %v548_v62, %v523_v20 }
 0x1c2   :  { %v543_v4 = vperm.slane %v537_v0, %v2288_v57  ;;  %v555_v53 = vperm.slane %v549_v2, %v2288_v57  ;;  %v562_v3 = vrot.slane %v547_v1, 4  ;;  %v566_v6 = vrot.slane %v559_v48, 4 }
 0x1c4   :  { %v560_v7 = vrot.slane %v543_v4, 4  ;;  %v563_v8 = vsel %vm255_vm1, 0.0, %v562_v3  ;;  %v564_v51 = vrot.slane %v555_v53, 4  ;;  %v567_v9 = vsel %vm255_vm1, 0.0, %v566_v6 }
 0x1c5   :  { %v624_v10 = vsel %vm255_vm1, %v562_v3, %v543_v4  ;;  %v629_v11 = vrot.slane %v563_v8, 4  ;;  %v635_v12 = vsel %vm255_vm1, %v566_v6, %v555_v53  ;;  %v640_v15 = vrot.slane %v567_v9, 4 }
 0x1c6   :  { %v561_v18 = vsel %vm255_vm1, 0.0, %v560_v7  ;;  %v565_v19 = vsel %vm255_vm1, 0.0, %v564_v51  ;;  %v628_v16 = vperm.slane %v624_v10, %v2266_v32  ;;  %v639_v17 = vperm.slane %v635_v12, %v2266_v32 }
 0x1c7   :  { %v630_v49 = vsel %vm255_vm1, %v629_v11, %v561_v18  ;;  %v641_v22 = vsel %vm255_vm1, %v640_v15, %v565_v19 }
 0x1c8   :  { %v634_v23 = vperm.slane %v630_v49, %v2266_v32  ;;  %v645_v26 = vperm.slane %v641_v22, %v2266_v32  ;;  %v648_v13 = vrot.slane %v628_v16, 4  ;;  %v660_v27 = vrot.slane %v639_v17, 4 }
 0x1c9   :  { %v2581_v49 = vadd.f32 %v2412_v21, %v231_v24 }
 0x1ca   :  { %v646_v29 = vrot.slane %v634_v23, 4  ;;  %v649_v30 = vsel %vm255_vm1, %v634_v23, %v648_v13  ;;  %v658_v31 = vrot.slane %v645_v26, 4  ;;  %v661_v33 = vsel %vm255_vm1, %v645_v26, %v660_v27 }
 0x1cb   :  { %v657_v34 = vperm.slane %v649_v30, %v2288_v57  ;;  %v669_v36 = vperm.slane %v661_v33, %v2288_v57 }
 0x1cc   :  { %v647_v35 = vsel %vm255_vm1, %v646_v29, %v628_v16  ;;  %v659_v37 = vsel %vm255_vm1, %v658_v31, %v639_v17 }
 0x1cd   :  { %v653_v38 = vperm.slane %v647_v35, %v2288_v57  ;;  %v665_v39 = vperm.slane %v659_v37, %v2288_v57  ;;  %v674_v40 = vrot.slane %v669_v36, 4  ;;  %v676_v41 = vrot.slane %v657_v34, 4 }
 0x1cf   :  { %v670_v42 = vrot.slane %v665_v39, 4  ;;  %v672_v43 = vrot.slane %v653_v38, 4  ;;  %v675_v46 = vsel %vm255_vm1, %v674_v40, %v657_v34  ;;  %v677_v25 = vsel %vm255_vm1, %v669_v36, %v676_v41 }
 0x1d0   :  { %v734_v59 = vpack.c.bf16 %v675_v46, %v675_v46  ;;  %v735_v45 = vpack.c.bf16 %v677_v25, %v677_v25 }
 0x1d1   :  { %v671_v61 = vsel %vm255_vm1, %v670_v42, %v653_v38  ;;  %v673_v14 = vsel %vm255_vm1, %v665_v39, %v672_v43 }
 0x1d2   :  { %v732_v20 = vpack.c.bf16 %v671_v61, %v671_v61  ;;  %v733_v28 = vpack.c.bf16 %v673_v14, %v673_v14  ;;  %742 = vst.msk [vmem:[#allocation3 + $0x8] sm:$0xf] %vm483_vm2, %v734_v59 }
 0x1d3   :  { %743 = vst.msk [vmem:[#allocation3 + $0xc] sm:$0xf] %vm483_vm2, %v735_v45 }
 0x1d4   :  { %740 = vst.msk [vmem:[#allocation3] sm:$0xf] %vm483_vm2, %v732_v20 }
 0x1d5   :  { %741 = vst.msk [vmem:[#allocation3 + $0x4] sm:$0xf] %vm483_vm2, %v733_v28 }
 0x1d9   :  { %v1297_v47 = vld [vmem:[#allocation3 + $0x8] sm:$0xf] }
 0x1da   :  { %v1346_v50 = vsel %vm1306_vm4, %v1297_v47, 0  ;;  %v1298_v52 = vld [vmem:[#allocation3 + $0xc] sm:$0xf] }
 0x1db   :  { %v1100_v54 = vpop.f32.mrf.mxu1  ;;  %v1295_v55 = vld [vmem:[#allocation3] sm:$0xf]  ;;  %1355 = vmatpush.bf16.msrb.mxu1 %v1346_v50  ;;  %v1365_v56 = vsel %vm1306_vm4, %v1298_v52, 0 }
 0x1dc   :  { %v1205_v58 = vsel %vm1046_vm3, %v1100_v54, -inf  ;;  %v1081_v44 = vpop.f32.mrf.mxu0  ;;  %v1308_v5 = vsel %vm1306_vm4, %v1295_v55, 0  ;;  %v1296_v60 = vld [vmem:[#allocation3 + $0x4] sm:$0xf]  ;;  %1374 = vmatpush.bf16.msrb.mxu2 %v1365_v56 }
 0x1dd   :  { %1206 = vmax.xlane.f32.xlu2 %v1205_v58  ;;  %1317 = vmatpush.bf16.msra.mxu3 %v1308_v5  ;;  %v1327_v62 = vsel %vm1306_vm4, %v1296_v60, 0  ;;  %v1202_v4 = vsel %vm1046_vm3, %v1081_v44, -inf }
 0x1de   :  { %1336 = vmatpush.bf16.msrb.mxu0 %v1327_v62 }
 0x1e0   :  { %v1119_v63 = vpop.f32.mrf.mxu2 }
 0x1e1   :  { %v1208_v1 = vsel %vm1046_vm3, %v1119_v63, -inf }
 0x1e2   :  { %v1062_v48 = vpop.f32.mrf.mxu3  ;;  %1209 = vmax.xlane.f32.xlu1 %v1208_v1 }
 0x1e3   :  { %v1102_v0 = vpop.f32.mrf.mxu1  ;;  %v1199_v2 = vsel %vm1046_vm3, %v1062_v48, -inf }
 0x1e4   :  { %1200 = vmax.xlane.f32.xlu0 %v1199_v2  ;;  %v1083_v53 = vpop.f32.mrf.mxu0 }
 0x1e5   :  { %1203 = vmax.xlane.f32.xlu2 %v1202_v4 }
 0x1e8   :  { %v1121_v3 = vpop.f32.mrf.mxu2 }
 0x1ea   :  { %v1064_v6 = vpop.f32.mrf.mxu3 }
 0x1eb   :  { %v1176_v7 = vpop.f32.mrf.mxu1 }
 0x1ec   :  { %v1217_v8 = vsel %vm1046_vm3, %v1176_v7, -inf  ;;  %v1157_v51 = vpop.f32.mrf.mxu0 }
 0x1ed   :  { %1218 = vmax.xlane.f32.xlu2 %v1217_v8  ;;  %v1214_v9 = vsel %vm1046_vm3, %v1157_v51, -inf }
 0x1ee   :  { %1215 = vmax.xlane.f32.xlu0 %v1214_v9 }
 0x1f0   :  { %v1195_v10 = vpop.f32.mrf.mxu2 }
 0x1f1   :  { %v1220_v11 = vsel %vm1046_vm3, %v1195_v10, -inf }
 0x1f2   :  { %v1138_v12 = vpop.f32.mrf.mxu3  ;;  %1221 = vmax.xlane.f32.xlu1 %v1220_v11 }
 0x1f3   :  { %v1178_v15 = vpop.f32.mrf.mxu1  ;;  %v1211_v19 = vsel %vm1046_vm3, %v1138_v12, -inf }
 0x1f4   :  { %v1159_v18 = vpop.f32.mrf.mxu0 }
 0x1f6   :  { %1212 = vmax.xlane.f32.xlu0 %v1211_v19 }
 0x1f8   :  { %v1197_v16 = vpop.f32.mrf.mxu2 }
 0x1fa   :  { %v1140_v17 = vpop.f32.mrf.mxu3 }
 0x205   :  { %508 = vrot.lane.b32.xlu2 %v2581_v49, %s2128_s1 }
 0x20a   :  { %502 = vrot.lane.b32.xlu0 %v2581_v49, %s2130_s6 }
 0x20b   :  { %496 = vrot.lane.b32.xlu1 %v2581_v49, %s2129_s14 }
 0x250   :  { %v1207_v22 = vpop.xlane.xlu2 %1206 }
 0x251   :  { %v1225_v23 = vsub.f32 %v1100_v54, %v1207_v22 }
 0x253   :  { %v1235_v26 = vmul.f32 1.442695, %v1225_v23 }
 0x255   :  { %1883 = vpow2.f32 %v1235_v26  ;;  %v1210_v13 = vpop.xlane.xlu1 %1209 }
 0x256   :  { %v1226_v27 = vsub.f32 %v1119_v63, %v1210_v13  ;;  %v570_v63 = vrot.slane %v2581_v49, 4 }
 0x257   :  { %v1201_v29 = vpop.xlane.xlu0 %1200 }
 0x258   :  { %v1237_v30 = vmul.f32 1.442695, %v1226_v27  ;;  %v1204_v31 = vpop.xlane.xlu2 %1203  ;;  %v1223_v21 = vsub.f32 %v1062_v48, %v1201_v29 }
 0x259   :  { %v1224_v33 = vsub.f32 %v1081_v44, %v1204_v31 }
 0x25a   :  { %1885 = vpow2.f32 %v1237_v30  ;;  %v1231_v34 = vmul.f32 1.442695, %v1223_v21 }
 0x25b   :  { %v2589_v36 = vpop.eup %1883  ;;  %v1233_v37 = vmul.f32 1.442695, %v1224_v33 }
 0x25c   :  { %1887 = vpow2.f32 %v1231_v34  ;;  %v1253_v35 = vsel %vm1046_vm3, %v2589_v36, 0.0 }
 0x25d   :  { %1254 = vadd.xlane.f32.xlu2 %v1253_v35  ;;  %1889 = vpow2.f32 %v1233_v37 }
 0x260   :  { %v2593_v38 = vpop.eup %1885  ;;  %v1219_v39 = vpop.xlane.xlu2 %1218 }
 0x261   :  { %v1229_v40 = vsub.f32 %v1176_v7, %v1219_v39  ;;  %v1216_v41 = vpop.xlane.xlu0 %1215  ;;  %v1256_v42 = vsel %vm1046_vm3, %v2593_v38, 0.0 }
 0x262   :  { %v2597_v43 = vpop.eup %1887  ;;  %1257 = vadd.xlane.f32.xlu0 %v1256_v42  ;;  %v1228_v47 = vsub.f32 %v1157_v51, %v1216_v41 }
 0x263   :  { %v1247_v46 = vsel %vm1046_vm3, %v2597_v43, 0.0  ;;  %v1243_v25 = vmul.f32 1.442695, %v1229_v40  ;;  %v2601_v61 = vpop.eup %1889 }
 0x264   :  { %1248 = vadd.xlane.f32.xlu1 %v1247_v46  ;;  %v1250_v24 = vsel %vm1046_vm3, %v2601_v61, 0.0  ;;  %v1241_v55 = vmul.f32 1.442695, %v1228_v47 }
 0x265   :  { %v1222_v59 = vpop.xlane.xlu1 %1221  ;;  %1891 = vpow2.f32 %v1243_v25 }
 0x266   :  { %v1230_v45 = vsub.f32 %v1195_v10, %v1222_v59 }
 0x268   :  { %v1245_v14 = vmul.f32 1.442695, %v1230_v45  ;;  %v509_v60 = vpop.permute.xlu2 %508 }
 0x269   :  { %v1213_v20 = vpop.xlane.xlu0 %1212  ;;  %v580_v1 = vrot.slane %v509_v60, 4 }
 0x26a   :  { %1893 = vpow2.f32 %v1245_v14  ;;  %v1227_v28 = vsub.f32 %v1138_v12, %v1213_v20 }
 0x26b   :  { %v2605_v52 = vpop.eup %1891 }
 0x26c   :  { %v1239_v50 = vmul.f32 1.442695, %v1227_v28  ;;  %1251 = vadd.xlane.f32.xlu1 %v1250_v24  ;;  %v1265_v58 = vsel %vm1046_vm3, %v2605_v52, 0.0 }
 0x26e   :  { %1895 = vpow2.f32 %v1239_v50 }
 0x26f   :  { %1897 = vpow2.f32 %v1241_v55 }
 0x270   :  { %v2607_v54 = vpop.eup %1893 }
 0x271   :  { %v1268_v56 = vsel %vm1046_vm3, %v2607_v54, 0.0 }
 0x272   :  { %1269 = vadd.xlane.f32.xlu2 %v1268_v56 }
 0x274   :  { %v2613_v44 = vpop.eup %1895  ;;  %1266 = vadd.xlane.f32.xlu1 %v1265_v58 }
 0x275   :  { %v1259_v5 = vsel %vm1046_vm3, %v2613_v44, 0.0  ;;  %v2617_v62 = vpop.eup %1897 }
 0x276   :  { %1260 = vadd.xlane.f32.xlu0 %v1259_v5  ;;  %v1262_v53 = vsel %vm1046_vm3, %v2617_v62, 0.0 }
 0x27c   :  { %v503_v48 = vpop.permute.xlu0 %502 }
 0x27d   :  { %v568_v0 = vrot.slane %v503_v48, 4  ;;  %v571_v2 = vsel %vm255_vm1, %v503_v48, %v570_v63  ;;  %v497_v4 = vpop.permute.xlu1 %496 }
 0x27e   :  { %v579_v3 = vperm.slane %v571_v2, %v2266_v32  ;;  %v581_v6 = vsel %vm255_vm1, %v580_v1, %v497_v4  ;;  %v582_v7 = vrot.slane %v497_v4, 4  ;;  %1263 = vadd.xlane.f32.xlu0 %v1262_v53 }
 0x27f   :  { %v569_v8 = vsel %vm255_vm1, %v568_v0, %v2581_v49  ;;  %v587_v51 = vperm.slane %v581_v6, %v2266_v32 }
 0x280   :  { %v575_v9 = vperm.slane %v569_v8, %v2266_v32  ;;  %v606_v10 = vrot.slane %v579_v3, 4  ;;  %v583_v11 = vsel %vm255_vm1, %v509_v60, %v582_v7 }
 0x281   :  { %v591_v12 = vperm.slane %v583_v11, %v2266_v32  ;;  %v592_v15 = vrot.slane %v587_v51, 4 }
 0x282   :  { %v594_v18 = vrot.slane %v575_v9, 4 }
 0x283   :  { %v593_v19 = vsel %vm255_vm1, %v592_v15, %v575_v9  ;;  %v604_v16 = vrot.slane %v591_v12, 4  ;;  %v607_v17 = vsel %vm255_vm1, %v591_v12, %v606_v10 }
 0x284   :  { %v595_v22 = vsel %vm255_vm1, %v587_v51, %v594_v18  ;;  %v599_v49 = vperm.slane %v593_v19, %v2288_v57  ;;  %v615_v23 = vperm.slane %v607_v17, %v2288_v57 }
 0x285   :  { %v603_v26 = vperm.slane %v595_v22, %v2288_v57  ;;  %v605_v13 = vsel %vm255_vm1, %v604_v16, %v579_v3 }
 0x286   :  { %v611_v27 = vperm.slane %v605_v13, %v2288_v57  ;;  %v622_v29 = vrot.slane %v615_v23, 4  ;;  %v616_v30 = vrot.slane %v599_v49, 4 }
 0x287   :  { %v618_v31 = vrot.slane %v603_v26, 4 }
 0x288   :  { %v620_v21 = vrot.slane %v611_v27, 4  ;;  %v623_v33 = vsel %vm255_vm1, 0.0, %v622_v29  ;;  %v689_v34 = vsel %vm255_vm1, %v622_v29, %v611_v27  ;;  %v617_v25 = vsel %vm255_vm1, 0.0, %v616_v30 }
 0x289   :  { %v619_v35 = vsel %vm255_vm1, 0.0, %v618_v31  ;;  %v678_v37 = vsel %vm255_vm1, %v618_v31, %v599_v49  ;;  %v693_v39 = vperm.slane %v689_v34, %v2266_v32  ;;  %v694_v40 = vrot.slane %v623_v33, 4 }
 0x28a   :  { %v621_v41 = vsel %vm255_vm1, 0.0, %v620_v21  ;;  %v682_v42 = vperm.slane %v678_v37, %v2266_v32  ;;  %v683_v46 = vrot.slane %v619_v35, 4 }
 0x28b   :  { %v695_v59 = vsel %vm255_vm1, %v694_v40, %v621_v41  ;;  %v714_v45 = vrot.slane %v693_v39, 4 }
 0x28c   :  { %v684_v14 = vsel %vm255_vm1, %v683_v46, %v617_v25  ;;  %v699_v20 = vperm.slane %v695_v59, %v2266_v32  ;;  %v702_v28 = vrot.slane %v682_v42, 4 }
 0x28d   :  { %v688_v24 = vperm.slane %v684_v14, %v2266_v32 }
 0x28e   :  { %v712_v47 = vrot.slane %v699_v20, 4  ;;  %v715_v50 = vsel %vm255_vm1, %v699_v20, %v714_v45 }
 0x28f   :  { %v700_v55 = vrot.slane %v688_v24, 4  ;;  %v703_v56 = vsel %vm255_vm1, %v688_v24, %v702_v28  ;;  %v723_v58 = vperm.slane %v715_v50, %v2288_v57 }
 0x290   :  { %v711_v5 = vperm.slane %v703_v56, %v2288_v57  ;;  %v713_v60 = vsel %vm255_vm1, %v712_v47, %v693_v39 }
 0x291   :  { %v701_v63 = vsel %vm255_vm1, %v700_v55, %v682_v42  ;;  %v719_v1 = vperm.slane %v713_v60, %v2288_v57  ;;  %v728_v48 = vrot.slane %v723_v58, 4 }
 0x292   :  { %v707_v0 = vperm.slane %v701_v63, %v2288_v57  ;;  %v730_v2 = vrot.slane %v711_v5, 4 }
 0x293   :  { %v724_v4 = vrot.slane %v719_v1, 4  ;;  %v729_v53 = vsel %vm255_vm1, %v728_v48, %v711_v5 }
 0x294   :  { %v726_v3 = vrot.slane %v707_v0, 4  ;;  %v731_v6 = vsel %vm255_vm1, %v723_v58, %v730_v2  ;;  %v738_v7 = vpack.c.bf16 %v729_v53, %v729_v53 }
 0x295   :  { %v725_v8 = vsel %vm255_vm1, %v724_v4, %v707_v0  ;;  %v739_v51 = vpack.c.bf16 %v731_v6, %v731_v6 }
 0x296   :  { %v727_v9 = vsel %vm255_vm1, %v719_v1, %v726_v3  ;;  %v736_v10 = vpack.c.bf16 %v725_v8, %v725_v8  ;;  %746 = vst.msk [vmem:[#allocation3 + $0x18] sm:$0xf] %vm483_vm2, %v738_v7 }
 0x297   :  { %v737_v11 = vpack.c.bf16 %v727_v9, %v727_v9  ;;  %747 = vst.msk [vmem:[#allocation3 + $0x1c] sm:$0xf] %vm483_vm2, %v739_v51 }
 0x298   :  { %744 = vst.msk [vmem:[#allocation3 + $0x10] sm:$0xf] %vm483_vm2, %v736_v10 }
 0x299   :  { %745 = vst.msk [vmem:[#allocation3 + $0x14] sm:$0xf] %vm483_vm2, %v737_v11 }
 0x29d   :  { %v1301_v12 = vld [vmem:[#allocation3 + $0x18] sm:$0xf] }
 0x29e   :  { %v1422_v15 = vsel %vm1306_vm4, %v1301_v12, 0  ;;  %v1302_v18 = vld [vmem:[#allocation3 + $0x1c] sm:$0xf] }
 0x29f   :  { %1431 = vmatpush.bf16.msra.mxu1 %v1422_v15  ;;  %v1441_v19 = vsel %vm1306_vm4, %v1302_v18, 0  ;;  %v1299_v16 = vld [vmem:[#allocation3 + $0x10] sm:$0xf] }
 0x2a0   :  { %1450 = vmatpush.bf16.msra.mxu2 %v1441_v19  ;;  %v1384_v17 = vsel %vm1306_vm4, %v1299_v16, 0  ;;  %v1300_v22 = vld [vmem:[#allocation3 + $0x14] sm:$0xf] }
 0x2a1   :  { %1393 = vmatpush.bf16.msrb.mxu3 %v1384_v17  ;;  %v1403_v49 = vsel %vm1306_vm4, %v1300_v22, 0 }
 0x2a2   :  { %1412 = vmatpush.bf16.msra.mxu0 %v1403_v49 }
 0x2d0   :  { %v1255_v23 = vpop.xlane.xlu2 %1254 }
 0x2d1   :  { %1899 = vrcp.f32 %v1255_v23 }
 0x2d5   :  { %v1258_v26 = vpop.xlane.xlu0 %1257 }
 0x2d6   :  { %1901 = vrcp.f32 %v1258_v26 }
 0x2d7   :  { %v1900_v13 = vpop.eup %1899  ;;  %v1249_v27 = vpop.xlane.xlu1 %1248 }
 0x2d8   :  { %v1281_v29 = vmul.f32 %v1900_v13, %v2589_v36  ;;  %1903 = vrcp.f32 %v1249_v27 }
 0x2da   :  { %v1289_v30 = vpack.c.bf16 %v1281_v29, %v1281_v29 }
 0x2dc   :  { %v1902_v31 = vpop.eup %1901  ;;  %1807 = vmatmul.msk.bf16.vlgmr.msrb.gmra.mxu1 %vm1046_vm3, %v1289_v30 }
 0x2dd   :  { %v1282_v21 = vmul.f32 %v1902_v31, %v2593_v38 }
 0x2de   :  { %v1904_v33 = vpop.eup %1903 }
 0x2df   :  { %v1279_v34 = vmul.f32 %v1904_v33, %v2597_v43  ;;  %v1290_v35 = vpack.c.bf16 %v1282_v21, %v1282_v21  ;;  %v1252_v37 = vpop.xlane.xlu1 %1251 }
 0x2e0   :  { %1905 = vrcp.f32 %v1252_v37 }
 0x2e1   :  { %v1287_v39 = vpack.c.bf16 %v1279_v34, %v1279_v34  ;;  %1808 = vmatmul.msk.bf16.vlgmr.msrb.gmra.mxu2 %vm1046_vm3, %v1290_v35 }
 0x2e3   :  { %1805 = vmatmul.msk.bf16.vlgmr.msra.gmra.mxu3 %vm1046_vm3, %v1287_v39 }
 0x2e5   :  { %v1270_v40 = vpop.xlane.xlu2 %1269 }
 0x2e6   :  { %v1906_v36 = vpop.eup %1905  ;;  %1907 = vrcp.f32 %v1270_v40 }
 0x2e7   :  { %v1280_v41 = vmul.f32 %v1906_v36, %v2601_v61  ;;  %v1267_v42 = vpop.xlane.xlu1 %1266 }
 0x2e8   :  { %1909 = vrcp.f32 %v1267_v42 }
 0x2e9   :  { %v1288_v46 = vpack.c.bf16 %v1280_v41, %v1280_v41  ;;  %v1261_v38 = vpop.xlane.xlu0 %1260 }
 0x2ea   :  { %1911 = vrcp.f32 %v1261_v38 }
 0x2eb   :  { %1806 = vmatmul.msk.bf16.vlgmr.msrb.gmra.mxu0 %vm1046_vm3, %v1288_v46 }
 0x2ec   :  { %v1908_v43 = vpop.eup %1907 }
 0x2ed   :  { %v1286_v25 = vmul.f32 %v1908_v43, %v2607_v54 }
 0x2ee   :  { %v1910_v59 = vpop.eup %1909 }
 0x2ef   :  { %v1294_v45 = vpack.c.bf16 %v1286_v25, %v1286_v25  ;;  %v1285_v14 = vmul.f32 %v1910_v59, %v2605_v52 }
 0x2f0   :  { %v1912_v20 = vpop.eup %1911 }
 0x2f1   :  { %v1293_v28 = vpack.c.bf16 %v1285_v14, %v1285_v14  ;;  %v1283_v24 = vmul.f32 %v1912_v20, %v2613_v44  ;;  %1812 = vmatmul.msk.bf16.vlgmr.msra.gmra.mxu2 %vm1046_vm3, %v1294_v45  ;;  %v1264_v61 = vpop.xlane.xlu0 %1263 }
 0x2f2   :  { %1913 = vrcp.f32 %v1264_v61 }
 0x2f3   :  { %v1291_v47 = vpack.c.bf16 %v1283_v24, %v1283_v24  ;;  %1811 = vmatmul.msk.bf16.vlgmr.msra.gmra.mxu1 %vm1046_vm3, %v1293_v28 }
 0x2f5   :  { %1809 = vmatmul.msk.bf16.vlgmr.msrb.gmra.mxu3 %vm1046_vm3, %v1291_v47 }
 0x2f8   :  { %v1914_v50 = vpop.eup %1913 }
 0x2f9   :  { %v1284_v54 = vmul.f32 %v1914_v50, %v2617_v62 }
 0x2fb   :  { %v1292_v55 = vpack.c.bf16 %v1284_v54, %v1284_v54 }
 0x2fd   :  { %1810 = vmatmul.msk.bf16.vlgmr.msra.gmra.mxu0 %vm1046_vm3, %v1292_v55 }
 0x359   :  { %v1357_v52 = vpop.f32.mrf.mxu1 }
 0x35a   :  { %v1456_v5 = vrot.slane %v1357_v52, 4 }
 0x361   :  { %v1359_v56 = vpop.f32.mrf.mxu1 }
 0x364   :  { %v1376_v58 = vpop.f32.mrf.mxu2 }
 0x365   :  { %v1468_v44 = vrot.slane %v1376_v58, 4 }
 0x366   :  { %v1319_v60 = vpop.f32.mrf.mxu3 }
 0x367   :  { %v1457_v63 = vsel %vm255_vm1, %v1456_v5, %v1319_v60  ;;  %v1458_v1 = vrot.slane %v1319_v60, 4 }
 0x368   :  { %v1463_v48 = vperm.slane %v1457_v63, %v2266_v32  ;;  %v1338_v0 = vpop.f32.mrf.mxu0 }
 0x369   :  { %v1459_v2 = vsel %vm255_vm1, %v1357_v52, %v1458_v1  ;;  %v1469_v4 = vsel %vm255_vm1, %v1468_v44, %v1338_v0  ;;  %v1470_v62 = vrot.slane %v1338_v0, 4 }
 0x36a   :  { %v1467_v53 = vperm.slane %v1459_v2, %v2266_v32  ;;  %v1482_v3 = vrot.slane %v1463_v48, 4  ;;  %v1475_v6 = vperm.slane %v1469_v4, %v2266_v32 }
 0x36b   :  { %v1471_v7 = vsel %vm255_vm1, %v1376_v58, %v1470_v62 }
 0x36c   :  { %v1494_v8 = vrot.slane %v1467_v53, 4  ;;  %v1479_v51 = vperm.slane %v1471_v7, %v2266_v32  ;;  %v1480_v9 = vrot.slane %v1475_v6, 4  ;;  %v1483_v10 = vsel %vm255_vm1, %v1475_v6, %v1482_v3  ;;  %v1378_v11 = vpop.f32.mrf.mxu2 }
 0x36d   :  { %v1491_v12 = vperm.slane %v1483_v10, %v2288_v57 }
 0x36e   :  { %v1481_v15 = vsel %vm255_vm1, %v1480_v9, %v1463_v48  ;;  %v1492_v18 = vrot.slane %v1479_v51, 4  ;;  %v1495_v19 = vsel %vm255_vm1, %v1479_v51, %v1494_v8  ;;  %v1321_v16 = vpop.f32.mrf.mxu3 }
 0x36f   :  { %v1487_v17 = vperm.slane %v1481_v15, %v2288_v57  ;;  %v1503_v22 = vperm.slane %v1495_v19, %v2288_v57  ;;  %v1506_v49 = vrot.slane %v1491_v12, 4 }
 0x370   :  { %v1493_v23 = vsel %vm255_vm1, %v1492_v18, %v1467_v53  ;;  %v1340_v26 = vpop.f32.mrf.mxu0  ;;  %v1433_v13 = vpop.f32.mrf.mxu1 }
 0x371   :  { %v1499_v27 = vperm.slane %v1493_v23, %v2288_v57  ;;  %v1504_v29 = vrot.slane %v1487_v17, 4  ;;  %v1507_v30 = vsel %vm255_vm1, 0.0, %v1506_v49  ;;  %v1510_v31 = vrot.slane %v1503_v22, 4 }
 0x372   :  { %v1573_v21 = vrot.slane %v1507_v30, 4  ;;  %v1568_v37 = vsel %vm255_vm1, %v1506_v49, %v1487_v17  ;;  %v1512_v25 = vrot.slane %v1433_v13, 4 }
 0x373   :  { %v1505_v33 = vsel %vm255_vm1, 0.0, %v1504_v29  ;;  %v1508_v34 = vrot.slane %v1499_v27, 4  ;;  %v1511_v35 = vsel %vm255_vm1, 0.0, %v1510_v31  ;;  %v1579_v42 = vsel %vm255_vm1, %v1510_v31, %v1499_v27 }
 0x374   :  { %v1574_v39 = vsel %vm255_vm1, %v1573_v21, %v1505_v33  ;;  %v1584_v40 = vrot.slane %v1511_v35, 4  ;;  %v1452_v36 = vpop.f32.mrf.mxu2  ;;  %v1572_v43 = vperm.slane %v1568_v37, %v2266_v32  ;;  %v1583_v28 = vperm.slane %v1579_v42, %v2266_v32 }
 0x375   :  { %v1578_v41 = vperm.slane %v1574_v39, %v2266_v32  ;;  %v1509_v46 = vsel %vm255_vm1, 0.0, %v1508_v34  ;;  %v1524_v45 = vrot.slane %v1452_v36, 4 }
 0x376   :  { %v1585_v38 = vsel %vm255_vm1, %v1584_v40, %v1509_v46  ;;  %v1592_v52 = vrot.slane %v1572_v43, 4  ;;  %v1604_v2 = vrot.slane %v1583_v28, 4 }
 0x377   :  { %v1589_v59 = vperm.slane %v1585_v38, %v2266_v32  ;;  %v1590_v47 = vrot.slane %v1578_v41, 4 }
 0x378   :  { %v1435_v14 = vpop.f32.mrf.mxu1  ;;  %v1395_v20 = vpop.f32.mrf.mxu3  ;;  %v1593_v17 = vsel %vm255_vm1, %v1578_v41, %v1592_v52 }
 0x379   :  { %v1513_v24 = vsel %vm255_vm1, %v1512_v25, %v1395_v20  ;;  %v1514_v61 = vrot.slane %v1395_v20, 4  ;;  %v1602_v50 = vrot.slane %v1589_v59, 4  ;;  %v1591_v4 = vsel %vm255_vm1, %v1590_v47, %v1572_v43 }
 0x37a   :  { %v1519_v54 = vperm.slane %v1513_v24, %v2266_v32  ;;  %v1414_v55 = vpop.f32.mrf.mxu0  ;;  %v1597_v15 = vperm.slane %v1591_v4, %v2288_v57  ;;  %v1605_v23 = vsel %vm255_vm1, %v1589_v59, %v1604_v2  ;;  %v1601_v33 = vperm.slane %v1593_v17, %v2288_v57 }
 0x37b   :  { %v1515_v56 = vsel %vm255_vm1, %v1433_v13, %v1514_v61  ;;  %v1525_v58 = vsel %vm255_vm1, %v1524_v45, %v1414_v55  ;;  %v1526_v5 = vrot.slane %v1414_v55, 4  ;;  %v1603_v48 = vsel %vm255_vm1, %v1602_v50, %v1583_v28 }
 0x37c   :  { %v1523_v44 = vperm.slane %v1515_v56, %v2266_v32  ;;  %v1538_v60 = vrot.slane %v1519_v54, 4  ;;  %v1531_v63 = vperm.slane %v1525_v58, %v2266_v32  ;;  %v1454_v1 = vpop.f32.mrf.mxu2  ;;  %v2725_v62 = vperm.slane %v1603_v48, %v2288_v57 }
 0x37d   :  { %v1527_v0 = vsel %vm255_vm1, %v1452_v36, %v1526_v5  ;;  %v1613_v42 = vperm.slane %v1605_v23, %v2288_v57  ;;  %v1620_v59 = vrot.slane %v1601_v33, 4  ;;  %v1616_v58 = vrot.slane %v1597_v15, 4 }
 0x37e   :  { %v1550_v53 = vrot.slane %v1523_v44, 4  ;;  %v1535_v3 = vperm.slane %v1527_v0, %v2266_v32  ;;  %v1536_v6 = vrot.slane %v1531_v63, 4  ;;  %v1539_v7 = vsel %vm255_vm1, %v1531_v63, %v1538_v60 }
 0x37f   :  { %v1547_v8 = vperm.slane %v1539_v7, %v2288_v57  ;;  %v1614_v51 = vrot.slane %v2725_v62, 4  ;;  %v1618_v50 = vrot.slane %v1613_v42, 4 }
 0x380   :  { %v1537_v9 = vsel %vm255_vm1, %v1536_v6, %v1519_v54  ;;  %v1548_v10 = vrot.slane %v1535_v3, 4  ;;  %v1551_v11 = vsel %vm255_vm1, %v1535_v3, %v1550_v53  ;;  %v1397_v12 = vpop.f32.mrf.mxu3  ;;  %v1617_v53 = vsel %vm255_vm1, %v2725_v62, %v1616_v58 }
 0x381   :  { %v1543_v18 = vperm.slane %v1537_v9, %v2288_v57  ;;  %v1559_v19 = vperm.slane %v1551_v11, %v2288_v57  ;;  %v1562_v16 = vrot.slane %v1547_v8, 4  ;;  %v2740_v26 = vsel %vm255_vm1, %v1614_v51, %v1597_v15  ;;  %v1828_v9 = vld [vmem:[#allocation15] sm:$0xff] }
 0x382   :  { %v1549_v22 = vsel %vm255_vm1, %v1548_v10, %v1523_v44  ;;  %v1416_v49 = vpop.f32.mrf.mxu0  ;;  %v1619_v2 = vsel %vm255_vm1, %v1618_v50, %v1601_v33 }
 0x383   :  { %v1555_v13 = vperm.slane %v1549_v22, %v2288_v57  ;;  %v1560_v27 = vrot.slane %v1543_v18, 4  ;;  %v1563_v29 = vsel %vm255_vm1, 0.0, %v1562_v16  ;;  %v1566_v30 = vrot.slane %v1559_v19, 4 }
 0x384   :  { %v1622_v31 = vsel %vm255_vm1, %v1562_v16, %v1543_v18  ;;  %v1627_v21 = vrot.slane %v1563_v29, 4 }
 0x385   :  { %v1561_v34 = vsel %vm255_vm1, 0.0, %v1560_v27  ;;  %v1564_v35 = vrot.slane %v1555_v13, 4  ;;  %v1567_v37 = vsel %vm255_vm1, 0.0, %v1566_v30  ;;  %v1626_v39 = vperm.slane %v1622_v31, %v2266_v32  ;;  %v1882_v31 = vld [vmem:[%s2799_s10] ss:$0 sm:$0xff] }
 0x386   :  { %v1628_v40 = vsel %vm255_vm1, %v1627_v21, %v1561_v34  ;;  %v1633_v36 = vsel %vm255_vm1, %v1566_v30, %v1555_v13  ;;  %v1638_v41 = vrot.slane %v1567_v37, 4 }
 0x387   :  { %v1632_v46 = vperm.slane %v1628_v40, %v2266_v32  ;;  %v1646_v38 = vrot.slane %v1626_v39, 4  ;;  %v1565_v43 = vsel %vm255_vm1, 0.0, %v1564_v35  ;;  %v1637_v25 = vperm.slane %v1633_v36, %v2266_v32 }
 0x388   :  { %v1639_v45 = vsel %vm255_vm1, %v1638_v41, %v1565_v43 }
 0x389   :  { %v1643_v14 = vperm.slane %v1639_v45, %v2266_v32  ;;  %v1647_v20 = vsel %vm255_vm1, %v1632_v46, %v1646_v38  ;;  %v1658_v28 = vrot.slane %v1637_v25, 4  ;;  %v1644_v24 = vrot.slane %v1632_v46, 4 }
 0x38a   :  { %v1655_v61 = vperm.slane %v1647_v20, %v2288_v57  ;;  %v1621_v32 = vsel %vm255_vm1, %v1613_v42, %v1620_v59 }
 0x38b   :  { %v1659_v47 = vsel %vm255_vm1, %v1643_v14, %v1658_v28  ;;  %v1645_v54 = vsel %vm255_vm1, %v1644_v24, %v1626_v39  ;;  %v1656_v55 = vrot.slane %v1643_v14, 4 }
 0x38c   :  { %v1667_v52 = vperm.slane %v1659_v47, %v2288_v57  ;;  %v1674_v56 = vrot.slane %v1655_v61, 4  ;;  %v1651_v5 = vperm.slane %v1645_v54, %v2288_v57 }
 0x38d   :  { %v1657_v44 = vsel %vm255_vm1, %v1656_v55, %v1637_v25 }
 0x38e   :  { %v1675_v60 = vsel %vm255_vm1, %v1667_v52, %v1674_v56  ;;  %v1672_v63 = vrot.slane %v1667_v52, 4  ;;  %v1663_v1 = vperm.slane %v1657_v44, %v2288_v57  ;;  %v1670_v48 = vrot.slane %v1651_v5, 4  ;;  %v1829_v57 = vld [vmem:[#allocation15 + $0x8] sm:$0xff] }
 0x38f   :  { %v1874_v0 = vpack.i.bf16 %v1675_v60, %v1621_v32  ;;  %1738 = vmatpush.bf16.msra.mxu3 %v1829_v57 }
 0x390   :  { %v1673_v4 = vsel %vm255_vm1, %v1672_v63, %v1655_v61  ;;  %v1668_v3 = vrot.slane %v1663_v1, 4  ;;  %v1671_v6 = vsel %vm255_vm1, %v1663_v1, %v1670_v48 }
 0x391   :  { %1875 = vrot.lane.b32.xlu0 %v1874_v0, %s2133_s8  ;;  %v1869_v7 = vpack.i.bf16 %v1673_v4, %v1619_v2  ;;  %v1864_v8 = vpack.i.bf16 %v1671_v6, %v1617_v53 }
 0x392   :  { %v1669_v51 = vsel %vm255_vm1, %v1668_v3, %v1651_v5 }
 0x393   :  { %1870 = vrot.lane.b32.xlu1 %v1869_v7, %s2134_s18  ;;  %1865 = vrot.lane.b32.xlu2 %v1864_v8, %s2119_s26 }
 0x394   :  { %1739 = vmatpush.bf16.msra.mxu3 %v1828_v9 }
 0x3ed   :  { %v1866_v10 = vpop.permute.xlu2 %1865 }
 0x3ee   :  { %v1868_v11 = vunpack.i.h.bf16 %v1866_v10  ;;  %v1867_v62 = vunpack.i.l.bf16 %v1866_v10 }
 0x3f0   :  { %v1700_v16 = vsel %vm1046_vm3, %v2740_v26, %v1867_v62  ;;  %v1701_v17 = vsel %vm1046_vm3, %v1669_v51, %v1868_v11 }
 0x403   :  { %v1876_v12 = vpop.permute.xlu0 %1875 }
 0x404   :  { %v1878_v22 = vunpack.i.h.bf16 %v1876_v12  ;;  %v1877_v49 = vunpack.i.l.bf16 %v1876_v12 }
 0x405   :  { %v1871_v15 = vpop.permute.xlu1 %1870 }
 0x406   :  { %v1873_v18 = vunpack.i.h.bf16 %v1871_v15  ;;  %v1872_v19 = vunpack.i.l.bf16 %v1871_v15 }
 0x408   :  { %v1703_v23 = vsel %vm1702_vm5, %v1700_v16, %v1872_v19  ;;  %v1704_v13 = vsel %vm1702_vm5, %v1701_v17, %v1873_v18 }
 0x409   :  { %v1706_v27 = vsel %vm1705_vm6, %v1703_v23, %v1877_v49  ;;  %v1707_v29 = vsel %vm1705_vm6, %v1704_v13, %v1878_v22 }
 0x40a   :  { %v1708_v30 = vpack.c.bf16 %v1707_v29, %v1706_v27 }
 0x40c   :  { %1821 = vmatmul.msk.bf16.vlgmr.msra.gmra.mxu3 %vm179_vm0, %v1708_v30 }
 0x48f   :  { %v1741_v21 = vpop.f32.mrf.mxu3 }
 0x490   :  { %v1742_v33 = vadd.f32 %v1882_v31, %v1741_v21 }
 0x492   :  { %1746 = vst.msk [vmem:[#allocation16] sm:$0xff] %vm179_vm0, %v1742_v33 }
 0x497   :  { %v1743_v26 = vpop.f32.mrf.mxu3 }
 0x498   :  { %v1744_v34 = vadd.f32 %v1882_v31, %v1743_v26 }
 0x49a   :  { %1747 = vst.msk [vmem:[#allocation16 + $0x8] sm:$0xff] %vm179_vm0, %v1744_v34 }
 0x49b   :  { %1760 = dma.vmem_to_hbm [thread:$0]  %s1753_s22, 256, %s1755_s0, [#allocation6], %s2118_s25, %s2118_s25, %s2119_s26  }
 0x49c   :  { %2115 = dma.done.wait [#allocation6], 256  }
 0x49d   :  { %2116 = vsyncadd [#allocation6], 4294967040 }
 0x49e   :  { %1765 = vsyncpa [#allocation5], 1 }
 0x49f   :  { %1766 = vsyncpa [#allocation8], 1 }
 0x4a0   :  { %1767 = vsyncpa [#allocation11], 1 }
 0x4a1   :  { %1768 = vsyncpa [#allocation14], 1 }
 0x4a2   :  { %1769 = vsyncpa [#allocation6], 1 }

</bundles_post_ra>
